<compile_context>
chip_gen: v5e
topology: v5e:2x2
jax: 0.10.0
libtpu: 0.0.40
codegen_flags: <defaults>
</compile_context>

<pallas_src>
import functools

import jax
import jax.numpy as jnp
from jax.experimental import pallas as pl
from jax.experimental.pallas import tpu as pltpu


# -----------------------------------------------------------------------------
# Kernel 1: linear layer with PyTorch-layout weight:  y = x @ w.T + b
#   x: (M, K), w: (N_out, K), b: (1, N_out)  ->  y: (M, N_out)
# Grid tiles the N_out axis so the weight streams block-by-block.
# -----------------------------------------------------------------------------
def _linear_kernel(x_ref, w_ref, b_ref, o_ref):
    acc = jax.lax.dot_general(
        x_ref[...], w_ref[...],
        dimension_numbers=(((1,), (1,)), ((), ())),   # contract K with K (no transpose copy)
        preferred_element_type=jnp.float32)
    o_ref[...] = (acc + b_ref[...]).astype(o_ref.dtype)


def linear_pt(x, w, b, *, block_n):
    M, K = x.shape
    n_out, k2 = w.shape
    assert K == k2 and n_out % block_n == 0
    grid = (n_out // block_n,)
    return pl.pallas_call(
        _linear_kernel,
        out_shape=jax.ShapeDtypeStruct((M, n_out), x.dtype),
        grid=grid,
        in_specs=[
            pl.BlockSpec((M, K), lambda j: (0, 0)),
            pl.BlockSpec((block_n, K), lambda j: (j, 0)),
            pl.BlockSpec((1, block_n), lambda j: (0, j)),
        ],
        out_specs=pl.BlockSpec((M, block_n), lambda j: (0, j)),
        compiler_params=pltpu.CompilerParams(dimension_semantics=("parallel",)),
    )(x, w, b.reshape(1, n_out))


# -----------------------------------------------------------------------------
# Kernel 2: fused per-batch-element multi-head SDPA + head merge + output proj.
#   qkv  : (N*L, 3E)  (batch-major rows: batch n owns rows n*L .. n*L+L)
#   out_w: (E, E)  PyTorch (out_features, in_features) layout
#   out_b: (1, E)
#   out  : (N, L, E)   (lane-dense (L, E) store per grid step)
# Heads are processed with a static unrolled loop (dynamic lane offsets are
# restricted on TPU); per-head results are assembled into a (L, E) VMEM scratch
# slab which then feeds a single (L,E)x(E,E)^T output-projection matmul.
# -----------------------------------------------------------------------------
def _mhsa_core_kernel(qkv_ref, w_ref, b_ref, o_ref, heads_ref, *,
                      num_heads, head_dim, scale):
    E = num_heads * head_dim
    for h in range(num_heads):
        lo = h * head_dim
        hi = lo + head_dim
        q = qkv_ref[:, lo:hi]                       # (L, Dh)
        k = qkv_ref[:, E + lo:E + hi]               # (L, Dh)
        v = qkv_ref[:, 2 * E + lo:2 * E + hi]       # (L, Dh)
        # scores = q @ k.T  (contract head_dim of both operands; no transpose copy)
        s = jax.lax.dot_general(
            q, k, dimension_numbers=(((1,), (1,)), ((), ())),
            preferred_element_type=jnp.float32) * scale       # (L, L)
        s = s - jnp.max(s, axis=-1, keepdims=True)
        p = jnp.exp(s)
        p = p * pl.reciprocal(jnp.sum(p, axis=-1, keepdims=True), approx=True)
        heads_ref[:, lo:hi] = jnp.dot(p, v, preferred_element_type=jnp.float32)
    # Fused output projection: (L, E) @ out_w.T + b   (out_w kept in PyTorch layout)
    proj = jax.lax.dot_general(
        heads_ref[...], w_ref[...],
        dimension_numbers=(((1,), (1,)), ((), ())),
        preferred_element_type=jnp.float32)                   # (L, E)
    o_ref[0] = (proj + b_ref[...]).astype(o_ref.dtype)


def mhsa_core(qkv, out_w, out_b, *, batch, seq_len, num_heads, head_dim):
    E = num_heads * head_dim
    kernel = functools.partial(
        _mhsa_core_kernel, num_heads=num_heads, head_dim=head_dim,
        scale=1.0 / float(head_dim) ** 0.5)
    return pl.pallas_call(
        kernel,
        out_shape=jax.ShapeDtypeStruct((batch, seq_len, E), qkv.dtype),
        grid=(batch,),
        in_specs=[
            pl.BlockSpec((seq_len, 3 * E), lambda n: (n, 0)),
            pl.BlockSpec((E, E), lambda n: (0, 0)),
            pl.BlockSpec((1, E), lambda n: (0, 0)),
        ],
        out_specs=pl.BlockSpec((1, seq_len, E), lambda n: (n, 0, 0)),
        scratch_shapes=[pltpu.VMEM((seq_len, E), jnp.float32)],
        compiler_params=pltpu.CompilerParams(dimension_semantics=("parallel",)),
    )(qkv, out_w, out_b.reshape(1, E))


# -----------------------------------------------------------------------------
# Full module forward: nn.MultiheadAttention(embed_dim=768, num_heads=H)(x,x,x)[0]
# -----------------------------------------------------------------------------
def multi_head_self_attention(x, params, num_heads):
    L, N, E = x.shape
    Dh = E // num_heads

    in_w = params["in_proj_weight"]    # (3E, E)  PyTorch (out, in) layout
    in_b = params["in_proj_bias"]      # (3E,)
    out_w = params["out_proj_weight"]  # (E, E)
    out_b = params["out_proj_bias"]    # (E,)

    # Batch-major flatten so each batch element's L rows are contiguous and
    # kernel 2 can read q/k/v straight out of the qkv buffer (no head-split
    # transposes). Requires L to be a multiple of 8 (f32 sublane tiling).
    x_flat = jnp.swapaxes(x, 0, 1).reshape(N * L, E)                 # (N*L, E)

    # --- input projection (Pallas, weight streamed over 3 column blocks) ---
    qkv = linear_pt(x_flat, in_w, in_b, block_n=E)                   # (N*L, 3E)

    # --- fused SDPA (all heads) + head merge + output projection (Pallas) ---
    out_nle = mhsa_core(qkv, out_w, out_b, batch=N, seq_len=L,
                        num_heads=num_heads, head_dim=Dh)            # (N, L, E)

    return jnp.swapaxes(out_nle, 0, 1)                               # (L, N, E)


# -----------------------------------------------------------------------------
# Pure-JAX reference (for a correctness sanity check)
# -----------------------------------------------------------------------------
def reference(x, params, num_heads):
    L, N, E = x.shape
    Dh = E // num_heads
    scale = 1.0 / (Dh ** 0.5)
    qkv = x.reshape(L * N, E) @ params["in_proj_weight"].T + params["in_proj_bias"]
    q, k, v = jnp.split(qkv, 3, axis=-1)

    def to_heads(t):
        return jnp.transpose(t.reshape(L, N, num_heads, Dh), (1, 2, 0, 3))

    qh, kh, vh = to_heads(q), to_heads(k), to_heads(v)
    s = jnp.einsum("bhqd,bhkd->bhqk", qh, kh) * scale
    p = jax.nn.softmax(s, axis=-1)
    o = jnp.einsum("bhqk,bhkd->bhqd", p, vh)
    o = jnp.transpose(o, (2, 0, 1, 3)).reshape(L * N, E)
    out = o @ params["out_proj_weight"].T + params["out_proj_bias"]
    return out.reshape(L, N, E)


if __name__ == "__main__":
    EMBED_DIM = 768
    NUM_HEADS = 12           # head_dim = 64
    SEQ_LEN = 8
    BATCH = 2

    key = jax.random.PRNGKey(0)
    k_x, k_w1, k_b1, k_w2, k_b2 = jax.random.split(key, 5)

    # Deterministic synthetic parameters (nn.MultiheadAttention parameter shapes).
    params = {
        "in_proj_weight": jax.random.normal(k_w1, (3 * EMBED_DIM, EMBED_DIM),
                                            jnp.float32) * 0.02,
        "in_proj_bias": jax.random.normal(k_b1, (3 * EMBED_DIM,),
                                          jnp.float32) * 0.02,
        "out_proj_weight": jax.random.normal(k_w2, (EMBED_DIM, EMBED_DIM),
                                             jnp.float32) * 0.02,
        "out_proj_bias": jax.random.normal(k_b2, (EMBED_DIM,),
                                           jnp.float32) * 0.02,
    }

    # layout: (seq_len, batch, embed_dim)
    x = jax.random.normal(k_x, (SEQ_LEN, BATCH, EMBED_DIM), jnp.float32)

    fwd = jax.jit(multi_head_self_attention, static_argnums=2)
    out = fwd(x, params, NUM_HEADS)
    out = jax.block_until_ready(out)

    ref = reference(x, params, NUM_HEADS)
    assert out.shape == (SEQ_LEN, BATCH, EMBED_DIM)
    # Tolerance accounts for the EUP approximate reciprocal in the softmax denominator.
    assert jnp.allclose(out, ref, atol=2e-3, rtol=2e-3), "mismatch vs reference"

    print("KERNEL_OK")
</pallas_src>

<mosaic_0001>
module attributes {stable_mosaic.version = 11 : i64} {
  func.func @_linear_kernel(%arg0: i32, %arg1: memref<16x768xf32, #tpu.memory_space<vmem>>, %arg2: memref<768x768xf32, #tpu.memory_space<vmem>>, %arg3: memref<1x768xf32, #tpu.memory_space<vmem>>, %arg4: memref<16x768xf32, #tpu.memory_space<vmem>>) attributes {dimension_semantics = [#tpu.dimension_semantics<parallel>], iteration_bounds = array<i64: 3>, scalar_prefetch = 0 : i64, scratch_operands = 0 : i64, tpu.core_type = #tpu.core_type<tc>, window_params = [{pipeline_mode = #tpu.pipeline_mode<synchronous>, transform_indices = @transform_0, window_bounds = array<i64: 16, 768>}, {transform_indices = @transform_1, window_bounds = array<i64: 768, 768>}, {transform_indices = @transform_2, window_bounds = array<i64: 1, 768>}, {transform_indices = @transform_3, window_bounds = array<i64: 16, 768>}]} {
    %c0 = arith.constant 0 : index
    %c0_0 = arith.constant 0 : index
    %0 = vector.load %arg1[%c0, %c0_0] : memref<16x768xf32, #tpu.memory_space<vmem>>, vector<16x768xf32>
    %c0_1 = arith.constant 0 : index
    %c0_2 = arith.constant 0 : index
    %1 = vector.load %arg2[%c0_1, %c0_2] : memref<768x768xf32, #tpu.memory_space<vmem>>, vector<768x768xf32>
    %cst = arith.constant dense<0.000000e+00> : vector<16x768xf32>
    %2 = tpu.matmul %0, %1, %cst {dimension_numbers = #tpu.dot_dimension_numbers<[1], [1], [0], [0], [0, 0, 1, 0], [], []>} : vector<16x768xf32>, vector<768x768xf32>, vector<16x768xf32> -> vector<16x768xf32>
    %c0_3 = arith.constant 0 : index
    %c0_4 = arith.constant 0 : index
    %3 = vector.load %arg3[%c0_3, %c0_4] : memref<1x768xf32, #tpu.memory_space<vmem>>, vector<1x768xf32>
    %4 = vector.broadcast %3 : vector<1x768xf32> to vector<16x768xf32>
    %5 = arith.addf %2, %4 : vector<16x768xf32>
    %c0_5 = arith.constant 0 : index
    %c0_6 = arith.constant 0 : index
    %6 = vector.load %arg4[%c0_5, %c0_6] : memref<16x768xf32, #tpu.memory_space<vmem>>, vector<16x768xf32>
    tpu.vector_store %arg4[%c0_5, %c0_6], %5 {strides = array<i32>} : memref<16x768xf32, #tpu.memory_space<vmem>>, vector<16x768xf32>,
    return
  }
  func.func @transform_0(%arg0: i32) -> (i32, i32) {
    %c0_i32 = arith.constant 0 : i32
    %c0_i32_0 = arith.constant 0 : i32
    %c0_i32_1 = arith.constant 0 : i32
    return %c0_i32, %c0_i32_0 : i32, i32
  }
  func.func @transform_1(%arg0: i32) -> (i32, i32) {
    %c0_i32 = arith.constant 0 : i32
    %c0_i32_0 = arith.constant 0 : i32
    return %arg0, %c0_i32 : i32, i32
  }
  func.func @transform_2(%arg0: i32) -> (i32, i32) {
    %c0_i32 = arith.constant 0 : i32
    %c0_i32_0 = arith.constant 0 : i32
    return %c0_i32, %arg0 : i32, i32
  }
  func.func @transform_3(%arg0: i32) -> (i32, i32) {
    %c0_i32 = arith.constant 0 : i32
    %c0_i32_0 = arith.constant 0 : i32
    return %c0_i32, %arg0 : i32, i32
  }
}

module attributes {stable_mosaic.version = 11 : i64} {
  func.func @_mhsa_core_kernel(%arg0: i32, %arg1: memref<8x2304xf32, #tpu.memory_space<vmem>>, %arg2: memref<768x768xf32, #tpu.memory_space<vmem>>, %arg3: memref<1x768xf32, #tpu.memory_space<vmem>>, %arg4: memref<1x8x768xf32, #tpu.memory_space<vmem>>, %arg5: memref<8x768xf32, #tpu.memory_space<vmem>>) attributes {dimension_semantics = [#tpu.dimension_semantics<parallel>], iteration_bounds = array<i64: 2>, scalar_prefetch = 0 : i64, scratch_operands = 1 : i64, tpu.core_type = #tpu.core_type<tc>, window_params = [{transform_indices = @transform_0, window_bounds = array<i64: 8, 2304>}, {pipeline_mode = #tpu.pipeline_mode<synchronous>, transform_indices = @transform_1, window_bounds = array<i64: 768, 768>}, {pipeline_mode = #tpu.pipeline_mode<synchronous>, transform_indices = @transform_2, window_bounds = array<i64: 1, 768>}, {transform_indices = @transform_3, window_bounds = array<i64: 1, 8, 768>}]} {
    %c0 = arith.constant 0 : index
    %c0_0 = arith.constant 0 : index
    %0 = vector.load %arg1[%c0, %c0_0] : memref<8x2304xf32, #tpu.memory_space<vmem>>, vector<8x64xf32>
    %c0_1 = arith.constant 0 : index
    %c768 = arith.constant 768 : index
    %1 = vector.load %arg1[%c0_1, %c768] : memref<8x2304xf32, #tpu.memory_space<vmem>>, vector<8x64xf32>
    %c0_2 = arith.constant 0 : index
    %c1536 = arith.constant 1536 : index
    %2 = vector.load %arg1[%c0_2, %c1536] : memref<8x2304xf32, #tpu.memory_space<vmem>>, vector<8x64xf32>
    %cst = arith.constant dense<0.000000e+00> : vector<8x8xf32>
    %3 = tpu.matmul %0, %1, %cst {dimension_numbers = #tpu.dot_dimension_numbers<[1], [1], [0], [0], [0, 0, 1, 0], [], []>} : vector<8x64xf32>, vector<8x64xf32>, vector<8x8xf32> -> vector<8x8xf32>
    %cst_3 = arith.constant 1.250000e-01 : f32
    %4 = vector.broadcast %cst_3 : f32 to vector<8x8xf32>
    %5 = arith.mulf %3, %4 : vector<8x8xf32>
    %cst_4 = arith.constant dense<0xFF800000> : vector<8xf32>
    %6 = vector.multi_reduction <maximumf>, %5, %cst_4 [1] : vector<8x8xf32> to vector<8xf32>
    %7 = vector.shape_cast %6 : vector<8xf32> to vector<8x1xf32>
    %8 = vector.broadcast %7 : vector<8x1xf32> to vector<8x8xf32>
    %9 = arith.subf %5, %8 : vector<8x8xf32>
    %10 = math.exp %9 : vector<8x8xf32>
    %cst_5 = arith.constant dense<0.000000e+00> : vector<8xf32>
    %11 = vector.multi_reduction <add>, %10, %cst_5 [1] : vector<8x8xf32> to vector<8xf32>
    %12 = vector.shape_cast %11 : vector<8xf32> to vector<8x1xf32>
    %13 = tpu.reciprocal %12 {approx = true} : vector<8x1xf32> -> vector<8x1xf32>
    %14 = vector.broadcast %13 : vector<8x1xf32> to vector<8x8xf32>
    %15 = arith.mulf %10, %14 : vector<8x8xf32>
    %cst_6 = arith.constant dense<0.000000e+00> : vector<8x64xf32>
    %16 = tpu.matmul %15, %2, %cst_6 {dimension_numbers = #tpu.dot_dimension_numbers<[1], [0], [0], [1], [0, 0, 1, 1], [], []>} : vector<8x8xf32>, vector<8x64xf32>, vector<8x64xf32> -> vector<8x64xf32>
    %c0_7 = arith.constant 0 : index
    %c0_8 = arith.constant 0 : index
    %17 = vector.load %arg5[%c0_7, %c0_8] : memref<8x768xf32, #tpu.memory_space<vmem>>, vector<8x64xf32>
    tpu.vector_store %arg5[%c0_7, %c0_8], %16 {strides = array<i32>} : memref<8x768xf32, #tpu.memory_space<vmem>>, vector<8x64xf32>,
    %c0_9 = arith.constant 0 : index
    %c64 = arith.constant 64 : index
    %18 = vector.load %arg1[%c0_9, %c64] : memref<8x2304xf32, #tpu.memory_space<vmem>>, vector<8x64xf32>
    %c0_10 = arith.constant 0 : index
    %c832 = arith.constant 832 : index
    %19 = vector.load %arg1[%c0_10, %c832] : memref<8x2304xf32, #tpu.memory_space<vmem>>, vector<8x64xf32>
    %c0_11 = arith.constant 0 : index
    %c1600 = arith.constant 1600 : index
    %20 = vector.load %arg1[%c0_11, %c1600] : memref<8x2304xf32, #tpu.memory_space<vmem>>, vector<8x64xf32>
    %cst_12 = arith.constant dense<0.000000e+00> : vector<8x8xf32>
    %21 = tpu.matmul %18, %19, %cst_12 {dimension_numbers = #tpu.dot_dimension_numbers<[1], [1], [0], [0], [0, 0, 1, 0], [], []>} : vector<8x64xf32>, vector<8x64xf32>, vector<8x8xf32> -> vector<8x8xf32>
    %cst_13 = arith.constant 1.250000e-01 : f32
    %22 = vector.broadcast %cst_13 : f32 to vector<8x8xf32>
    %23 = arith.mulf %21, %22 : vector<8x8xf32>
    %cst_14 = arith.constant dense<0xFF800000> : vector<8xf32>
    %24 = vector.multi_reduction <maximumf>, %23, %cst_14 [1] : vector<8x8xf32> to vector<8xf32>
    %25 = vector.shape_cast %24 : vector<8xf32> to vector<8x1xf32>
    %26 = vector.broadcast %25 : vector<8x1xf32> to vector<8x8xf32>
    %27 = arith.subf %23, %26 : vector<8x8xf32>
    %28 = math.exp %27 : vector<8x8xf32>
    %cst_15 = arith.constant dense<0.000000e+00> : vector<8xf32>
    %29 = vector.multi_reduction <add>, %28, %cst_15 [1] : vector<8x8xf32> to vector<8xf32>
    %30 = vector.shape_cast %29 : vector<8xf32> to vector<8x1xf32>
    %31 = tpu.reciprocal %30 {approx = true} : vector<8x1xf32> -> vector<8x1xf32>
    %32 = vector.broadcast %31 : vector<8x1xf32> to vector<8x8xf32>
    %33 = arith.mulf %28, %32 : vector<8x8xf32>
    %cst_16 = arith.constant dense<0.000000e+00> : vector<8x64xf32>
    %34 = tpu.matmul %33, %20, %cst_16 {dimension_numbers = #tpu.dot_dimension_numbers<[1], [0], [0], [1], [0, 0, 1, 1], [], []>} : vector<8x8xf32>, vector<8x64xf32>, vector<8x64xf32> -> vector<8x64xf32>
    %c0_17 = arith.constant 0 : index
    %c64_18 = arith.constant 64 : index
    %35 = vector.load %arg5[%c0_17, %c64_18] : memref<8x768xf32, #tpu.memory_space<vmem>>, vector<8x64xf32>
    tpu.vector_store %arg5[%c0_17, %c64_18], %34 {strides = array<i32>} : memref<8x768xf32, #tpu.memory_space<vmem>>, vector<8x64xf32>,
    %c0_19 = arith.constant 0 : index
    %c128 = arith.constant 128 : index
    %36 = vector.load %arg1[%c0_19, %c128] : memref<8x2304xf32, #tpu.memory_space<vmem>>, vector<8x64xf32>
    %c0_20 = arith.constant 0 : index
    %c896 = arith.constant 896 : index
    %37 = vector.load %arg1[%c0_20, %c896] : memref<8x2304xf32, #tpu.memory_space<vmem>>, vector<8x64xf32>
    %c0_21 = arith.constant 0 : index
    %c1664 = arith.constant 1664 : index
    %38 = vector.load %arg1[%c0_21, %c1664] : memref<8x2304xf32, #tpu.memory_space<vmem>>, vector<8x64xf32>
    %cst_22 = arith.constant dense<0.000000e+00> : vector<8x8xf32>
    %39 = tpu.matmul %36, %37, %cst_22 {dimension_numbers = #tpu.dot_dimension_numbers<[1], [1], [0], [0], [0, 0, 1, 0], [], []>} : vector<8x64xf32>, vector<8x64xf32>, vector<8x8xf32> -> vector<8x8xf32>
    %cst_23 = arith.constant 1.250000e-01 : f32
    %40 = vector.broadcast %cst_23 : f32 to vector<8x8xf32>
    %41 = arith.mulf %39, %40 : vector<8x8xf32>
    %cst_24 = arith.constant dense<0xFF800000> : vector<8xf32>
    %42 = vector.multi_reduction <maximumf>, %41, %cst_24 [1] : vector<8x8xf32> to vector<8xf32>
    %43 = vector.shape_cast %42 : vector<8xf32> to vector<8x1xf32>
    %44 = vector.broadcast %43 : vector<8x1xf32> to vector<8x8xf32>
    %45 = arith.subf %41, %44 : vector<8x8xf32>
    %46 = math.exp %45 : vector<8x8xf32>
    %cst_25 = arith.constant dense<0.000000e+00> : vector<8xf32>
    %47 = vector.multi_reduction <add>, %46, %cst_25 [1] : vector<8x8xf32> to vector<8xf32>
    %48 = vector.shape_cast %47 : vector<8xf32> to vector<8x1xf32>
    %49 = tpu.reciprocal %48 {approx = true} : vector<8x1xf32> -> vector<8x1xf32>
    %50 = vector.broadcast %49 : vector<8x1xf32> to vector<8x8xf32>
    %51 = arith.mulf %46, %50 : vector<8x8xf32>
    %cst_26 = arith.constant dense<0.000000e+00> : vector<8x64xf32>
    %52 = tpu.matmul %51, %38, %cst_26 {dimension_numbers = #tpu.dot_dimension_numbers<[1], [0], [0], [1], [0, 0, 1, 1], [], []>} : vector<8x8xf32>, vector<8x64xf32>, vector<8x64xf32> -> vector<8x64xf32>
    %c0_27 = arith.constant 0 : index
    %c128_28 = arith.constant 128 : index
    %53 = vector.load %arg5[%c0_27, %c128_28] : memref<8x768xf32, #tpu.memory_space<vmem>>, vector<8x64xf32>
    tpu.vector_store %arg5[%c0_27, %c128_28], %52 {strides = array<i32>} : memref<8x768xf32, #tpu.memory_space<vmem>>, vector<8x64xf32>,
    %c0_29 = arith.constant 0 : index
    %c192 = arith.constant 192 : index
    %54 = vector.load %arg1[%c0_29, %c192] : memref<8x2304xf32, #tpu.memory_space<vmem>>, vector<8x64xf32>
    %c0_30 = arith.constant 0 : index
    %c960 = arith.constant 960 : index
    %55 = vector.load %arg1[%c0_30, %c960] : memref<8x2304xf32, #tpu.memory_space<vmem>>, vector<8x64xf32>
    %c0_31 = arith.constant 0 : index
    %c1728 = arith.constant 1728 : index
    %56 = vector.load %arg1[%c0_31, %c1728] : memref<8x2304xf32, #tpu.memory_space<vmem>>, vector<8x64xf32>
    %cst_32 = arith.constant dense<0.000000e+00> : vector<8x8xf32>
    %57 = tpu.matmul %54, %55, %cst_32 {dimension_numbers = #tpu.dot_dimension_numbers<[1], [1], [0], [0], [0, 0, 1, 0], [], []>} : vector<8x64xf32>, vector<8x64xf32>, vector<8x8xf32> -> vector<8x8xf32>
    %cst_33 = arith.constant 1.250000e-01 : f32
    %58 = vector.broadcast %cst_33 : f32 to vector<8x8xf32>
    %59 = arith.mulf %57, %58 : vector<8x8xf32>
    %cst_34 = arith.constant dense<0xFF800000> : vector<8xf32>
    %60 = vector.multi_reduction <maximumf>, %59, %cst_34 [1] : vector<8x8xf32> to vector<8xf32>
    %61 = vector.shape_cast %60 : vector<8xf32> to vector<8x1xf32>
    %62 = vector.broadcast %61 : vector<8x1xf32> to vector<8x8xf32>
    %63 = arith.subf %59, %62 : vector<8x8xf32>
    %64 = math.exp %63 : vector<8x8xf32>
    %cst_35 = arith.constant dense<0.000000e+00> : vector<8xf32>
    %65 = vector.multi_reduction <add>, %64, %cst_35 [1] : vector<8x8xf32> to vector<8xf32>
    %66 = vector.shape_cast %65 : vector<8xf32> to vector<8x1xf32>
    %67 = tpu.reciprocal %66 {approx = true} : vector<8x1xf32> -> vector<8x1xf32>
    %68 = vector.broadcast %67 : vector<8x1xf32> to vector<8x8xf32>
    %69 = arith.mulf %64, %68 : vector<8x8xf32>
    %cst_36 = arith.constant dense<0.000000e+00> : vector<8x64xf32>
    %70 = tpu.matmul %69, %56, %cst_36 {dimension_numbers = #tpu.dot_dimension_numbers<[1], [0], [0], [1], [0, 0, 1, 1], [], []>} : vector<8x8xf32>, vector<8x64xf32>, vector<8x64xf32> -> vector<8x64xf32>
    %c0_37 = arith.constant 0 : index
    %c192_38 = arith.constant 192 : index
    %71 = vector.load %arg5[%c0_37, %c192_38] : memref<8x768xf32, #tpu.memory_space<vmem>>, vector<8x64xf32>
    tpu.vector_store %arg5[%c0_37, %c192_38], %70 {strides = array<i32>} : memref<8x768xf32, #tpu.memory_space<vmem>>, vector<8x64xf32>,
    %c0_39 = arith.constant 0 : index
    %c256 = arith.constant 256 : index
    %72 = vector.load %arg1[%c0_39, %c256] : memref<8x2304xf32, #tpu.memory_space<vmem>>, vector<8x64xf32>
    %c0_40 = arith.constant 0 : index
    %c1024 = arith.constant 1024 : index
    %73 = vector.load %arg1[%c0_40, %c1024] : memref<8x2304xf32, #tpu.memory_space<vmem>>, vector<8x64xf32>
    %c0_41 = arith.constant 0 : index
    %c1792 = arith.constant 1792 : index
    %74 = vector.load %arg1[%c0_41, %c1792] : memref<8x2304xf32, #tpu.memory_space<vmem>>, vector<8x64xf32>
    %cst_42 = arith.constant dense<0.000000e+00> : vector<8x8xf32>
    %75 = tpu.matmul %72, %73, %cst_42 {dimension_numbers = #tpu.dot_dimension_numbers<[1], [1], [0], [0], [0, 0, 1, 0], [], []>} : vector<8x64xf32>, vector<8x64xf32>, vector<8x8xf32> -> vector<8x8xf32>
    %cst_43 = arith.constant 1.250000e-01 : f32
    %76 = vector.broadcast %cst_43 : f32 to vector<8x8xf32>
    %77 = arith.mulf %75, %76 : vector<8x8xf32>
    %cst_44 = arith.constant dense<0xFF800000> : vector<8xf32>
    %78 = vector.multi_reduction <maximumf>, %77, %cst_44 [1] : vector<8x8xf32> to vector<8xf32>
    %79 = vector.shape_cast %78 : vector<8xf32> to vector<8x1xf32>
    %80 = vector.broadcast %79 : vector<8x1xf32> to vector<8x8xf32>
    %81 = arith.subf %77, %80 : vector<8x8xf32>
    %82 = math.exp %81 : vector<8x8xf32>
    %cst_45 = arith.constant dense<0.000000e+00> : vector<8xf32>
    %83 = vector.multi_reduction <add>, %82, %cst_45 [1] : vector<8x8xf32> to vector<8xf32>
    %84 = vector.shape_cast %83 : vector<8xf32> to vector<8x1xf32>
    %85 = tpu.reciprocal %84 {approx = true} : vector<8x1xf32> -> vector<8x1xf32>
    %86 = vector.broadcast %85 : vector<8x1xf32> to vector<8x8xf32>
    %87 = arith.mulf %82, %86 : vector<8x8xf32>
    %cst_46 = arith.constant dense<0.000000e+00> : vector<8x64xf32>
    %88 = tpu.matmul %87, %74, %cst_46 {dimension_numbers = #tpu.dot_dimension_numbers<[1], [0], [0], [1], [0, 0, 1, 1], [], []>} : vector<8x8xf32>, vector<8x64xf32>, vector<8x64xf32> -> vector<8x64xf32>
    %c0_47 = arith.constant 0 : index
    %c256_48 = arith.constant 256 : index
    %89 = vector.load %arg5[%c0_47, %c256_48] : memref<8x768xf32, #tpu.memory_space<vmem>>, vector<8x64xf32>
    tpu.vector_store %arg5[%c0_47, %c256_48], %88 {strides = array<i32>} : memref<8x768xf32, #tpu.memory_space<vmem>>, vector<8x64xf32>,
    %c0_49 = arith.constant 0 : index
    %c320 = arith.constant 320 : index
    %90 = vector.load %arg1[%c0_49, %c320] : memref<8x2304xf32, #tpu.memory_space<vmem>>, vector<8x64xf32>
    %c0_50 = arith.constant 0 : index
    %c1088 = arith.constant 1088 : index
    %91 = vector.load %arg1[%c0_50, %c1088] : memref<8x2304xf32, #tpu.memory_space<vmem>>, vector<8x64xf32>
    %c0_51 = arith.constant 0 : index
    %c1856 = arith.constant 1856 : index
    %92 = vector.load %arg1[%c0_51, %c1856] : memref<8x2304xf32, #tpu.memory_space<vmem>>, vector<8x64xf32>
    %cst_52 = arith.constant dense<0.000000e+00> : vector<8x8xf32>
    %93 = tpu.matmul %90, %91, %cst_52 {dimension_numbers = #tpu.dot_dimension_numbers<[1], [1], [0], [0], [0, 0, 1, 0], [], []>} : vector<8x64xf32>, vector<8x64xf32>, vector<8x8xf32> -> vector<8x8xf32>
    %cst_53 = arith.constant 1.250000e-01 : f32
    %94 = vector.broadcast %cst_53 : f32 to vector<8x8xf32>
    %95 = arith.mulf %93, %94 : vector<8x8xf32>
    %cst_54 = arith.constant dense<0xFF800000> : vector<8xf32>
    %96 = vector.multi_reduction <maximumf>, %95, %cst_54 [1] : vector<8x8xf32> to vector<8xf32>
    %97 = vector.shape_cast %96 : vector<8xf32> to vector<8x1xf32>
    %98 = vector.broadcast %97 : vector<8x1xf32> to vector<8x8xf32>
    %99 = arith.subf %95, %98 : vector<8x8xf32>
    %100 = math.exp %99 : vector<8x8xf32>
    %cst_55 = arith.constant dense<0.000000e+00> : vector<8xf32>
    %101 = vector.multi_reduction <add>, %100, %cst_55 [1] : vector<8x8xf32> to vector<8xf32>
    %102 = vector.shape_cast %101 : vector<8xf32> to vector<8x1xf32>
    %103 = tpu.reciprocal %102 {approx = true} : vector<8x1xf32> -> vector<8x1xf32>
    %104 = vector.broadcast %103 : vector<8x1xf32> to vector<8x8xf32>
    %105 = arith.mulf %100, %104 : vector<8x8xf32>
    %cst_56 = arith.constant dense<0.000000e+00> : vector<8x64xf32>
    %106 = tpu.matmul %105, %92, %cst_56 {dimension_numbers = #tpu.dot_dimension_numbers<[1], [0], [0], [1], [0, 0, 1, 1], [], []>} : vector<8x8xf32>, vector<8x64xf32>, vector<8x64xf32> -> vector<8x64xf32>
    %c0_57 = arith.constant 0 : index
    %c320_58 = arith.constant 320 : index
    %107 = vector.load %arg5[%c0_57, %c320_58] : memref<8x768xf32, #tpu.memory_space<vmem>>, vector<8x64xf32>
    tpu.vector_store %arg5[%c0_57, %c320_58], %106 {strides = array<i32>} : memref<8x768xf32, #tpu.memory_space<vmem>>, vector<8x64xf32>,
    %c0_59 = arith.constant 0 : index
    %c384 = arith.constant 384 : index
    %108 = vector.load %arg1[%c0_59, %c384] : memref<8x2304xf32, #tpu.memory_space<vmem>>, vector<8x64xf32>
    %c0_60 = arith.constant 0 : index
    %c1152 = arith.constant 1152 : index
    %109 = vector.load %arg1[%c0_60, %c1152] : memref<8x2304xf32, #tpu.memory_space<vmem>>, vector<8x64xf32>
    %c0_61 = arith.constant 0 : index
    %c1920 = arith.constant 1920 : index
    %110 = vector.load %arg1[%c0_61, %c1920] : memref<8x2304xf32, #tpu.memory_space<vmem>>, vector<8x64xf32>
    %cst_62 = arith.constant dense<0.000000e+00> : vector<8x8xf32>
    %111 = tpu.matmul %108, %109, %cst_62 {dimension_numbers = #tpu.dot_dimension_numbers<[1], [1], [0], [0], [0, 0, 1, 0], [], []>} : vector<8x64xf32>, vector<8x64xf32>, vector<8x8xf32> -> vector<8x8xf32>
    %cst_63 = arith.constant 1.250000e-01 : f32
    %112 = vector.broadcast %cst_63 : f32 to vector<8x8xf32>
    %113 = arith.mulf %111, %112 : vector<8x8xf32>
    %cst_64 = arith.constant dense<0xFF800000> : vector<8xf32>
    %114 = vector.multi_reduction <maximumf>, %113, %cst_64 [1] : vector<8x8xf32> to vector<8xf32>
    %115 = vector.shape_cast %114 : vector<8xf32> to vector<8x1xf32>
    %116 = vector.broadcast %115 : vector<8x1xf32> to vector<8x8xf32>
    %117 = arith.subf %113, %116 : vector<8x8xf32>
    %118 = math.exp %117 : vector<8x8xf32>
    %cst_65 = arith.constant dense<0.000000e+00> : vector<8xf32>
    %119 = vector.multi_reduction <add>, %118, %cst_65 [1] : vector<8x8xf32> to vector<8xf32>
    %120 = vector.shape_cast %119 : vector<8xf32> to vector<8x1xf32>
    %121 = tpu.reciprocal %120 {approx = true} : vector<8x1xf32> -> vector<8x1xf32>
    %122 = vector.broadcast %121 : vector<8x1xf32> to vector<8x8xf32>
    %123 = arith.mulf %118, %122 : vector<8x8xf32>
    %cst_66 = arith.constant dense<0.000000e+00> : vector<8x64xf32>
    %124 = tpu.matmul %123, %110, %cst_66 {dimension_numbers = #tpu.dot_dimension_numbers<[1], [0], [0], [1], [0, 0, 1, 1], [], []>} : vector<8x8xf32>, vector<8x64xf32>, vector<8x64xf32> -> vector<8x64xf32>
    %c0_67 = arith.constant 0 : index
    %c384_68 = arith.constant 384 : index
    %125 = vector.load %arg5[%c0_67, %c384_68] : memref<8x768xf32, #tpu.memory_space<vmem>>, vector<8x64xf32>
    tpu.vector_store %arg5[%c0_67, %c384_68], %124 {strides = array<i32>} : memref<8x768xf32, #tpu.memory_space<vmem>>, vector<8x64xf32>,
    %c0_69 = arith.constant 0 : index
    %c448 = arith.constant 448 : index
    %126 = vector.load %arg1[%c0_69, %c448] : memref<8x2304xf32, #tpu.memory_space<vmem>>, vector<8x64xf32>
    %c0_70 = arith.constant 0 : index
    %c1216 = arith.constant 1216 : index
    %127 = vector.load %arg1[%c0_70, %c1216] : memref<8x2304xf32, #tpu.memory_space<vmem>>, vector<8x64xf32>
    %c0_71 = arith.constant 0 : index
    %c1984 = arith.constant 1984 : index
    %128 = vector.load %arg1[%c0_71, %c1984] : memref<8x2304xf32, #tpu.memory_space<vmem>>, vector<8x64xf32>
    %cst_72 = arith.constant dense<0.000000e+00> : vector<8x8xf32>
    %129 = tpu.matmul %126, %127, %cst_72 {dimension_numbers = #tpu.dot_dimension_numbers<[1], [1], [0], [0], [0, 0, 1, 0], [], []>} : vector<8x64xf32>, vector<8x64xf32>, vector<8x8xf32> -> vector<8x8xf32>
    %cst_73 = arith.constant 1.250000e-01 : f32
    %130 = vector.broadcast %cst_73 : f32 to vector<8x8xf32>
    %131 = arith.mulf %129, %130 : vector<8x8xf32>
    %cst_74 = arith.constant dense<0xFF800000> : vector<8xf32>
    %132 = vector.multi_reduction <maximumf>, %131, %cst_74 [1] : vector<8x8xf32> to vector<8xf32>
    %133 = vector.shape_cast %132 : vector<8xf32> to vector<8x1xf32>
    %134 = vector.broadcast %133 : vector<8x1xf32> to vector<8x8xf32>
    %135 = arith.subf %131, %134 : vector<8x8xf32>
    %136 = math.exp %135 : vector<8x8xf32>
    %cst_75 = arith.constant dense<0.000000e+00> : vector<8xf32>
    %137 = vector.multi_reduction <add>, %136, %cst_75 [1] : vector<8x8xf32> to vector<8xf32>
    %138 = vector.shape_cast %137 : vector<8xf32> to vector<8x1xf32>
    %139 = tpu.reciprocal %138 {approx = true} : vector<8x1xf32> -> vector<8x1xf32>
    %140 = vector.broadcast %139 : vector<8x1xf32> to vector<8x8xf32>
    %141 = arith.mulf %136, %140 : vector<8x8xf32>
    %cst_76 = arith.constant dense<0.000000e+00> : vector<8x64xf32>
    %142 = tpu.matmul %141, %128, %cst_76 {dimension_numbers = #tpu.dot_dimension_numbers<[1], [0], [0], [1], [0, 0, 1, 1], [], []>} : vector<8x8xf32>, vector<8x64xf32>, vector<8x64xf32> -> vector<8x64xf32>
    %c0_77 = arith.constant 0 : index
    %c448_78 = arith.constant 448 : index
    %143 = vector.load %arg5[%c0_77, %c448_78] : memref<8x768xf32, #tpu.memory_space<vmem>>, vector<8x64xf32>
    tpu.vector_store %arg5[%c0_77, %c448_78], %142 {strides = array<i32>} : memref<8x768xf32, #tpu.memory_space<vmem>>, vector<8x64xf32>,
    %c0_79 = arith.constant 0 : index
    %c512 = arith.constant 512 : index
    %144 = vector.load %arg1[%c0_79, %c512] : memref<8x2304xf32, #tpu.memory_space<vmem>>, vector<8x64xf32>
    %c0_80 = arith.constant 0 : index
    %c1280 = arith.constant 1280 : index
    %145 = vector.load %arg1[%c0_80, %c1280] : memref<8x2304xf32, #tpu.memory_space<vmem>>, vector<8x64xf32>
    %c0_81 = arith.constant 0 : index
    %c2048 = arith.constant 2048 : index
    %146 = vector.load %arg1[%c0_81, %c2048] : memref<8x2304xf32, #tpu.memory_space<vmem>>, vector<8x64xf32>
    %cst_82 = arith.constant dense<0.000000e+00> : vector<8x8xf32>
    %147 = tpu.matmul %144, %145, %cst_82 {dimension_numbers = #tpu.dot_dimension_numbers<[1], [1], [0], [0], [0, 0, 1, 0], [], []>} : vector<8x64xf32>, vector<8x64xf32>, vector<8x8xf32> -> vector<8x8xf32>
    %cst_83 = arith.constant 1.250000e-01 : f32
    %148 = vector.broadcast %cst_83 : f32 to vector<8x8xf32>
    %149 = arith.mulf %147, %148 : vector<8x8xf32>
    %cst_84 = arith.constant dense<0xFF800000> : vector<8xf32>
    %150 = vector.multi_reduction <maximumf>, %149, %cst_84 [1] : vector<8x8xf32> to vector<8xf32>
    %151 = vector.shape_cast %150 : vector<8xf32> to vector<8x1xf32>
    %152 = vector.broadcast %151 : vector<8x1xf32> to vector<8x8xf32>
    %153 = arith.subf %149, %152 : vector<8x8xf32>
    %154 = math.exp %153 : vector<8x8xf32>
    %cst_85 = arith.constant dense<0.000000e+00> : vector<8xf32>
    %155 = vector.multi_reduction <add>, %154, %cst_85 [1] : vector<8x8xf32> to vector<8xf32>
    %156 = vector.shape_cast %155 : vector<8xf32> to vector<8x1xf32>
    %157 = tpu.reciprocal %156 {approx = true} : vector<8x1xf32> -> vector<8x1xf32>
    %158 = vector.broadcast %157 : vector<8x1xf32> to vector<8x8xf32>
    %159 = arith.mulf %154, %158 : vector<8x8xf32>
    %cst_86 = arith.constant dense<0.000000e+00> : vector<8x64xf32>
    %160 = tpu.matmul %159, %146, %cst_86 {dimension_numbers = #tpu.dot_dimension_numbers<[1], [0], [0], [1], [0, 0, 1, 1], [], []>} : vector<8x8xf32>, vector<8x64xf32>, vector<8x64xf32> -> vector<8x64xf32>
    %c0_87 = arith.constant 0 : index
    %c512_88 = arith.constant 512 : index
    %161 = vector.load %arg5[%c0_87, %c512_88] : memref<8x768xf32, #tpu.memory_space<vmem>>, vector<8x64xf32>
    tpu.vector_store %arg5[%c0_87, %c512_88], %160 {strides = array<i32>} : memref<8x768xf32, #tpu.memory_space<vmem>>, vector<8x64xf32>,
    %c0_89 = arith.constant 0 : index
    %c576 = arith.constant 576 : index
    %162 = vector.load %arg1[%c0_89, %c576] : memref<8x2304xf32, #tpu.memory_space<vmem>>, vector<8x64xf32>
    %c0_90 = arith.constant 0 : index
    %c1344 = arith.constant 1344 : index
    %163 = vector.load %arg1[%c0_90, %c1344] : memref<8x2304xf32, #tpu.memory_space<vmem>>, vector<8x64xf32>
    %c0_91 = arith.constant 0 : index
    %c2112 = arith.constant 2112 : index
    %164 = vector.load %arg1[%c0_91, %c2112] : memref<8x2304xf32, #tpu.memory_space<vmem>>, vector<8x64xf32>
    %cst_92 = arith.constant dense<0.000000e+00> : vector<8x8xf32>
    %165 = tpu.matmul %162, %163, %cst_92 {dimension_numbers = #tpu.dot_dimension_numbers<[1], [1], [0], [0], [0, 0, 1, 0], [], []>} : vector<8x64xf32>, vector<8x64xf32>, vector<8x8xf32> -> vector<8x8xf32>
    %cst_93 = arith.constant 1.250000e-01 : f32
    %166 = vector.broadcast %cst_93 : f32 to vector<8x8xf32>
    %167 = arith.mulf %165, %166 : vector<8x8xf32>
    %cst_94 = arith.constant dense<0xFF800000> : vector<8xf32>
    %168 = vector.multi_reduction <maximumf>, %167, %cst_94 [1] : vector<8x8xf32> to vector<8xf32>
    %169 = vector.shape_cast %168 : vector<8xf32> to vector<8x1xf32>
    %170 = vector.broadcast %169 : vector<8x1xf32> to vector<8x8xf32>
    %171 = arith.subf %167, %170 : vector<8x8xf32>
    %172 = math.exp %171 : vector<8x8xf32>
    %cst_95 = arith.constant dense<0.000000e+00> : vector<8xf32>
    %173 = vector.multi_reduction <add>, %172, %cst_95 [1] : vector<8x8xf32> to vector<8xf32>
    %174 = vector.shape_cast %173 : vector<8xf32> to vector<8x1xf32>
    %175 = tpu.reciprocal %174 {approx = true} : vector<8x1xf32> -> vector<8x1xf32>
    %176 = vector.broadcast %175 : vector<8x1xf32> to vector<8x8xf32>
    %177 = arith.mulf %172, %176 : vector<8x8xf32>
    %cst_96 = arith.constant dense<0.000000e+00> : vector<8x64xf32>
    %178 = tpu.matmul %177, %164, %cst_96 {dimension_numbers = #tpu.dot_dimension_numbers<[1], [0], [0], [1], [0, 0, 1, 1], [], []>} : vector<8x8xf32>, vector<8x64xf32>, vector<8x64xf32> -> vector<8x64xf32>
    %c0_97 = arith.constant 0 : index
    %c576_98 = arith.constant 576 : index
    %179 = vector.load %arg5[%c0_97, %c576_98] : memref<8x768xf32, #tpu.memory_space<vmem>>, vector<8x64xf32>
    tpu.vector_store %arg5[%c0_97, %c576_98], %178 {strides = array<i32>} : memref<8x768xf32, #tpu.memory_space<vmem>>, vector<8x64xf32>,
    %c0_99 = arith.constant 0 : index
    %c640 = arith.constant 640 : index
    %180 = vector.load %arg1[%c0_99, %c640] : memref<8x2304xf32, #tpu.memory_space<vmem>>, vector<8x64xf32>
    %c0_100 = arith.constant 0 : index
    %c1408 = arith.constant 1408 : index
    %181 = vector.load %arg1[%c0_100, %c1408] : memref<8x2304xf32, #tpu.memory_space<vmem>>, vector<8x64xf32>
    %c0_101 = arith.constant 0 : index
    %c2176 = arith.constant 2176 : index
    %182 = vector.load %arg1[%c0_101, %c2176] : memref<8x2304xf32, #tpu.memory_space<vmem>>, vector<8x64xf32>
    %cst_102 = arith.constant dense<0.000000e+00> : vector<8x8xf32>
    %183 = tpu.matmul %180, %181, %cst_102 {dimension_numbers = #tpu.dot_dimension_numbers<[1], [1], [0], [0], [0, 0, 1, 0], [], []>} : vector<8x64xf32>, vector<8x64xf32>, vector<8x8xf32> -> vector<8x8xf32>
    %cst_103 = arith.constant 1.250000e-01 : f32
    %184 = vector.broadcast %cst_103 : f32 to vector<8x8xf32>
    %185 = arith.mulf %183, %184 : vector<8x8xf32>
    %cst_104 = arith.constant dense<0xFF800000> : vector<8xf32>
    %186 = vector.multi_reduction <maximumf>, %185, %cst_104 [1] : vector<8x8xf32> to vector<8xf32>
    %187 = vector.shape_cast %186 : vector<8xf32> to vector<8x1xf32>
    %188 = vector.broadcast %187 : vector<8x1xf32> to vector<8x8xf32>
    %189 = arith.subf %185, %188 : vector<8x8xf32>
    %190 = math.exp %189 : vector<8x8xf32>
    %cst_105 = arith.constant dense<0.000000e+00> : vector<8xf32>
    %191 = vector.multi_reduction <add>, %190, %cst_105 [1] : vector<8x8xf32> to vector<8xf32>
    %192 = vector.shape_cast %191 : vector<8xf32> to vector<8x1xf32>
    %193 = tpu.reciprocal %192 {approx = true} : vector<8x1xf32> -> vector<8x1xf32>
    %194 = vector.broadcast %193 : vector<8x1xf32> to vector<8x8xf32>
    %195 = arith.mulf %190, %194 : vector<8x8xf32>
    %cst_106 = arith.constant dense<0.000000e+00> : vector<8x64xf32>
    %196 = tpu.matmul %195, %182, %cst_106 {dimension_numbers = #tpu.dot_dimension_numbers<[1], [0], [0], [1], [0, 0, 1, 1], [], []>} : vector<8x8xf32>, vector<8x64xf32>, vector<8x64xf32> -> vector<8x64xf32>
    %c0_107 = arith.constant 0 : index
    %c640_108 = arith.constant 640 : index
    %197 = vector.load %arg5[%c0_107, %c640_108] : memref<8x768xf32, #tpu.memory_space<vmem>>, vector<8x64xf32>
    tpu.vector_store %arg5[%c0_107, %c640_108], %196 {strides = array<i32>} : memref<8x768xf32, #tpu.memory_space<vmem>>, vector<8x64xf32>,
    %c0_109 = arith.constant 0 : index
    %c704 = arith.constant 704 : index
    %198 = vector.load %arg1[%c0_109, %c704] : memref<8x2304xf32, #tpu.memory_space<vmem>>, vector<8x64xf32>
    %c0_110 = arith.constant 0 : index
    %c1472 = arith.constant 1472 : index
    %199 = vector.load %arg1[%c0_110, %c1472] : memref<8x2304xf32, #tpu.memory_space<vmem>>, vector<8x64xf32>
    %c0_111 = arith.constant 0 : index
    %c2240 = arith.constant 2240 : index
    %200 = vector.load %arg1[%c0_111, %c2240] : memref<8x2304xf32, #tpu.memory_space<vmem>>, vector<8x64xf32>
    %cst_112 = arith.constant dense<0.000000e+00> : vector<8x8xf32>
    %201 = tpu.matmul %198, %199, %cst_112 {dimension_numbers = #tpu.dot_dimension_numbers<[1], [1], [0], [0], [0, 0, 1, 0], [], []>} : vector<8x64xf32>, vector<8x64xf32>, vector<8x8xf32> -> vector<8x8xf32>
    %cst_113 = arith.constant 1.250000e-01 : f32
    %202 = vector.broadcast %cst_113 : f32 to vector<8x8xf32>
    %203 = arith.mulf %201, %202 : vector<8x8xf32>
    %cst_114 = arith.constant dense<0xFF800000> : vector<8xf32>
    %204 = vector.multi_reduction <maximumf>, %203, %cst_114 [1] : vector<8x8xf32> to vector<8xf32>
    %205 = vector.shape_cast %204 : vector<8xf32> to vector<8x1xf32>
    %206 = vector.broadcast %205 : vector<8x1xf32> to vector<8x8xf32>
    %207 = arith.subf %203, %206 : vector<8x8xf32>
    %208 = math.exp %207 : vector<8x8xf32>
    %cst_115 = arith.constant dense<0.000000e+00> : vector<8xf32>
    %209 = vector.multi_reduction <add>, %208, %cst_115 [1] : vector<8x8xf32> to vector<8xf32>
    %210 = vector.shape_cast %209 : vector<8xf32> to vector<8x1xf32>
    %211 = tpu.reciprocal %210 {approx = true} : vector<8x1xf32> -> vector<8x1xf32>
    %212 = vector.broadcast %211 : vector<8x1xf32> to vector<8x8xf32>
    %213 = arith.mulf %208, %212 : vector<8x8xf32>
    %cst_116 = arith.constant dense<0.000000e+00> : vector<8x64xf32>
    %214 = tpu.matmul %213, %200, %cst_116 {dimension_numbers = #tpu.dot_dimension_numbers<[1], [0], [0], [1], [0, 0, 1, 1], [], []>} : vector<8x8xf32>, vector<8x64xf32>, vector<8x64xf32> -> vector<8x64xf32>
    %c0_117 = arith.constant 0 : index
    %c704_118 = arith.constant 704 : index
    %215 = vector.load %arg5[%c0_117, %c704_118] : memref<8x768xf32, #tpu.memory_space<vmem>>, vector<8x64xf32>
    tpu.vector_store %arg5[%c0_117, %c704_118], %214 {strides = array<i32>} : memref<8x768xf32, #tpu.memory_space<vmem>>, vector<8x64xf32>,
    %c0_119 = arith.constant 0 : index
    %c0_120 = arith.constant 0 : index
    %216 = vector.load %arg5[%c0_119, %c0_120] : memref<8x768xf32, #tpu.memory_space<vmem>>, vector<8x768xf32>
    %c0_121 = arith.constant 0 : index
    %c0_122 = arith.constant 0 : index
    %217 = vector.load %arg2[%c0_121, %c0_122] : memref<768x768xf32, #tpu.memory_space<vmem>>, vector<768x768xf32>
    %cst_123 = arith.constant dense<0.000000e+00> : vector<8x768xf32>
    %218 = tpu.matmul %216, %217, %cst_123 {dimension_numbers = #tpu.dot_dimension_numbers<[1], [1], [0], [0], [0, 0, 1, 0], [], []>} : vector<8x768xf32>, vector<768x768xf32>, vector<8x768xf32> -> vector<8x768xf32>
    %c0_124 = arith.constant 0 : index
    %c0_125 = arith.constant 0 : index
    %219 = vector.load %arg3[%c0_124, %c0_125] : memref<1x768xf32, #tpu.memory_space<vmem>>, vector<1x768xf32>
    %220 = vector.broadcast %219 : vector<1x768xf32> to vector<8x768xf32>
    %221 = arith.addf %218, %220 : vector<8x768xf32>
    %c0_126 = arith.constant 0 : index
    %c0_127 = arith.constant 0 : index
    %c0_128 = arith.constant 0 : index
    %222 = vector.load %arg4[%c0_126, %c0_127, %c0_128] : memref<1x8x768xf32, #tpu.memory_space<vmem>>, vector<1x8x768xf32>
    %223 = vector.shape_cast %222 : vector<1x8x768xf32> to vector<8x768xf32>
    %224 = vector.shape_cast %221 : vector<8x768xf32> to vector<1x8x768xf32>
    tpu.vector_store %arg4[%c0_126, %c0_127, %c0_128], %224 {strides = array<i32>} : memref<1x8x768xf32, #tpu.memory_space<vmem>>, vector<1x8x768xf32>,
    return
  }
  func.func @transform_0(%arg0: i32) -> (i32, i32) {
    %c0_i32 = arith.constant 0 : i32
    %c0_i32_0 = arith.constant 0 : i32
    return %arg0, %c0_i32 : i32, i32
  }
  func.func @transform_1(%arg0: i32) -> (i32, i32) {
    %c0_i32 = arith.constant 0 : i32
    %c0_i32_0 = arith.constant 0 : i32
    %c0_i32_1 = arith.constant 0 : i32
    return %c0_i32, %c0_i32_0 : i32, i32
  }
  func.func @transform_2(%arg0: i32) -> (i32, i32) {
    %c0_i32 = arith.constant 0 : i32
    %c0_i32_0 = arith.constant 0 : i32
    %c0_i32_1 = arith.constant 0 : i32
    return %c0_i32, %c0_i32_0 : i32, i32
  }
  func.func @transform_3(%arg0: i32) -> (i32, i32, i32) {
    %c0_i32 = arith.constant 0 : i32
    %c0_i32_0 = arith.constant 0 : i32
    %c0_i32_1 = arith.constant 0 : i32
    return %arg0, %c0_i32, %c0_i32_0 : i32, i32, i32
  }
}

</mosaic_0001>

<bundles_post_ra>
// kernel: multi_head_self_attention.3
= control target key start
LH: loop header
LB: loop body
LE: loop exit
PB: predicated region body
PF: predicated region fallthrough
CT: control target
= control target key end

     0   :  { %8 = vsyncpa [#allocation4], 0  ;;  %s2629_s12 = smov 0   ;;  %s2920_s0 = inlined_call_operand.vmem [shape: f32[16,2304], index: 0, kind: input, shape index: {}]   ;;  %s2921_s1 = inlined_call_operand.hbm [shape: f32[768,768], index: 1, kind: input, shape index: {}]   ;;  %s2922_s2 = inlined_call_operand.vmem [shape: f32[1,768], index: 2, kind: input, shape index: {}]   ;;  %s2923_s3 = inlined_call_operand.vmem [shape: f32[2,8,768], index: 3, kind: output, shape index: {}]  }
   0x1 LB: > { %s124_s15 = sshll.u32 %s2921_s1, 4  ;;  %s2432_s16 = sadd.s32 4294967295, %s2603_s12   ;;  %s2603_s12 = sphi %s2629_s12, %s14_s12   ;;  %s125_s15 = int_to_ptr.hbm [resolvable:$true] %s124_s15 }
   0x2   : > { %p2434_p0 = scmp.ge.s32.totalorder %s2603_s12, 1  ;;  %p113_p1 = scmp.lt.s32.totalorder %s2603_s12, 3 }
   0x3   : > { %p2489_p2 = scmp.eq.s32.totalorder %s2432_s16, 0  ;;  %s2605_s17 = smov [#allocation3]  }
   0x4   : > { %p114_p3 = pnand %p2434_p0, %p113_p1  ;;  %s126_s18 = sshll.u32 %s2605_s17, 4  ;;  %s127_s18 = int_to_ptr.vmem [resolvable:$true] %s126_s18 }
   0x5   : > { %s2606_s19 = smov 768   ;;  %s2607_s20 = smov 48  }
   0x6   : > { %p2485_p4 = pneg %p114_p3  ;;  %153 = sbr.rel (%p114_p3) target bundleno = 1608 (0x648), region = 32 }
   0x8   : > { %p2486_p5 = pnand %p2489_p2, %p2485_p4 }
   0xa   : > { %2488 = dma.hbm_to_vmem [thread:$0]  (!%p2486_p5), %s125_s15, 73728, %s127_s18, [#allocation4], %s2606_s19, %s2606_s19, %s2607_s20  }
   0xb   : > { %2598 = dma.done.wait (%p2489_p2), [#allocation4], 73728  }
   0xc   : > { %2600 = vsyncadd (%p2489_p2), [#allocation4], 4294893568  ;;  %p178_p6 = scmp.lt.s32.totalorder %s2432_s16, 1  ;;  %vm191_vm0 = vcmask 523264   ;;  %s2608_s25 = smov 64   ;;  %vm219_vm1 = vcmask 64512  }
   0xd   : > { %vm331_vm2 = vcmask 1048064  }
   0xe   : > { %s2925_s16 = smov (!%p178_p6, %s2432_s16), 1 }
   0xf   : > { %s2479_s21 = smul.u32 144, %s2925_s16 }
  0x10   : > { %s2480_s28 = smul.u32 48, %s2925_s16 }
  0x11   : > { %s2646_s24 = scalar_lea.vmem %s2920_s0, %s2479_s21 }
  0x12   : > { %v189_v0 = vld [vmem:[%s2646_s24 + $0x30] sm:$0xff]  ;;  %v2650_v1 = vld [vmem:[%s2646_s24 + $0x8] sm:$0xff]  ;;  %v188_v2 = vld [vmem:[%s2646_s24] sm:$0xff]  ;;  %s2893_s4 = scalar_lea.vmem %s2923_s3, %s2480_s28 }
  0x13   : > { %2441 = vmatpush.xpose.msk.msra.mxu0 %vm191_vm0, %v189_v0  ;;  %402 = vrot.lane.b32.xlu1 %v2650_v1, %s2608_s25  ;;  %v2659_v3 = vld [vmem:[%s2646_s24 + $0x40] sm:$0xff]  ;;  %v2665_v5 = vld [vmem:[%s2646_s24 + $0x18] sm:$0xff]  ;;  %v540_v10 = vld [vmem:[%s2646_s24 + $0x10] sm:$0xff] }
  0x14   : > { %262 = vrot.lane.b32.xlu2 %v189_v0, %s2608_s25  ;;  %v2671_v9 = vld [vmem:[%s2646_s24 + $0x20] sm:$0xff]  ;;  %v683_v13 = vld [vmem:[%s2646_s24 + $0x48] sm:$0xff]  ;;  %v399_v15 = vld [vmem:[%s2646_s24 + $0x38] sm:$0xff] }
  0x15   : > { %v825_v16 = vld [vmem:[%s2646_s24 + $0x50] sm:$0xff]  ;;  %v967_v23 = vld [vmem:[%s2646_s24 + $0x58] sm:$0xff]  ;;  %v966_v24 = vld [vmem:[%s2646_s24 + $0x28] sm:$0xff] }
  0x16   : > { %2442 = vmatmul.msk.f32.vlgmr.msra.gmra.mxu0 %vm191_vm0, %v188_v2  ;;  %v2703_v33 = vld [vmem:[%s2646_s24 + $0x60] sm:$0xff] }
  0x17   : > { %249 = vmatpush.msra.mxu1 %v2703_v33 }
  0x19   : > { %2447 = vmatpush.xpose.msk.msrb.mxu1 %vm191_vm0, %v399_v15 }
  0x1b   : > { %547 = vrot.lane.b32.xlu1 %v2659_v3, %s2608_s25 }
  0x1c   : > { %544 = vrot.lane.b32.xlu2 %v540_v10, %s2608_s25 }
  0x23   : > { %259 = vrot.lane.b32.xlu1 %v188_v2, %s2608_s25 }
  0x24   : > { %689 = vrot.lane.b32.xlu2 %v683_v13, %s2608_s25 }
  0x2b   : > { %686 = vrot.lane.b32.xlu1 %v2665_v5, %s2608_s25 }
  0x33   : > { %828 = vrot.lane.b32.xlu1 %v2671_v9, %s2608_s25 }
  0x3b   : > { %970 = vrot.lane.b32.xlu1 %v966_v24, %s2608_s25 }
  0x6e   : > { %v263_v6 = vpop.permute.xlu2 %262 }
  0x6f   : > { %2444 = vmatpush.xpose.msk.msra.mxu2 %vm191_vm0, %v263_v6 }
  0x76   : > { %v545_v21 = vpop.permute.xlu2 %544 }
  0x7e   : > { %v690_v26 = vpop.permute.xlu2 %689 }
  0x85   : > { %v403_v4 = vpop.permute.xlu1 %402 }
  0x8d   : > { %v548_v8 = vpop.permute.xlu1 %547 }
  0x93   : > { %v215_v7 = vpop.f32.mrf.mxu0 }
  0x94   : > { %v218_v11 = vmul.f32 0.125, %v215_v7 }
  0x95   : > { %v260_v14 = vpop.permute.xlu1 %259 }
  0x96   : > { %v220_v12 = vsel %vm219_vm1, %v218_v11, -inf  ;;  %2445 = vmatmul.msk.f32.vlgmr.msra.gmra.mxu2 %vm191_vm0, %v260_v14 }
  0x97   : > { %221 = vmax.xlane.f32.xlu0 %v220_v12 }
  0x9d   : > { %v687_v31 = vpop.permute.xlu1 %686 }
  0xa5   : > { %v829_v32 = vpop.permute.xlu1 %828 }
  0xab   : > { %405 = vrot.lane.b32.xlu0 %v399_v15, %s2608_s25 }
  0xad   : > { %v971_v38 = vpop.permute.xlu1 %970 }
  0xb3   : > { %831 = vrot.lane.b32.xlu0 %v825_v16, %s2608_s25 }
  0xbb   : > { %973 = vrot.lane.b32.xlu0 %v967_v23, %s2608_s25 }
 0x10a   : > { %v222_v17 = vpop.xlane.xlu0 %221 }
 0x10b   : > { %v223_v18 = vsub.f32 %v218_v11, %v222_v17 }
 0x10d   : > { %v224_v19 = vmul.f32 1.442695, %v223_v18 }
 0x10f   : > { %2508 = vpow2.f32 %v224_v19 }
 0x115   : > { %v2509_v20 = vpop.eup %2508 }
 0x116   : > { %v226_v22 = vsel %vm219_vm1, %v2509_v20, 0.0 }
 0x117   : > { %227 = vadd.xlane.f32.xlu2 %v226_v22  ;;  %v2760_v22 = vld [vmem:[%s2646_s24 + $0x78] sm:$0xff] }
 0x119   : > { %v285_v27 = vpop.f32.mrf.mxu2 }
 0x11a   : > { %v2692_v28 = vmul.f32 0.125, %v285_v27 }
 0x11c   : > { %v289_v29 = vsel %vm219_vm1, %v2692_v28, -inf }
 0x11d   : > { %v406_v25 = vpop.permute.xlu0 %405 }
 0x11e   : > { %2450 = vmatpush.xpose.msk.msrb.mxu0 %vm191_vm0, %v406_v25 }
 0x11f   : > { %290 = vmax.xlane.f32.xlu2 %v289_v29 }
 0x121   : > { %2451 = vmatmul.msk.f32.vlgmr.msrb.gmra.mxu0 %vm191_vm0, %v403_v4 }
 0x122   : > { %2456 = vmatpush.xpose.msk.msra.mxu0 %vm191_vm0, %v548_v8 }
 0x125   : > { %v832_v30 = vpop.permute.xlu0 %831 }
 0x126   : > { %2462 = vmatpush.xpose.msk.msrb.mxu0 %vm191_vm0, %v690_v26 }
 0x129   : > { %2457 = vmatmul.msk.f32.vlgmr.msra.gmra.mxu0 %vm191_vm0, %v545_v21  ;;  %v2755_v21 = vld [vmem:[%s2646_s24 + $0x70] sm:$0xff] }
 0x12a   : > { %2468 = vmatpush.xpose.msk.msra.mxu0 %vm191_vm0, %v832_v30 }
 0x12d   : > { %v974_v37 = vpop.permute.xlu0 %973 }
 0x131   : > { %2463 = vmatmul.msk.f32.vlgmr.msrb.gmra.mxu0 %vm191_vm0, %v687_v31 }
 0x132   : > { %2474 = vmatpush.xpose.msk.msrb.mxu0 %vm191_vm0, %v974_v37 }
 0x139   : > { %2469 = vmatmul.msk.f32.vlgmr.msra.gmra.mxu0 %vm191_vm0, %v829_v32 }
 0x141   : > { %2475 = vmatmul.msk.f32.vlgmr.msrb.gmra.mxu0 %vm191_vm0, %v971_v38 }
 0x18a   : > { %v228_v34 = vpop.xlane.xlu2 %227 }
 0x18b   : > { %2510 = vrcp.f32 %v228_v34 }
 0x191   : > { %v2511_v35 = vpop.eup %2510 }
 0x192   : > { %v230_v36 = vmul.f32 %v2511_v35, %v2509_v20  ;;  %v291_v56 = vpop.xlane.xlu2 %290  ;;  %v2750_v20 = vld [vmem:[%s2646_s24 + $0x68] sm:$0xff] }
 0x194   : > { %2443 = vmatmul.msk.f32.vlgmr.msra.gmra.mxu1 %vm219_vm1, %v230_v36 }
 0x195   : > { %2453 = vmatpush.xpose.msk.msra.mxu1 %vm191_vm0, %v2659_v3  ;;  %v292_v3 = vsub.f32 %v2692_v28, %v291_v56 }
 0x19c   : > { %2448 = vmatmul.msk.f32.vlgmr.msrb.gmra.mxu1 %vm191_vm0, %v2650_v1 }
 0x19d   : > { %2459 = vmatpush.xpose.msk.msrb.mxu1 %vm191_vm0, %v683_v13 }
 0x19e   : > { %v428_v39 = vpop.f32.mrf.mxu0 }
 0x19f   : > { %v431_v40 = vmul.f32 0.125, %v428_v39 }
 0x1a1   : > { %v432_v41 = vsel %vm219_vm1, %v431_v40, -inf }
 0x1a2   : > { %433 = vmax.xlane.f32.xlu0 %v432_v41 }
 0x1a4   : > { %2454 = vmatmul.msk.f32.vlgmr.msra.gmra.mxu1 %vm191_vm0, %v540_v10 }
 0x1a5   : > { %2465 = vmatpush.xpose.msk.msra.mxu1 %vm191_vm0, %v825_v16 }
 0x1a6   : > { %v570_v42 = vpop.f32.mrf.mxu0 }
 0x1a7   : > { %v573_v43 = vmul.f32 0.125, %v570_v42 }
 0x1a9   : > { %v574_v44 = vsel %vm219_vm1, %v573_v43, -inf }
 0x1aa   : > { %575 = vmax.xlane.f32.xlu1 %v574_v44 }
 0x1ac   : > { %2460 = vmatmul.msk.f32.vlgmr.msrb.gmra.mxu1 %vm191_vm0, %v2665_v5 }
 0x1ad   : > { %2471 = vmatpush.xpose.msk.msrb.mxu1 %vm191_vm0, %v967_v23  ;;  %v2503_v23 = vpack.i.bf16 %v2760_v22, %v2703_v33 }
 0x1ae   : > { %v712_v45 = vpop.f32.mrf.mxu0 }
 0x1af   : > { %v715_v46 = vmul.f32 0.125, %v712_v45 }
 0x1b1   : > { %v716_v47 = vsel %vm219_vm1, %v715_v46, -inf }
 0x1b2   : > { %717 = vmax.xlane.f32.xlu2 %v716_v47 }
 0x1b4   : > { %2466 = vmatmul.msk.f32.vlgmr.msra.gmra.mxu1 %vm191_vm0, %v2671_v9  ;;  %v293_v9 = vmul.f32 1.442695, %v292_v3 }
 0x1b6   : > { %v854_v48 = vpop.f32.mrf.mxu0 }
 0x1b7   : > { %v857_v49 = vmul.f32 0.125, %v854_v48 }
 0x1b9   : > { %v858_v50 = vsel %vm219_vm1, %v857_v49, -inf }
 0x1ba   : > { %859 = vmax.xlane.f32.xlu2 %v858_v50 }
 0x1bc   : > { %2472 = vmatmul.msk.f32.vlgmr.msrb.gmra.mxu1 %vm191_vm0, %v966_v24 }
 0x1be   : > { %v996_v16 = vpop.f32.mrf.mxu0 }
 0x1bf   : > { %v999_v18 = vmul.f32 0.125, %v996_v16 }
 0x1c1   : > { %v1000_v19 = vsel %vm219_vm1, %v999_v18, -inf }
 0x211   : > { %v251_v51 = vpop.f32.mrf.mxu1 }
 0x212   : > { %254 = vst.msk [vmem:[#allocation2] sm:$0xff] %vm191_vm0, %v251_v51 }
 0x215   : > { %v434_v52 = vpop.xlane.xlu0 %433 }
 0x216   : > { %v435_v53 = vsub.f32 %v431_v40, %v434_v52 }
 0x218   : > { %v436_v54 = vmul.f32 1.442695, %v435_v53 }
 0x219   : > { %v359_v55 = vpop.f32.mrf.mxu1 }
 0x21a   : > { %2512 = vpow2.f32 %v436_v54  ;;  %v362_v63 = vmul.f32 0.125, %v359_v55 }
 0x21c   : > { %v363_v7 = vsel %vm219_vm1, %v362_v63, -inf }
 0x21d   : > { %v576_v57 = vpop.xlane.xlu1 %575 }
 0x21e   : > { %v577_v58 = vsub.f32 %v573_v43, %v576_v57 }
 0x220   : > { %v2728_v59 = vpop.eup %2512  ;;  %v578_v60 = vmul.f32 1.442695, %v577_v58 }
 0x221   : > { %v501_v61 = vpop.f32.mrf.mxu1  ;;  %v438_v62 = vsel %vm219_vm1, %v2728_v59, 0.0 }
 0x222   : > { %2514 = vpow2.f32 %v578_v60  ;;  %439 = vadd.xlane.f32.xlu2 %v438_v62  ;;  %v504_v11 = vmul.f32 0.125, %v501_v61 }
 0x224   : > { %v505_v13 = vsel %vm219_vm1, %v504_v11, -inf }
 0x225   : > { %v718_v0 = vpop.xlane.xlu2 %717 }
 0x226   : > { %v719_v1 = vsub.f32 %v715_v46, %v718_v0 }
 0x228   : > { %v2732_v2 = vpop.eup %2514  ;;  %v720_v4 = vmul.f32 1.442695, %v719_v1 }
 0x229   : > { %v643_v5 = vpop.f32.mrf.mxu1  ;;  %v580_v6 = vsel %vm219_vm1, %v2732_v2, 0.0 }
 0x22a   : > { %2516 = vpow2.f32 %v720_v4  ;;  %v646_v8 = vmul.f32 0.125, %v643_v5  ;;  %581 = vadd.xlane.f32.xlu0 %v580_v6  ;;  %364 = vmax.xlane.f32.xlu2 %v363_v7  ;;  %v826_v5 = vld [vmem:[%s2646_s24 + $0x80] sm:$0xff] }
 0x22b   : > { %2518 = vpow2.f32 %v293_v9 }
 0x22c   : > { %v647_v10 = vsel %vm219_vm1, %v646_v8, -inf }
 0x22d   : > { %648 = vmax.xlane.f32.xlu1 %v647_v10  ;;  %v860_v25 = vpop.xlane.xlu2 %859 }
 0x22e   : > { %v861_v26 = vsub.f32 %v857_v49, %v860_v25 }
 0x230   : > { %v2739_v12 = vpop.eup %2516  ;;  %v862_v27 = vmul.f32 1.442695, %v861_v26 }
 0x231   : > { %v722_v14 = vsel %vm219_vm1, %v2739_v12, 0.0  ;;  %v2744_v15 = vpop.eup %2518  ;;  %v785_v24 = vpop.f32.mrf.mxu1 }
 0x232   : > { %506 = vmax.xlane.f32.xlu0 %v505_v13  ;;  %723 = vadd.xlane.f32.xlu2 %v722_v14  ;;  %v295_v17 = vsel %vm219_vm1, %v2744_v15, 0.0  ;;  %2520 = vpow2.f32 %v862_v27  ;;  %v2773_v33 = vmul.f32 0.125, %v785_v24 }
 0x234   : > { %v789_v34 = vsel %vm219_vm1, %v2773_v33, -inf }
 0x238   : > { %v2769_v31 = vpop.eup %2520 }
 0x239   : > { %v927_v28 = vpop.f32.mrf.mxu1  ;;  %v864_v32 = vsel %vm219_vm1, %v2769_v31, 0.0 }
 0x23a   : > { %296 = vadd.xlane.f32.xlu0 %v295_v17  ;;  %v2765_v29 = vmul.f32 0.125, %v927_v28 }
 0x23c   : > { %v931_v30 = vsel %vm219_vm1, %v2765_v29, -inf }
 0x242   : > { %1001 = vmax.xlane.f32.xlu0 %v1000_v19 }
 0x246   : > { %444 = vrot.lane.b32.xlu1 %v2750_v20, %s2608_s25 }
 0x24a   : > { %586 = vrot.lane.b32.xlu2 %v2755_v21, %s2608_s25 }
 0x256   : > { %2504 = vrot.lane.b32.xlu0 %v2503_v23, %s2608_s25 }
 0x270   : > { %932 = vmax.xlane.f32.xlu1 %v931_v30 }
 0x273   : > { %865 = vadd.xlane.f32.xlu2 %v864_v32  ;;  %v1141_v32 = vld [vmem:[#allocation3 + $0x2e0] sm:$0xff] }
 0x274   : > { %1679 = vmatpush.xpose.msra.mxu0 %v1141_v32  ;;  %v1097_v32 = vld [vmem:[#allocation3 + $0x180] sm:$0xff] }
 0x280   : > { %790 = vmax.xlane.f32.xlu0 %v789_v34 }
 0x295   : > { %v440_v35 = vpop.xlane.xlu2 %439 }
 0x29d   : > { %v365_v36 = vpop.xlane.xlu2 %364  ;;  %v582_v37 = vpop.xlane.xlu0 %581 }
 0x29e   : > { %v366_v38 = vsub.f32 %v362_v63, %v365_v36 }
 0x2a0   : > { %v367_v39 = vmul.f32 1.442695, %v366_v38  ;;  %v649_v40 = vpop.xlane.xlu1 %648 }
 0x2a1   : > { %v650_v41 = vsub.f32 %v646_v8, %v649_v40  ;;  %v1129_v40 = vld [vmem:[#allocation3 + $0x280] sm:$0xff] }
 0x2a2   : > { %2522 = vpow2.f32 %v367_v39  ;;  %v1142_v39 = vld [vmem:[#allocation3 + $0x2e8] sm:$0xff] }
 0x2a3   : > { %v651_v42 = vmul.f32 1.442695, %v650_v41 }
 0x2a5   : > { %v507_v43 = vpop.xlane.xlu0 %506  ;;  %2524 = vpow2.f32 %v651_v42  ;;  %v724_v51 = vpop.xlane.xlu2 %723  ;;  %v1136_v42 = vld [vmem:[#allocation3 + $0x2b8] sm:$0xff] }
 0x2a6   : > { %v508_v44 = vsub.f32 %v504_v11, %v507_v43  ;;  %v1123_v43 = vld [vmem:[#allocation3 + $0x250] sm:$0xff] }
 0x2a8   : > { %v2777_v45 = vpop.eup %2522  ;;  %v509_v46 = vmul.f32 1.442695, %v508_v44 }
 0x2a9   : > { %v369_v47 = vsel %vm219_vm1, %v2777_v45, 0.0 }
 0x2aa   : > { %2526 = vpow2.f32 %v509_v46  ;;  %370 = vadd.xlane.f32.xlu1 %v369_v47  ;;  %v1124_v47 = vld [vmem:[#allocation3 + $0x258] sm:$0xff] }
 0x2ab   : > { %v2781_v49 = vpop.eup %2524  ;;  %2528 = vrcp.f32 %v440_v35 }
 0x2ac   : > { %v653_v52 = vsel %vm219_vm1, %v2781_v49, 0.0  ;;  %2530 = vrcp.f32 %v582_v37 }
 0x2ad   : > { %v297_v48 = vpop.xlane.xlu0 %296  ;;  %v587_v61 = vpop.permute.xlu2 %586 }
 0x2b0   : > { %v2783_v50 = vpop.eup %2526 }
 0x2b1   : > { %v511_v53 = vsel %vm219_vm1, %v2783_v50, 0.0  ;;  %v2529_v54 = vpop.eup %2528 }
 0x2b2   : > { %654 = vadd.xlane.f32.xlu1 %v653_v52  ;;  %512 = vadd.xlane.f32.xlu2 %v511_v53  ;;  %v442_v60 = vmul.f32 %v2529_v54, %v2728_v59  ;;  %v2531_v62 = vpop.eup %2530  ;;  %v1112_v53 = vld [vmem:[#allocation3 + $0x1f8] sm:$0xff]  ;;  %v1099_v54 = vld [vmem:[#allocation3 + $0x190] sm:$0xff] }
 0x2b3   : > { %v584_v0 = vmul.f32 %v2531_v62, %v2732_v2  ;;  %v968_v2 = vld [vmem:[%s2646_s24 + $0x88] sm:$0xff] }
 0x2b4   : > { %v1088_v62 = vld [vmem:[#allocation3 + $0x138] sm:$0xff] }
 0x2b5   : > { %v1002_v55 = vpop.xlane.xlu0 %1001 }
 0x2b6   : > { %v1003_v56 = vsub.f32 %v999_v18, %v1002_v55  ;;  %v1106_v55 = vld [vmem:[#allocation3 + $0x1c8] sm:$0xff] }
 0x2b8   : > { %v1004_v57 = vmul.f32 1.442695, %v1003_v56  ;;  %v445_v58 = vpop.permute.xlu1 %444  ;;  %v1093_v56 = vld [vmem:[#allocation3 + $0x160] sm:$0xff] }
 0x2b9   : > { %465 = vmatpush.msrb.mxu2 %v445_v58  ;;  %v1087_v58 = vld [vmem:[#allocation3 + $0x130] sm:$0xff] }
 0x2ba   : > { %2532 = vpow2.f32 %v1004_v57  ;;  %2452 = vmatmul.msk.f32.vlgmr.msrb.gmra.mxu2 %vm219_vm1, %v442_v60  ;;  %v1100_v57 = vld [vmem:[#allocation3 + $0x198] sm:$0xff]  ;;  %v1094_v60 = vld [vmem:[#allocation3 + $0x168] sm:$0xff] }
 0x2bb   : > { %607 = vmatpush.msra.mxu2 %v587_v61  ;;  %2534 = vrcp.f32 %v297_v48  ;;  %v1111_v48 = vld [vmem:[#allocation3 + $0x1f0] sm:$0xff]  ;;  %v1081_v61 = vld [vmem:[#allocation3 + $0x100] sm:$0xff] }
 0x2bc   : > { %2536 = vrcp.f32 %v724_v51  ;;  %v1105_v51 = vld [vmem:[#allocation3 + $0x1c0] sm:$0xff] }
 0x2c0   : > { %v2791_v63 = vpop.eup %2532 }
 0x2c1   : > { %v1006_v1 = vsel %vm219_vm1, %v2791_v63, 0.0  ;;  %v2535_v59 = vpop.eup %2534 }
 0x2c2   : > { %2458 = vmatmul.msk.f32.vlgmr.msra.gmra.mxu2 %vm219_vm1, %v584_v0  ;;  %1007 = vadd.xlane.f32.xlu0 %v1006_v1  ;;  %v2537_v3 = vpop.eup %2536  ;;  %v299_v8 = vmul.f32 %v2535_v59, %v2744_v15  ;;  %v1082_v0 = vld [vmem:[#allocation3 + $0x108] sm:$0xff]  ;;  %v1139_v1 = vld [vmem:[#allocation3 + $0x2d0] sm:$0xff]  ;;  %v1069_v59 = vld [vmem:[#allocation3 + $0xa0] sm:$0xff] }
 0x2c3   : > { %v726_v9 = vmul.f32 %v2537_v3, %v2739_v12  ;;  %1639 = vmatpush.xpose.msra.mxu1 %v1139_v1  ;;  %v1076_v3 = vld [vmem:[#allocation3 + $0xd8] sm:$0xff]  ;;  %v1049_v1 = vld [vmem:[#allocation3] sm:$0xff] }
 0x2c8   : > { %v2505_v4 = vpop.permute.xlu0 %2504 }
 0x2c9   : > { %v2507_v6 = vunpack.i.h.bf16 %v2505_v4  ;;  %v2506_v7 = vunpack.i.l.bf16 %v2505_v4  ;;  %v1133_v4 = vld [vmem:[#allocation3 + $0x2a0] sm:$0xff] }
 0x2ca   : > { %1012 = vrot.lane.b32.xlu2 %v968_v2, %s2608_s25  ;;  %1640 = vmatpush.xpose.msra.mxu1 %v1133_v4  ;;  %v1170_v4 = vld [vmem:[#allocation3 + $0x3c8] sm:$0xff] }
 0x2cb   : > { %870 = vrot.lane.b32.xlu1 %v826_v5, %s2608_s25  ;;  %322 = vmatpush.msra.mxu3 %v2506_v7  ;;  %v1127_v7 = vld [vmem:[#allocation3 + $0x270] sm:$0xff] }
 0x2cc   : > { %749 = vmatpush.msrb.mxu2 %v2507_v6  ;;  %2446 = vmatmul.msk.f32.vlgmr.msra.gmra.mxu3 %vm219_vm1, %v299_v8  ;;  %v1070_v6 = vld [vmem:[#allocation3 + $0xa8] sm:$0xff]  ;;  %v1057_v8 = vld [vmem:[#allocation3 + $0x40] sm:$0xff] }
 0x2cd   : > { %2464 = vmatmul.msk.f32.vlgmr.msrb.gmra.mxu2 %vm219_vm1, %v726_v9  ;;  %392 = vmatpush.msrb.mxu3 %v2750_v20  ;;  %v1064_v9 = vld [vmem:[#allocation3 + $0x78] sm:$0xff] }
 0x2ce   : > { %1641 = vmatpush.xpose.msra.mxu1 %v1127_v7 }
 0x2cf   : > { %534 = vmatpush.msra.mxu3 %v2755_v21 }
 0x2e3   : > { %v933_v10 = vpop.xlane.xlu1 %932 }
 0x2e4   : > { %v934_v12 = vsub.f32 %v2765_v29, %v933_v10 }
 0x2e6   : > { %v935_v15 = vmul.f32 1.442695, %v934_v12  ;;  %v866_v20 = vpop.xlane.xlu2 %865  ;;  %v1235_v12 = vld [vmem:[#allocation3 + $0x5d0] sm:$0xff] }
 0x2f3   : > { %v791_v11 = vpop.xlane.xlu0 %790 }
 0x2f4   : > { %v792_v13 = vsub.f32 %v2773_v33, %v791_v11  ;;  %v1051_v11 = vld [vmem:[#allocation3 + $0x10] sm:$0xff] }
 0x2f6   : > { %v793_v14 = vmul.f32 1.442695, %v792_v13  ;;  %v1058_v13 = vld [vmem:[#allocation3 + $0x48] sm:$0xff] }
 0x2f8   : > { %2538 = vpow2.f32 %v793_v14  ;;  %v1115_v14 = vld [vmem:[#allocation3 + $0x210] sm:$0xff] }
 0x2f9   : > { %2540 = vpow2.f32 %v935_v15 }
 0x2fe   : > { %v2809_v16 = vpop.eup %2538 }
 0x2ff   : > { %v795_v17 = vsel %vm219_vm1, %v2809_v16, 0.0  ;;  %v2813_v18 = vpop.eup %2540 }
 0x300   : > { %796 = vadd.xlane.f32.xlu0 %v795_v17  ;;  %v937_v19 = vsel %vm219_vm1, %v2813_v18, 0.0  ;;  %v1052_v17 = vld [vmem:[#allocation3 + $0x18] sm:$0xff] }
 0x308   : > { %938 = vadd.xlane.f32.xlu0 %v937_v19  ;;  %v1229_v19 = vld [vmem:[#allocation3 + $0x5a0] sm:$0xff] }
 0x31d   : > { %v371_v21 = vpop.xlane.xlu1 %370 }
 0x31e   : > { %2542 = vrcp.f32 %v371_v21 }
 0x324   : > { %v2543_v23 = vpop.eup %2542 }
 0x325   : > { %v513_v24 = vpop.xlane.xlu2 %512  ;;  %v373_v25 = vmul.f32 %v2543_v23, %v2777_v45  ;;  %v655_v26 = vpop.xlane.xlu1 %654  ;;  %v1117_v45 = vld [vmem:[#allocation3 + $0x220] sm:$0xff] }
 0x326   : > { %2544 = vrcp.f32 %v513_v24  ;;  %v1140_v24 = vld [vmem:[#allocation3 + $0x2d8] sm:$0xff] }
 0x327   : > { %2449 = vmatmul.msk.f32.vlgmr.msrb.gmra.mxu3 %vm219_vm1, %v373_v25  ;;  %2546 = vrcp.f32 %v655_v26  ;;  %v1236_v25 = vld [vmem:[#allocation3 + $0x5d8] sm:$0xff]  ;;  %v1223_v26 = vld [vmem:[#allocation3 + $0x570] sm:$0xff] }
 0x328   : > { %676 = vmatpush.msrb.mxu3 %v2760_v22  ;;  %2548 = vrcp.f32 %v866_v20  ;;  %v1135_v22 = vld [vmem:[#allocation3 + $0x2b0] sm:$0xff]  ;;  %v1109_v20 = vld [vmem:[#allocation3 + $0x1e0] sm:$0xff] }
 0x329   : > { %1680 = vmatpush.xpose.msra.mxu0 %v1135_v22  ;;  %v1224_v22 = vld [vmem:[#allocation3 + $0x578] sm:$0xff] }
 0x32c   : > { %v2545_v27 = vpop.eup %2544 }
 0x32d   : > { %v515_v28 = vmul.f32 %v2545_v27, %v2783_v50  ;;  %v2547_v29 = vpop.eup %2546  ;;  %v1013_v35 = vpop.permute.xlu2 %1012  ;;  %1681 = vmatpush.xpose.msra.mxu0 %v1129_v40  ;;  %v1103_v27 = vld [vmem:[#allocation3 + $0x1b0] sm:$0xff]  ;;  %v1116_v40 = vld [vmem:[#allocation3 + $0x218] sm:$0xff] }
 0x32e   : > { %v657_v30 = vmul.f32 %v2547_v29, %v2781_v49  ;;  %v2549_v34 = vpop.eup %2548  ;;  %v1118_v49 = vld [vmem:[#allocation3 + $0x228] sm:$0xff] }
 0x32f   : > { %2455 = vmatmul.msk.f32.vlgmr.msra.gmra.mxu3 %vm219_vm1, %v515_v28  ;;  %v868_v36 = vmul.f32 %v2549_v34, %v2769_v31  ;;  %v1130_v31 = vld [vmem:[#allocation3 + $0x288] sm:$0xff]  ;;  %v1128_v34 = vld [vmem:[#allocation3 + $0x278] sm:$0xff] }
 0x330   : > { %818 = vmatpush.msra.mxu3 %v826_v5  ;;  %v1063_v5 = vld [vmem:[#allocation3 + $0x70] sm:$0xff]  ;;  %v1134_v28 = vld [vmem:[#allocation3 + $0x2a8] sm:$0xff] }
 0x331   : > { %1682 = vmatpush.xpose.msra.mxu0 %v1123_v43  ;;  %v1230_v29 = vld [vmem:[#allocation3 + $0x5a8] sm:$0xff]  ;;  %v1079_v43 = vld [vmem:[#allocation3 + $0xf0] sm:$0xff] }
 0x335   : > { %v1008_v33 = vpop.xlane.xlu0 %1007  ;;  %1683 = vmatpush.xpose.msra.mxu0 %v1117_v45  ;;  %v1193_v45 = vld [vmem:[#allocation3 + $0x480] sm:$0xff] }
 0x336   : > { %2550 = vrcp.f32 %v1008_v33 }
 0x337   : > { %2461 = vmatmul.msk.f32.vlgmr.msrb.gmra.mxu3 %vm219_vm1, %v657_v30 }
 0x338   : > { %960 = vmatpush.msrb.mxu3 %v968_v2  ;;  %v1121_v2 = vld [vmem:[#allocation3 + $0x240] sm:$0xff] }
 0x339   : > { %1684 = vmatpush.xpose.msra.mxu0 %v1111_v48  ;;  %1642 = vmatpush.xpose.msra.mxu1 %v1121_v2  ;;  %v1073_v48 = vld [vmem:[#allocation3 + $0xc0] sm:$0xff] }
 0x33a   : > { %v1157_v2 = vld [vmem:[#allocation3 + $0x360] sm:$0xff] }
 0x33c   : > { %v2551_v41 = vpop.eup %2550 }
 0x33d   : > { %v467_v37 = vpop.f32.mrf.mxu2  ;;  %v871_v38 = vpop.permute.xlu1 %870  ;;  %v1010_v44 = vmul.f32 %v2551_v41, %v2791_v63  ;;  %1685 = vmatpush.xpose.msra.mxu0 %v1105_v51  ;;  %v1075_v63 = vld [vmem:[#allocation3 + $0xd0] sm:$0xff]  ;;  %1643 = vmatpush.xpose.msra.mxu1 %v1115_v14  ;;  %v1212_v41 = vld [vmem:[#allocation3 + $0x518] sm:$0xff]  ;;  %v1098_v51 = vld [vmem:[#allocation3 + $0x188] sm:$0xff] }
 0x33e   : > { %471 = vrot.lane.b32.xlu0 %v467_v37, %s2608_s25  ;;  %891 = vmatpush.msra.mxu2 %v871_v38  ;;  %v1122_v37 = vld [vmem:[#allocation3 + $0x248] sm:$0xff]  ;;  %v1125_v14 = vld [vmem:[#allocation3 + $0x260] sm:$0xff] }
 0x33f   : > { %2470 = vmatmul.msk.f32.vlgmr.msra.gmra.mxu2 %vm219_vm1, %v868_v36  ;;  %v1091_v36 = vld [vmem:[#allocation3 + $0x150] sm:$0xff]  ;;  %v1218_v38 = vld [vmem:[#allocation3 + $0x548] sm:$0xff] }
 0x340   : > { %1033 = vmatpush.msrb.mxu2 %v1013_v35  ;;  %v1211_v35 = vld [vmem:[#allocation3 + $0x510] sm:$0xff] }
 0x341   : > { %1686 = vmatpush.xpose.msra.mxu0 %v1099_v54  ;;  %1644 = vmatpush.xpose.msra.mxu1 %v1109_v20  ;;  %v1092_v54 = vld [vmem:[#allocation3 + $0x158] sm:$0xff] }
 0x342   : > { %1699 = vmatpush.xpose.msra.mxu2 %v1142_v39  ;;  %v1205_v39 = vld [vmem:[#allocation3 + $0x4e0] sm:$0xff]  ;;  %v1152_v20 = vld [vmem:[#allocation3 + $0x338] sm:$0xff] }
 0x345   : > { %v609_v46 = vpop.f32.mrf.mxu2  ;;  %1687 = vmatpush.xpose.msra.mxu0 %v1093_v56  ;;  %1645 = vmatpush.xpose.msra.mxu1 %v1103_v27  ;;  %v1061_v56 = vld [vmem:[#allocation3 + $0x60] sm:$0xff] }
 0x346   : > { %1700 = vmatpush.xpose.msra.mxu2 %v1136_v42  ;;  %v1199_v42 = vld [vmem:[#allocation3 + $0x4b0] sm:$0xff]  ;;  %v1113_v27 = vld [vmem:[#allocation3 + $0x200] sm:$0xff] }
 0x347   : > { %2476 = vmatmul.msk.f32.vlgmr.msrb.gmra.mxu2 %vm219_vm1, %v1010_v44  ;;  %v1110_v44 = vld [vmem:[#allocation3 + $0x1e8] sm:$0xff] }
 0x349   : > { %1688 = vmatpush.xpose.msra.mxu0 %v1087_v58  ;;  %1646 = vmatpush.xpose.msra.mxu1 %v1097_v32  ;;  %v1086_v58 = vld [vmem:[#allocation3 + $0x128] sm:$0xff]  ;;  %v1107_v32 = vld [vmem:[#allocation3 + $0x1d0] sm:$0xff] }
 0x34a   : > { %1701 = vmatpush.xpose.msra.mxu2 %v1130_v31  ;;  %v1206_v31 = vld [vmem:[#allocation3 + $0x4e8] sm:$0xff] }
 0x34d   : > { %1689 = vmatpush.xpose.msra.mxu0 %v1081_v61  ;;  %1647 = vmatpush.xpose.msra.mxu1 %v1091_v36  ;;  %v1055_v61 = vld [vmem:[#allocation3 + $0x30] sm:$0xff]  ;;  %v1240_v36 = vld [vmem:[#allocation3 + $0x5f8] sm:$0xff] }
 0x34e   : > { %1702 = vmatpush.xpose.msra.mxu2 %v1124_v47  ;;  %v1200_v47 = vld [vmem:[#allocation3 + $0x4b8] sm:$0xff] }
 0x34f   : > { %v324_v50 = vpop.f32.mrf.mxu3 }
 0x350   : > { %v751_v52 = vpop.f32.mrf.mxu2  ;;  %328 = vrot.lane.b32.xlu1 %v324_v50, %s2608_s25  ;;  %v1067_v50 = vld [vmem:[#allocation3 + $0x90] sm:$0xff] }
 0x351   : > { %755 = vrot.lane.b32.xlu2 %v751_v52, %s2608_s25  ;;  %1690 = vmatpush.xpose.msra.mxu0 %v1075_v63  ;;  %v1194_v52 = vld [vmem:[#allocation3 + $0x488] sm:$0xff]  ;;  %v1080_v63 = vld [vmem:[#allocation3 + $0xf8] sm:$0xff] }
 0x352   : > { %1703 = vmatpush.xpose.msra.mxu2 %v1118_v49  ;;  %v1187_v49 = vld [vmem:[#allocation3 + $0x450] sm:$0xff] }
 0x355   : > { %1691 = vmatpush.xpose.msra.mxu0 %v1069_v59  ;;  %v1143_v59 = vld [vmem:[#allocation3 + $0x2f0] sm:$0xff] }
 0x356   : > { %1704 = vmatpush.xpose.msra.mxu2 %v1112_v53  ;;  %v1181_v53 = vld [vmem:[#allocation3 + $0x420] sm:$0xff] }
 0x358   : > { %613 = vrot.lane.b32.xlu1 %v609_v46, %s2608_s25  ;;  %v1104_v46 = vld [vmem:[#allocation3 + $0x1b8] sm:$0xff] }
 0x359   : > { %1692 = vmatpush.xpose.msra.mxu0 %v1063_v5  ;;  %v1163_v5 = vld [vmem:[#allocation3 + $0x390] sm:$0xff] }
 0x35a   : > { %1705 = vmatpush.xpose.msra.mxu2 %v1106_v55  ;;  %v1188_v55 = vld [vmem:[#allocation3 + $0x458] sm:$0xff] }
 0x35d   : > { %1693 = vmatpush.xpose.msra.mxu0 %v1057_v8  ;;  %v1068_v8 = vld [vmem:[#allocation3 + $0x98] sm:$0xff] }
 0x35e   : > { %1706 = vmatpush.xpose.msra.mxu2 %v1100_v57  ;;  %v1175_v57 = vld [vmem:[#allocation3 + $0x3f0] sm:$0xff] }
 0x361   : > { %1694 = vmatpush.xpose.msra.mxu0 %v1051_v11  ;;  %v1062_v11 = vld [vmem:[#allocation3 + $0x68] sm:$0xff] }
 0x362   : > { %1707 = vmatpush.xpose.msra.mxu2 %v1094_v60  ;;  %v1182_v60 = vld [vmem:[#allocation3 + $0x428] sm:$0xff] }
 0x365   : > { %1759 = vmatpush.xpose.msrb.mxu0 %v1235_v12  ;;  %v1151_v12 = vld [vmem:[#allocation3 + $0x330] sm:$0xff] }
 0x366   : > { %1708 = vmatpush.xpose.msra.mxu2 %v1088_v62  ;;  %v1169_v62 = vld [vmem:[#allocation3 + $0x3c0] sm:$0xff] }
 0x369   : > { %1760 = vmatpush.xpose.msrb.mxu0 %v1229_v19  ;;  %v1056_v19 = vld [vmem:[#allocation3 + $0x38] sm:$0xff] }
 0x36a   : > { %1709 = vmatpush.xpose.msra.mxu2 %v1082_v0  ;;  %v1176_v0 = vld [vmem:[#allocation3 + $0x3f8] sm:$0xff] }
 0x36d   : > { %1761 = vmatpush.xpose.msrb.mxu0 %v1223_v26  ;;  %v1144_v26 = vld [vmem:[#allocation3 + $0x2f8] sm:$0xff] }
 0x36e   : > { %1710 = vmatpush.xpose.msra.mxu2 %v1076_v3  ;;  %v1074_v3 = vld [vmem:[#allocation3 + $0xc8] sm:$0xff] }
 0x372   : > { %1711 = vmatpush.xpose.msra.mxu2 %v1070_v6  ;;  %v1137_v6 = vld [vmem:[#allocation3 + $0x2c0] sm:$0xff] }
 0x373   : > { %v797_v10 = vpop.xlane.xlu0 %796 }
 0x374   : > { %2552 = vrcp.f32 %v797_v10  ;;  %v1131_v10 = vld [vmem:[#allocation3 + $0x290] sm:$0xff] }
 0x376   : > { %1712 = vmatpush.xpose.msra.mxu2 %v1064_v9  ;;  %v1164_v9 = vld [vmem:[#allocation3 + $0x398] sm:$0xff] }
 0x37a   : > { %1713 = vmatpush.xpose.msra.mxu2 %v1058_v13  ;;  %v2553_v15 = vpop.eup %2552  ;;  %v1158_v13 = vld [vmem:[#allocation3 + $0x368] sm:$0xff] }
 0x37b   : > { %v799_v21 = vmul.f32 %v2553_v15, %v2809_v16  ;;  %v939_v23 = vpop.xlane.xlu0 %938  ;;  %v1217_v16 = vld [vmem:[#allocation3 + $0x540] sm:$0xff] }
 0x37c   : > { %2554 = vrcp.f32 %v939_v23  ;;  %1762 = vmatpush.xpose.msrb.mxu0 %v1217_v16  ;;  %v1119_v23 = vld [vmem:[#allocation3 + $0x230] sm:$0xff]  ;;  %v1138_v16 = vld [vmem:[#allocation3 + $0x2c8] sm:$0xff] }
 0x37d   : > { %2467 = vmatmul.msk.f32.vlgmr.msra.gmra.mxu3 %vm219_vm1, %v799_v21  ;;  %v1145_v21 = vld [vmem:[#allocation3 + $0x300] sm:$0xff] }
 0x37e   : > { %1714 = vmatpush.xpose.msra.mxu2 %v1052_v17  ;;  %1659 = vmatpush.xpose.msra.mxu3 %v1140_v24  ;;  %v1050_v24 = vld [vmem:[#allocation3 + $0x8] sm:$0xff] }
 0x380   : > { %1763 = vmatpush.xpose.msrb.mxu0 %v1211_v35 }
 0x382   : > { %1779 = vmatpush.xpose.msrb.mxu2 %v1236_v25  ;;  %v2555_v30 = vpop.eup %2554  ;;  %1660 = vmatpush.xpose.msra.mxu3 %v1134_v28  ;;  %v1146_v25 = vld [vmem:[#allocation3 + $0x308] sm:$0xff] }
 0x383   : > { %v941_v33 = vmul.f32 %v2555_v30, %v2813_v18  ;;  %v1085_v18 = vld [vmem:[#allocation3 + $0x120] sm:$0xff] }
 0x384   : > { %1764 = vmatpush.xpose.msrb.mxu0 %v1205_v39  ;;  %1648 = vmatpush.xpose.msra.mxu1 %v1085_v18  ;;  %v1095_v39 = vld [vmem:[#allocation3 + $0x170] sm:$0xff]  ;;  %v1089_v18 = vld [vmem:[#allocation3 + $0x140] sm:$0xff] }
 0x385   : > { %2473 = vmatmul.msk.f32.vlgmr.msrb.gmra.mxu3 %vm219_vm1, %v941_v33  ;;  %v1132_v33 = vld [vmem:[#allocation3 + $0x298] sm:$0xff] }
 0x386   : > { %1780 = vmatpush.xpose.msrb.mxu2 %v1230_v29  ;;  %1661 = vmatpush.xpose.msra.mxu3 %v1128_v34  ;;  %v1101_v34 = vld [vmem:[#allocation3 + $0x1a0] sm:$0xff] }
 0x388   : > { %1765 = vmatpush.xpose.msrb.mxu0 %v1199_v42  ;;  %1649 = vmatpush.xpose.msra.mxu1 %v1079_v43 }
 0x38a   : > { %1781 = vmatpush.xpose.msrb.mxu2 %v1224_v22  ;;  %1662 = vmatpush.xpose.msra.mxu3 %v1122_v37 }
 0x38c   : > { %1766 = vmatpush.xpose.msrb.mxu0 %v1193_v45  ;;  %1650 = vmatpush.xpose.msra.mxu1 %v1073_v48  ;;  %v1114_v45 = vld [vmem:[#allocation3 + $0x208] sm:$0xff]  ;;  %v1108_v48 = vld [vmem:[#allocation3 + $0x1d8] sm:$0xff] }
 0x38e   : > { %1782 = vmatpush.xpose.msrb.mxu2 %v1218_v38  ;;  %1663 = vmatpush.xpose.msra.mxu3 %v1116_v40  ;;  %v1126_v38 = vld [vmem:[#allocation3 + $0x268] sm:$0xff] }
 0x38f   : > { %v1234_v40 = vld [vmem:[#allocation3 + $0x5c8] sm:$0xff] }
 0x390   : > { %1767 = vmatpush.xpose.msrb.mxu0 %v1187_v49  ;;  %1651 = vmatpush.xpose.msra.mxu1 %v1067_v50  ;;  %v1077_v49 = vld [vmem:[#allocation3 + $0xe0] sm:$0xff]  ;;  %v1239_v50 = vld [vmem:[#allocation3 + $0x5f0] sm:$0xff] }
 0x392   : > { %1783 = vmatpush.xpose.msrb.mxu2 %v1212_v41  ;;  %1664 = vmatpush.xpose.msra.mxu3 %v1110_v44  ;;  %v1120_v41 = vld [vmem:[#allocation3 + $0x238] sm:$0xff] }
 0x394   : > { %1768 = vmatpush.xpose.msrb.mxu0 %v1181_v53  ;;  %1652 = vmatpush.xpose.msra.mxu1 %v1061_v56  ;;  %v1102_v53 = vld [vmem:[#allocation3 + $0x1a8] sm:$0xff] }
 0x395   : > { %v1210_v56 = vld [vmem:[#allocation3 + $0x508] sm:$0xff] }
 0x396   : > { %1784 = vmatpush.xpose.msrb.mxu2 %v1206_v31  ;;  %1665 = vmatpush.xpose.msra.mxu3 %v1104_v46  ;;  %v1228_v31 = vld [vmem:[#allocation3 + $0x598] sm:$0xff]  ;;  %v1083_v46 = vld [vmem:[#allocation3 + $0x110] sm:$0xff] }
 0x398   : > { %1769 = vmatpush.xpose.msrb.mxu0 %v1175_v57  ;;  %1653 = vmatpush.xpose.msra.mxu1 %v1055_v61  ;;  %v1096_v57 = vld [vmem:[#allocation3 + $0x178] sm:$0xff] }
 0x399   : > { %v1204_v61 = vld [vmem:[#allocation3 + $0x4d8] sm:$0xff] }
 0x39a   : > { %1785 = vmatpush.xpose.msrb.mxu2 %v1200_v47  ;;  %1666 = vmatpush.xpose.msra.mxu3 %v1098_v51  ;;  %v1222_v47 = vld [vmem:[#allocation3 + $0x568] sm:$0xff] }
 0x39c   : > { %1770 = vmatpush.xpose.msrb.mxu0 %v1169_v62  ;;  %1654 = vmatpush.xpose.msra.mxu1 %v1049_v1  ;;  %v1090_v62 = vld [vmem:[#allocation3 + $0x148] sm:$0xff] }
 0x39d   : > { %v1198_v1 = vld [vmem:[#allocation3 + $0x4a8] sm:$0xff] }
 0x39e   : > { %1786 = vmatpush.xpose.msrb.mxu2 %v1194_v52  ;;  %1667 = vmatpush.xpose.msra.mxu3 %v1092_v54  ;;  %v1216_v52 = vld [vmem:[#allocation3 + $0x538] sm:$0xff]  ;;  %v1071_v54 = vld [vmem:[#allocation3 + $0xb0] sm:$0xff] }
 0x3a0   : > { %1719 = vmatpush.xpose.msrb.mxu1 %v1143_v59  ;;  %1771 = vmatpush.xpose.msrb.mxu0 %v1163_v5  ;;  %v1084_v59 = vld [vmem:[#allocation3 + $0x118] sm:$0xff]  ;;  %v1237_v5 = vld [vmem:[#allocation3 + $0x5e0] sm:$0xff] }
 0x3a2   : > { %1787 = vmatpush.xpose.msrb.mxu2 %v1188_v55  ;;  %1668 = vmatpush.xpose.msra.mxu3 %v1086_v58  ;;  %v1233_v55 = vld [vmem:[#allocation3 + $0x5c0] sm:$0xff] }
 0x3a3   : > { %v1065_v58 = vld [vmem:[#allocation3 + $0x80] sm:$0xff] }
 0x3a4   : > { %1720 = vmatpush.xpose.msrb.mxu1 %v1137_v6  ;;  %1772 = vmatpush.xpose.msrb.mxu0 %v1157_v2  ;;  %v1192_v6 = vld [vmem:[#allocation3 + $0x478] sm:$0xff]  ;;  %v1186_v2 = vld [vmem:[#allocation3 + $0x448] sm:$0xff] }
 0x3a6   : > { %1788 = vmatpush.xpose.msrb.mxu2 %v1182_v60  ;;  %1669 = vmatpush.xpose.msra.mxu3 %v1080_v63  ;;  %v1227_v60 = vld [vmem:[#allocation3 + $0x590] sm:$0xff] }
 0x3a7   : > { %v1059_v63 = vld [vmem:[#allocation3 + $0x50] sm:$0xff] }
 0x3a8   : > { %1721 = vmatpush.xpose.msrb.mxu1 %v1131_v10  ;;  %1773 = vmatpush.xpose.msrb.mxu0 %v1151_v12  ;;  %v1072_v10 = vld [vmem:[#allocation3 + $0xb8] sm:$0xff] }
 0x3a9   : > { %v1180_v12 = vld [vmem:[#allocation3 + $0x418] sm:$0xff] }
 0x3aa   : > { %1789 = vmatpush.xpose.msrb.mxu2 %v1176_v0  ;;  %1670 = vmatpush.xpose.msra.mxu3 %v1074_v3  ;;  %v394_v7 = vpop.f32.mrf.mxu3  ;;  %v1221_v0 = vld [vmem:[#allocation3 + $0x560] sm:$0xff]  ;;  %v1215_v3 = vld [vmem:[#allocation3 + $0x530] sm:$0xff] }
 0x3ab   : > { %397 = vst.msk [vmem:[#allocation2 + $0x8] sm:$0xff] %vm191_vm0, %v394_v7  ;;  %v756_v29 = vpop.permute.xlu2 %755  ;;  %v1078_v7 = vld [vmem:[#allocation3 + $0xe8] sm:$0xff] }
 0x3ac   : > { %1722 = vmatpush.xpose.msrb.mxu1 %v1125_v14  ;;  %1774 = vmatpush.xpose.msrb.mxu0 %v1145_v21  ;;  %v1066_v14 = vld [vmem:[#allocation3 + $0x88] sm:$0xff]  ;;  %v1191_v21 = vld [vmem:[#allocation3 + $0x470] sm:$0xff] }
 0x3ae   : > { %1790 = vmatpush.xpose.msrb.mxu2 %v1170_v4  ;;  %1671 = vmatpush.xpose.msra.mxu3 %v1068_v8  ;;  %v1053_v4 = vld [vmem:[#allocation3 + $0x20] sm:$0xff]  ;;  %v1231_v8 = vld [vmem:[#allocation3 + $0x5b0] sm:$0xff] }
 0x3b0   : > { %v472_v15 = vpop.permute.xlu0 %471  ;;  %1723 = vmatpush.xpose.msrb.mxu1 %v1119_v23  ;;  %v1213_v23 = vld [vmem:[#allocation3 + $0x520] sm:$0xff] }
 0x3b1   : > { %474 = vst.msk [vmem:[#allocation2 + $0x8] sm:$0xff] %vm331_vm2, %v472_v15  ;;  %v1219_v15 = vld [vmem:[#allocation3 + $0x550] sm:$0xff] }
 0x3b2   : > { %1791 = vmatpush.xpose.msrb.mxu2 %v1164_v9  ;;  %1672 = vmatpush.xpose.msra.mxu3 %v1062_v11  ;;  %v536_v17 = vpop.f32.mrf.mxu3  ;;  %v1209_v9 = vld [vmem:[#allocation3 + $0x500] sm:$0xff]  ;;  %v1203_v11 = vld [vmem:[#allocation3 + $0x4d0] sm:$0xff] }
 0x3b3   : > { %539 = vst.msk [vmem:[#allocation2 + $0x10] sm:$0xff] %vm191_vm0, %v536_v17  ;;  %v1197_v17 = vld [vmem:[#allocation3 + $0x4a0] sm:$0xff] }
 0x3b4   : > { %1724 = vmatpush.xpose.msrb.mxu1 %v1113_v27  ;;  %v1185_v27 = vld [vmem:[#allocation3 + $0x440] sm:$0xff] }
 0x3b6   : > { %1792 = vmatpush.xpose.msrb.mxu2 %v1158_v13  ;;  %1673 = vmatpush.xpose.msra.mxu3 %v1056_v19  ;;  %v1225_v13 = vld [vmem:[#allocation3 + $0x580] sm:$0xff]  ;;  %v1174_v19 = vld [vmem:[#allocation3 + $0x3e8] sm:$0xff] }
 0x3b8   : > { %v2840_v30 = vld [vmem:[#allocation2 + $0x8] sm:$0xff]  ;;  %1725 = vmatpush.xpose.msrb.mxu1 %v1107_v32  ;;  %v1179_v32 = vld [vmem:[#allocation3 + $0x410] sm:$0xff] }
 0x3ba   : > { %1793 = vmatpush.xpose.msrb.mxu2 %v1152_v20  ;;  %1674 = vmatpush.xpose.msra.mxu3 %v1050_v24  ;;  %v678_v28 = vpop.f32.mrf.mxu3  ;;  %v1060_v20 = vld [vmem:[#allocation3 + $0x58] sm:$0xff] }
 0x3bb   : > { %681 = vst.msk [vmem:[#allocation2 + $0x18] sm:$0xff] %vm191_vm0, %v678_v28  ;;  %v1168_v24 = vld [vmem:[#allocation3 + $0x3b8] sm:$0xff]  ;;  %v1207_v28 = vld [vmem:[#allocation3 + $0x4f0] sm:$0xff] }
 0x3bc   : > { %758 = vst.msk [vmem:[#allocation2 + $0x18] sm:$0xff] %vm331_vm2, %v756_v29  ;;  %1726 = vmatpush.xpose.msrb.mxu1 %v1101_v34  ;;  %v1162_v29 = vld [vmem:[#allocation3 + $0x388] sm:$0xff]  ;;  %v1156_v34 = vld [vmem:[#allocation3 + $0x358] sm:$0xff] }
 0x3bd   : > { %1675 = vmatmul.f32.vlgmr.msra.gmra.mxu3 %v2840_v30 }
 0x3be   : > { %1794 = vmatpush.xpose.msrb.mxu2 %v1146_v25  ;;  %1739 = vmatpush.xpose.msrb.mxu3 %v1144_v26  ;;  %v1054_v25 = vld [vmem:[#allocation3 + $0x28] sm:$0xff] }
 0x3bf   : > { %v1238_v26 = vld [vmem:[#allocation3 + $0x5e8] sm:$0xff] }
 0x3c0   : > { %1727 = vmatpush.xpose.msrb.mxu1 %v1095_v39 }
 0x3c2   : > { %1740 = vmatpush.xpose.msrb.mxu3 %v1138_v16  ;;  %v893_v22 = vpop.f32.mrf.mxu2  ;;  %v329_v35 = vpop.permute.xlu1 %328  ;;  %v1232_v16 = vld [vmem:[#allocation3 + $0x5b8] sm:$0xff] }
 0x3c3   : > { %332 = vst.msk [vmem:[#allocation2] sm:$0xff] %vm331_vm2, %v329_v35  ;;  %897 = vrot.lane.b32.xlu1 %v893_v22, %s2608_s25  ;;  %v2846_v37 = vld [vmem:[#allocation2 + $0x18] sm:$0xff]  ;;  %v1173_v35 = vld [vmem:[#allocation3 + $0x3e0] sm:$0xff] }
 0x3c4   : > { %1715 = vmatmul.f32.vlgmr.msra.gmra.mxu2 %v2846_v37  ;;  %1728 = vmatpush.xpose.msrb.mxu1 %v1089_v18  ;;  %v1226_v22 = vld [vmem:[#allocation3 + $0x588] sm:$0xff]  ;;  %v1167_v18 = vld [vmem:[#allocation3 + $0x3b0] sm:$0xff] }
 0x3c5   : > { %1859 = vmatpush.xpose.msra.mxu2 %v1240_v36  ;;  %v1195_v36 = vld [vmem:[#allocation3 + $0x490] sm:$0xff] }
 0x3c6   : > { %1741 = vmatpush.xpose.msrb.mxu3 %v1132_v33  ;;  %v1201_v33 = vld [vmem:[#allocation3 + $0x4c0] sm:$0xff] }
 0x3c8   : > { %1729 = vmatpush.xpose.msrb.mxu1 %v1083_v46  ;;  %v1183_v46 = vld [vmem:[#allocation3 + $0x430] sm:$0xff] }
 0x3c9   : > { %1860 = vmatpush.xpose.msra.mxu2 %v1234_v40  ;;  %v1334_v40 = vld [vmem:[#allocation3 + $0x8e8] sm:$0xff] }
 0x3ca   : > { %1742 = vmatpush.xpose.msrb.mxu3 %v1126_v38  ;;  %v1035_v42 = vpop.f32.mrf.mxu2  ;;  %v614_v43 = vpop.permute.xlu1 %613  ;;  %v2849_v44 = vld [vmem:[#allocation2] sm:$0xff]  ;;  %v1150_v38 = vld [vmem:[#allocation3 + $0x328] sm:$0xff] }
 0x3cb   : > { %616 = vst.msk [vmem:[#allocation2 + $0x10] sm:$0xff] %vm331_vm2, %v614_v43  ;;  %1039 = vrot.lane.b32.xlu2 %v1035_v42, %s2608_s25  ;;  %1655 = vmatmul.f32.vlgmr.msra.gmra.mxu1 %v2849_v44  ;;  %v1189_v42 = vld [vmem:[#allocation3 + $0x460] sm:$0xff]  ;;  %v1328_v43 = vld [vmem:[#allocation3 + $0x8b8] sm:$0xff] }
 0x3cc   : > { %1795 = vmatmul.f32.vlgmr.msrb.gmra.mxu2 %v2840_v30  ;;  %1730 = vmatpush.xpose.msrb.mxu1 %v1077_v49  ;;  %v1208_v49 = vld [vmem:[#allocation3 + $0x4f8] sm:$0xff] }
 0x3cd   : > { %1861 = vmatpush.xpose.msra.mxu2 %v1228_v31  ;;  %v1214_v31 = vld [vmem:[#allocation3 + $0x528] sm:$0xff] }
 0x3ce   : > { %1743 = vmatpush.xpose.msrb.mxu3 %v1120_v41  ;;  %v1220_v41 = vld [vmem:[#allocation3 + $0x558] sm:$0xff] }
 0x3d0   : > { %1731 = vmatpush.xpose.msrb.mxu1 %v1071_v54  ;;  %v1202_v54 = vld [vmem:[#allocation3 + $0x4c8] sm:$0xff] }
 0x3d1   : > { %1862 = vmatpush.xpose.msra.mxu2 %v1222_v47 }
 0x3d2   : > { %1744 = vmatpush.xpose.msrb.mxu3 %v1114_v45  ;;  %v2855_v51 = vld [vmem:[#allocation2 + $0x10] sm:$0xff] }
 0x3d3   : > { %1695 = vmatmul.f32.vlgmr.msra.gmra.mxu0 %v2855_v51  ;;  %v1161_v45 = vld [vmem:[#allocation3 + $0x380] sm:$0xff] }
 0x3d4   : > { %1839 = vmatpush.xpose.msra.mxu0 %v1239_v50  ;;  %1732 = vmatpush.xpose.msrb.mxu1 %v1065_v58  ;;  %v1155_v50 = vld [vmem:[#allocation3 + $0x350] sm:$0xff]  ;;  %v1310_v58 = vld [vmem:[#allocation3 + $0x828] sm:$0xff] }
 0x3d5   : > { %1863 = vmatpush.xpose.msra.mxu2 %v1216_v52  ;;  %v1177_v52 = vld [vmem:[#allocation3 + $0x400] sm:$0xff] }
 0x3d6   : > { %1745 = vmatpush.xpose.msrb.mxu3 %v1108_v48  ;;  %v1322_v48 = vld [vmem:[#allocation3 + $0x888] sm:$0xff] }
 0x3d8   : > { %1840 = vmatpush.xpose.msra.mxu0 %v1233_v55  ;;  %1733 = vmatpush.xpose.msrb.mxu1 %v1059_v63  ;;  %v1149_v55 = vld [vmem:[#allocation3 + $0x320] sm:$0xff]  ;;  %v1304_v63 = vld [vmem:[#allocation3 + $0x7f8] sm:$0xff] }
 0x3d9   : > { %1864 = vmatpush.xpose.msra.mxu2 %v1210_v56  ;;  %v1171_v56 = vld [vmem:[#allocation3 + $0x3d0] sm:$0xff] }
 0x3da   : > { %1746 = vmatpush.xpose.msrb.mxu3 %v1102_v53  ;;  %v1316_v53 = vld [vmem:[#allocation3 + $0x858] sm:$0xff] }
 0x3db   : > { %1775 = vmatmul.f32.vlgmr.msrb.gmra.mxu0 %v2849_v44 }
 0x3dc   : > { %1841 = vmatpush.xpose.msra.mxu0 %v1227_v60  ;;  %1734 = vmatpush.xpose.msrb.mxu1 %v1053_v4  ;;  %v1196_v60 = vld [vmem:[#allocation3 + $0x498] sm:$0xff] }
 0x3dd   : > { %1865 = vmatpush.xpose.msra.mxu2 %v1204_v61  ;;  %v1165_v61 = vld [vmem:[#allocation3 + $0x3a0] sm:$0xff]  ;;  %v1184_v4 = vld [vmem:[#allocation3 + $0x438] sm:$0xff] }
 0x3de   : > { %1747 = vmatpush.xpose.msrb.mxu3 %v1096_v57  ;;  %v1333_v57 = vld [vmem:[#allocation3 + $0x8e0] sm:$0xff] }
 0x3e0   : > { %1842 = vmatpush.xpose.msra.mxu0 %v1221_v0  ;;  %1799 = vmatpush.xpose.msra.mxu1 %v1237_v5  ;;  %v1190_v0 = vld [vmem:[#allocation3 + $0x468] sm:$0xff]  ;;  %v1153_v5 = vld [vmem:[#allocation3 + $0x340] sm:$0xff] }
 0x3e1   : > { %1866 = vmatpush.xpose.msra.mxu2 %v1198_v1  ;;  %v1159_v1 = vld [vmem:[#allocation3 + $0x370] sm:$0xff] }
 0x3e2   : > { %1748 = vmatpush.xpose.msrb.mxu3 %v1090_v62  ;;  %v1327_v62 = vld [vmem:[#allocation3 + $0x8b0] sm:$0xff] }
 0x3e4   : > { %1843 = vmatpush.xpose.msra.mxu0 %v1215_v3  ;;  %1800 = vmatpush.xpose.msra.mxu1 %v1231_v8  ;;  %v1298_v3 = vld [vmem:[#allocation3 + $0x7c8] sm:$0xff] }
 0x3e5   : > { %1867 = vmatpush.xpose.msra.mxu2 %v1192_v6  ;;  %v1315_v6 = vld [vmem:[#allocation3 + $0x850] sm:$0xff]  ;;  %v1178_v8 = vld [vmem:[#allocation3 + $0x408] sm:$0xff] }
 0x3e6   : > { %1749 = vmatpush.xpose.msrb.mxu3 %v1084_v59  ;;  %v1321_v59 = vld [vmem:[#allocation3 + $0x880] sm:$0xff] }
 0x3e8   : > { %1844 = vmatpush.xpose.msra.mxu0 %v1209_v9  ;;  %1801 = vmatpush.xpose.msra.mxu1 %v1225_v13  ;;  %v1147_v9 = vld [vmem:[#allocation3 + $0x310] sm:$0xff] }
 0x3e9   : > { %1868 = vmatpush.xpose.msra.mxu2 %v1186_v2  ;;  %v1309_v2 = vld [vmem:[#allocation3 + $0x820] sm:$0xff]  ;;  %v1303_v13 = vld [vmem:[#allocation3 + $0x7f0] sm:$0xff] }
 0x3ea   : > { %1750 = vmatpush.xpose.msrb.mxu3 %v1078_v7  ;;  %v1292_v7 = vld [vmem:[#allocation3 + $0x798] sm:$0xff] }
 0x3ec   : > { %1845 = vmatpush.xpose.msra.mxu0 %v1203_v11  ;;  %1802 = vmatpush.xpose.msra.mxu1 %v1219_v15  ;;  %v1172_v11 = vld [vmem:[#allocation3 + $0x3d8] sm:$0xff]  ;;  %v1166_v15 = vld [vmem:[#allocation3 + $0x3a8] sm:$0xff] }
 0x3ed   : > { %1869 = vmatpush.xpose.msra.mxu2 %v1180_v12  ;;  %v1280_v12 = vld [vmem:[#allocation3 + $0x738] sm:$0xff] }
 0x3ee   : > { %1751 = vmatpush.xpose.msrb.mxu3 %v1072_v10  ;;  %v1286_v10 = vld [vmem:[#allocation3 + $0x768] sm:$0xff] }
 0x3f0   : > { %1846 = vmatpush.xpose.msra.mxu0 %v1197_v17  ;;  %1803 = vmatpush.xpose.msra.mxu1 %v1213_v23  ;;  %v1297_v17 = vld [vmem:[#allocation3 + $0x7c0] sm:$0xff]  ;;  %v1268_v23 = vld [vmem:[#allocation3 + $0x6d8] sm:$0xff] }
 0x3f1   : > { %1870 = vmatpush.xpose.msra.mxu2 %v1174_v19  ;;  %v1274_v19 = vld [vmem:[#allocation3 + $0x708] sm:$0xff] }
 0x3f2   : > { %1752 = vmatpush.xpose.msrb.mxu3 %v1066_v14 }
 0x3f4   : > { %1847 = vmatpush.xpose.msra.mxu0 %v1191_v21  ;;  %1804 = vmatpush.xpose.msra.mxu1 %v1207_v28  ;;  %v1291_v21 = vld [vmem:[#allocation3 + $0x790] sm:$0xff]  ;;  %v1148_v28 = vld [vmem:[#allocation3 + $0x318] sm:$0xff] }
 0x3f5   : > { %1871 = vmatpush.xpose.msra.mxu2 %v1168_v24 }
 0x3f6   : > { %1753 = vmatpush.xpose.msrb.mxu3 %v1060_v20  ;;  %v1160_v20 = vld [vmem:[#allocation3 + $0x378] sm:$0xff] }
 0x3f8   : > { %1848 = vmatpush.xpose.msra.mxu0 %v1185_v27  ;;  %1805 = vmatpush.xpose.msra.mxu1 %v1201_v33  ;;  %v1262_v27 = vld [vmem:[#allocation3 + $0x6a8] sm:$0xff] }
 0x3f9   : > { %1872 = vmatpush.xpose.msra.mxu2 %v1162_v29  ;;  %v1332_v29 = vld [vmem:[#allocation3 + $0x8d8] sm:$0xff] }
 0x3fa   : > { %1754 = vmatpush.xpose.msrb.mxu3 %v1054_v25  ;;  %v1154_v25 = vld [vmem:[#allocation3 + $0x348] sm:$0xff] }
 0x3fc   : > { %1849 = vmatpush.xpose.msra.mxu0 %v1179_v32  ;;  %1806 = vmatpush.xpose.msra.mxu1 %v1195_v36  ;;  %v1256_v32 = vld [vmem:[#allocation3 + $0x678] sm:$0xff] }
 0x3fd   : > { %1873 = vmatpush.xpose.msra.mxu2 %v1156_v34  ;;  %v1326_v34 = vld [vmem:[#allocation3 + $0x8a8] sm:$0xff]  ;;  %v1320_v36 = vld [vmem:[#allocation3 + $0x878] sm:$0xff] }
 0x3fe   : > { %1819 = vmatpush.xpose.msra.mxu3 %v1238_v26  ;;  %v1285_v26 = vld [vmem:[#allocation3 + $0x760] sm:$0xff] }
 0x400   : > { %1850 = vmatpush.xpose.msra.mxu0 %v1173_v35  ;;  %v820_v39 = vpop.f32.mrf.mxu3  ;;  %1807 = vmatpush.xpose.msra.mxu1 %v1189_v42  ;;  %v1250_v35 = vld [vmem:[#allocation3 + $0x648] sm:$0xff] }
 0x401   : > { %823 = vst.msk [vmem:[#allocation2 + $0x20] sm:$0xff] %vm191_vm0, %v820_v39  ;;  %1874 = vmatpush.xpose.msra.mxu2 %v1150_v38  ;;  %v1267_v38 = vld [vmem:[#allocation3 + $0x6d0] sm:$0xff]  ;;  %v1244_v39 = vld [vmem:[#allocation3 + $0x618] sm:$0xff]  ;;  %v1314_v42 = vld [vmem:[#allocation3 + $0x848] sm:$0xff] }
 0x402   : > { %1820 = vmatpush.xpose.msra.mxu3 %v1232_v16  ;;  %v1279_v16 = vld [vmem:[#allocation3 + $0x730] sm:$0xff] }
 0x404   : > { %1851 = vmatpush.xpose.msra.mxu0 %v1167_v18  ;;  %1808 = vmatpush.xpose.msra.mxu1 %v1183_v46  ;;  %v1428_v18 = vld [vmem:[#allocation3 + $0xbd8] sm:$0xff] }
 0x405   : > { %1939 = vmatpush.xpose.msrb.mxu2 %v1334_v40  ;;  %v1331_v40 = vld [vmem:[#allocation3 + $0x8d0] sm:$0xff]  ;;  %v1308_v46 = vld [vmem:[#allocation3 + $0x818] sm:$0xff] }
 0x406   : > { %1821 = vmatpush.xpose.msra.mxu3 %v1226_v22  ;;  %v1273_v22 = vld [vmem:[#allocation3 + $0x700] sm:$0xff] }
 0x408   : > { %1852 = vmatpush.xpose.msra.mxu0 %v1161_v45  ;;  %v962_v47 = vpop.f32.mrf.mxu3  ;;  %1809 = vmatpush.xpose.msra.mxu1 %v1177_v52  ;;  %v1422_v45 = vld [vmem:[#allocation3 + $0xba8] sm:$0xff]  ;;  %v1249_v52 = vld [vmem:[#allocation3 + $0x640] sm:$0xff] }
 0x409   : > { %1940 = vmatpush.xpose.msrb.mxu2 %v1328_v43  ;;  %965 = vst.msk [vmem:[#allocation2 + $0x28] sm:$0xff] %vm191_vm0, %v962_v47  ;;  %v1261_v43 = vld [vmem:[#allocation3 + $0x6a0] sm:$0xff]  ;;  %v1255_v47 = vld [vmem:[#allocation3 + $0x670] sm:$0xff] }
 0x40a   : > { %1822 = vmatpush.xpose.msra.mxu3 %v1220_v41 }
 0x40c   : > { %1853 = vmatpush.xpose.msra.mxu0 %v1155_v50  ;;  %1810 = vmatpush.xpose.msra.mxu1 %v1171_v56  ;;  %v1302_v50 = vld [vmem:[#allocation3 + $0x7e8] sm:$0xff]  ;;  %v1427_v56 = vld [vmem:[#allocation3 + $0xbd0] sm:$0xff] }
 0x40d   : > { %1941 = vmatpush.xpose.msrb.mxu2 %v1322_v48  ;;  %v1319_v48 = vld [vmem:[#allocation3 + $0x870] sm:$0xff] }
 0x40e   : > { %1823 = vmatpush.xpose.msra.mxu3 %v1214_v31  ;;  %v1325_v31 = vld [vmem:[#allocation3 + $0x8a0] sm:$0xff] }
 0x410   : > { %1854 = vmatpush.xpose.msra.mxu0 %v1149_v55  ;;  %1811 = vmatpush.xpose.msra.mxu1 %v1165_v61  ;;  %v1296_v55 = vld [vmem:[#allocation3 + $0x7b8] sm:$0xff]  ;;  %v1421_v61 = vld [vmem:[#allocation3 + $0xba0] sm:$0xff] }
 0x411   : > { %1942 = vmatpush.xpose.msrb.mxu2 %v1316_v53  ;;  %v1313_v53 = vld [vmem:[#allocation3 + $0x840] sm:$0xff] }
 0x412   : > { %1824 = vmatpush.xpose.msra.mxu3 %v1208_v49  ;;  %v1416_v49 = vld [vmem:[#allocation3 + $0xb78] sm:$0xff] }
 0x414   : > { %1919 = vmatpush.xpose.msrb.mxu0 %v1333_v57  ;;  %1812 = vmatpush.xpose.msra.mxu1 %v1159_v1  ;;  %v1307_v57 = vld [vmem:[#allocation3 + $0x810] sm:$0xff] }
 0x415   : > { %1943 = vmatpush.xpose.msrb.mxu2 %v1310_v58  ;;  %v1404_v58 = vld [vmem:[#allocation3 + $0xb18] sm:$0xff]  ;;  %v1415_v1 = vld [vmem:[#allocation3 + $0xb70] sm:$0xff] }
 0x416   : > { %1825 = vmatpush.xpose.msra.mxu3 %v1202_v54  ;;  %v1410_v54 = vld [vmem:[#allocation3 + $0xb48] sm:$0xff] }
 0x418   : > { %1920 = vmatpush.xpose.msrb.mxu0 %v1327_v62  ;;  %1813 = vmatpush.xpose.msra.mxu1 %v1153_v5  ;;  %v1301_v62 = vld [vmem:[#allocation3 + $0x7e0] sm:$0xff] }
 0x419   : > { %1944 = vmatpush.xpose.msrb.mxu2 %v1304_v63  ;;  %v1398_v63 = vld [vmem:[#allocation3 + $0xae8] sm:$0xff]  ;;  %v1409_v5 = vld [vmem:[#allocation3 + $0xb40] sm:$0xff] }
 0x41a   : > { %1826 = vmatpush.xpose.msra.mxu3 %v1196_v60  ;;  %v1290_v60 = vld [vmem:[#allocation3 + $0x788] sm:$0xff] }
 0x41c   : > { %1921 = vmatpush.xpose.msrb.mxu0 %v1321_v59  ;;  %1814 = vmatpush.xpose.msra.mxu1 %v1147_v9  ;;  %v1295_v59 = vld [vmem:[#allocation3 + $0x7b0] sm:$0xff] }
 0x41d   : > { %1945 = vmatpush.xpose.msrb.mxu2 %v1298_v3  ;;  %v1392_v3 = vld [vmem:[#allocation3 + $0xab8] sm:$0xff]  ;;  %v1283_v9 = vld [vmem:[#allocation3 + $0x750] sm:$0xff] }
 0x41e   : > { %1827 = vmatpush.xpose.msra.mxu3 %v1190_v0  ;;  %v1284_v0 = vld [vmem:[#allocation3 + $0x758] sm:$0xff] }
 0x420   : > { %1922 = vmatpush.xpose.msrb.mxu0 %v1315_v6  ;;  %v1289_v6 = vld [vmem:[#allocation3 + $0x780] sm:$0xff] }
 0x421   : > { %1946 = vmatpush.xpose.msrb.mxu2 %v1292_v7  ;;  %v1386_v7 = vld [vmem:[#allocation3 + $0xa88] sm:$0xff] }
 0x422   : > { %1828 = vmatpush.xpose.msra.mxu3 %v1184_v4  ;;  %v1278_v4 = vld [vmem:[#allocation3 + $0x728] sm:$0xff] }
 0x424   : > { %1923 = vmatpush.xpose.msrb.mxu0 %v1309_v2  ;;  %v1380_v2 = vld [vmem:[#allocation3 + $0xa58] sm:$0xff] }
 0x425   : > { %1947 = vmatpush.xpose.msrb.mxu2 %v1286_v10  ;;  %v1040_v14 = vpop.permute.xlu2 %1039  ;;  %v1266_v10 = vld [vmem:[#allocation3 + $0x6c8] sm:$0xff] }
 0x426   : > { %1829 = vmatpush.xpose.msra.mxu3 %v1178_v8  ;;  %1042 = vst.msk [vmem:[#allocation2 + $0x28] sm:$0xff] %vm331_vm2, %v1040_v14  ;;  %v1403_v8 = vld [vmem:[#allocation3 + $0xb10] sm:$0xff]  ;;  %v1260_v14 = vld [vmem:[#allocation3 + $0x698] sm:$0xff] }
 0x428   : > { %1924 = vmatpush.xpose.msrb.mxu0 %v1303_v13  ;;  %v1277_v13 = vld [vmem:[#allocation3 + $0x720] sm:$0xff] }
 0x429   : > { %1948 = vmatpush.xpose.msrb.mxu2 %v1280_v12  ;;  %v1374_v12 = vld [vmem:[#allocation3 + $0xa28] sm:$0xff] }
 0x42a   : > { %1830 = vmatpush.xpose.msra.mxu3 %v1172_v11  ;;  %v1397_v11 = vld [vmem:[#allocation3 + $0xae0] sm:$0xff] }
 0x42c   : > { %1925 = vmatpush.xpose.msrb.mxu0 %v1297_v17  ;;  %v1271_v17 = vld [vmem:[#allocation3 + $0x6f0] sm:$0xff] }
 0x42d   : > { %1949 = vmatpush.xpose.msrb.mxu2 %v1274_v19  ;;  %v2862_v24 = vld [vmem:[#allocation2 + $0x28] sm:$0xff] }
 0x42e   : > { %1831 = vmatpush.xpose.msra.mxu3 %v1166_v15  ;;  %1875 = vmatmul.f32.vlgmr.msra.gmra.mxu2 %v2862_v24  ;;  %v1391_v15 = vld [vmem:[#allocation3 + $0xab0] sm:$0xff]  ;;  %v1368_v19 = vld [vmem:[#allocation3 + $0x9f8] sm:$0xff] }
 0x42f   : > { %1755 = vmatmul.f32.vlgmr.msrb.gmra.mxu3 %v2862_v24 }
 0x430   : > { %1926 = vmatpush.xpose.msrb.mxu0 %v1291_v21  ;;  %v1385_v21 = vld [vmem:[#allocation3 + $0xa80] sm:$0xff] }
 0x431   : > { %1950 = vmatpush.xpose.msrb.mxu2 %v1268_v23  ;;  %v1265_v23 = vld [vmem:[#allocation3 + $0x6c0] sm:$0xff] }
 0x432   : > { %1832 = vmatpush.xpose.msra.mxu3 %v1160_v20  ;;  %v1254_v20 = vld [vmem:[#allocation3 + $0x668] sm:$0xff] }
 0x434   : > { %1927 = vmatpush.xpose.msrb.mxu0 %v1285_v26  ;;  %v1248_v26 = vld [vmem:[#allocation3 + $0x638] sm:$0xff] }
 0x435   : > { %1951 = vmatpush.xpose.msrb.mxu2 %v1262_v27  ;;  %v898_v33 = vpop.permute.xlu1 %897  ;;  %v1379_v27 = vld [vmem:[#allocation3 + $0xa50] sm:$0xff] }
 0x436   : > { %1833 = vmatpush.xpose.msra.mxu3 %v1154_v25  ;;  %900 = vst.msk [vmem:[#allocation2 + $0x20] sm:$0xff] %vm331_vm2, %v898_v33  ;;  %v1362_v25 = vld [vmem:[#allocation3 + $0x9c8] sm:$0xff]  ;;  %v1373_v33 = vld [vmem:[#allocation3 + $0xa20] sm:$0xff] }
 0x438   : > { %1928 = vmatpush.xpose.msrb.mxu0 %v1279_v16  ;;  %v1242_v16 = vld [vmem:[#allocation3 + $0x608] sm:$0xff] }
 0x439   : > { %1952 = vmatpush.xpose.msrb.mxu2 %v1256_v32  ;;  %v1336_v32 = vld [vmem:[#allocation3 + $0x8f8] sm:$0xff] }
 0x43a   : > { %1834 = vmatpush.xpose.msra.mxu3 %v1148_v28  ;;  %v1259_v28 = vld [vmem:[#allocation3 + $0x690] sm:$0xff] }
 0x43c   : > { %1929 = vmatpush.xpose.msrb.mxu0 %v1273_v22  ;;  %v1350_v22 = vld [vmem:[#allocation3 + $0x968] sm:$0xff] }
 0x43d   : > { %1835 = vmatmul.f32.vlgmr.msra.gmra.mxu3 %v2846_v37  ;;  %1953 = vmatpush.xpose.msrb.mxu2 %v1250_v35  ;;  %v2868_v41 = vld [vmem:[#allocation2 + $0x20] sm:$0xff]  ;;  %v1330_v35 = vld [vmem:[#allocation3 + $0x8c8] sm:$0xff] }
 0x43e   : > { %1899 = vmatpush.xpose.msrb.mxu3 %v1332_v29  ;;  %1735 = vmatmul.f32.vlgmr.msrb.gmra.mxu1 %v2868_v41  ;;  %v1356_v29 = vld [vmem:[#allocation3 + $0x998] sm:$0xff] }
 0x43f   : > { %1855 = vmatmul.f32.vlgmr.msra.gmra.mxu0 %v2868_v41  ;;  %1879 = vmatpush.xpose.msrb.mxu1 %v1331_v40  ;;  %v1324_v40 = vld [vmem:[#allocation3 + $0x898] sm:$0xff] }
 0x440   : > { %1930 = vmatpush.xpose.msrb.mxu0 %v1267_v38  ;;  %v1247_v38 = vld [vmem:[#allocation3 + $0x630] sm:$0xff] }
 0x441   : > { %1954 = vmatpush.xpose.msrb.mxu2 %v1244_v39  ;;  %v1344_v39 = vld [vmem:[#allocation3 + $0x938] sm:$0xff] }
 0x442   : > { %1900 = vmatpush.xpose.msrb.mxu3 %v1326_v34  ;;  %v1253_v34 = vld [vmem:[#allocation3 + $0x660] sm:$0xff] }
 0x443   : > { %1880 = vmatpush.xpose.msrb.mxu1 %v1325_v31  ;;  %v1335_v31 = vld [vmem:[#allocation3 + $0x8f0] sm:$0xff] }
 0x444   : > { %1931 = vmatpush.xpose.msrb.mxu0 %v1261_v43  ;;  %1955 = vmatmul.f32.vlgmr.msrb.gmra.mxu2 %v2846_v37  ;;  %v1243_v37 = vld [vmem:[#allocation3 + $0x610] sm:$0xff]  ;;  %v1338_v43 = vld [vmem:[#allocation3 + $0x908] sm:$0xff] }
 0x445   : > { %2019 = vmatpush.xpose.msra.mxu2 %v1428_v18  ;;  %v1361_v18 = vld [vmem:[#allocation3 + $0x9c0] sm:$0xff] }
 0x446   : > { %1901 = vmatpush.xpose.msrb.mxu3 %v1320_v36  ;;  %1815 = vmatmul.f32.vlgmr.msra.gmra.mxu1 %v2855_v51  ;;  %v1367_v36 = vld [vmem:[#allocation3 + $0x9f0] sm:$0xff] }
 0x447   : > { %1881 = vmatpush.xpose.msrb.mxu1 %v1319_v48  ;;  %v1329_v48 = vld [vmem:[#allocation3 + $0x8c0] sm:$0xff] }
 0x448   : > { %1932 = vmatpush.xpose.msrb.mxu0 %v1255_v47  ;;  %v1355_v47 = vld [vmem:[#allocation3 + $0x990] sm:$0xff] }
 0x449   : > { %2020 = vmatpush.xpose.msra.mxu2 %v1422_v45  ;;  %v1432_v45 = vld [vmem:[#allocation3 + $0xbf8] sm:$0xff] }
 0x44a   : > { %1902 = vmatpush.xpose.msrb.mxu3 %v1314_v42  ;;  %v1241_v42 = vld [vmem:[#allocation3 + $0x600] sm:$0xff] }
 0x44b   : > { %1882 = vmatpush.xpose.msrb.mxu1 %v1313_v53  ;;  %v1323_v53 = vld [vmem:[#allocation3 + $0x890] sm:$0xff] }
 0x44c   : > { %1933 = vmatpush.xpose.msrb.mxu0 %v1249_v52  ;;  %v1349_v52 = vld [vmem:[#allocation3 + $0x960] sm:$0xff] }
 0x44d   : > { %2021 = vmatpush.xpose.msra.mxu2 %v1416_v49  ;;  %v1426_v49 = vld [vmem:[#allocation3 + $0xbc8] sm:$0xff] }
 0x44e   : > { %1903 = vmatpush.xpose.msrb.mxu3 %v1308_v46  ;;  %v1318_v46 = vld [vmem:[#allocation3 + $0x868] sm:$0xff] }
 0x44f   : > { %1883 = vmatpush.xpose.msrb.mxu1 %v1307_v57  ;;  %v1414_v57 = vld [vmem:[#allocation3 + $0xb68] sm:$0xff] }
 0x450   : > { %1934 = vmatpush.xpose.msrb.mxu0 %v1243_v37  ;;  %v1343_v37 = vld [vmem:[#allocation3 + $0x930] sm:$0xff] }
 0x451   : > { %2022 = vmatpush.xpose.msra.mxu2 %v1410_v54  ;;  %v1420_v54 = vld [vmem:[#allocation3 + $0xb98] sm:$0xff] }
 0x452   : > { %1904 = vmatpush.xpose.msrb.mxu3 %v1302_v50  ;;  %v1312_v50 = vld [vmem:[#allocation3 + $0x838] sm:$0xff] }
 0x453   : > { %1935 = vmatmul.f32.vlgmr.msrb.gmra.mxu0 %v2855_v51  ;;  %1884 = vmatpush.xpose.msrb.mxu1 %v1301_v62  ;;  %v1272_v51 = vld [vmem:[#allocation3 + $0x6f8] sm:$0xff] }
 0x454   : > { %1999 = vmatpush.xpose.msra.mxu0 %v1427_v56  ;;  %v1317_v56 = vld [vmem:[#allocation3 + $0x860] sm:$0xff]  ;;  %v1408_v62 = vld [vmem:[#allocation3 + $0xb38] sm:$0xff] }
 0x455   : > { %2023 = vmatpush.xpose.msra.mxu2 %v1404_v58  ;;  %v1300_v58 = vld [vmem:[#allocation3 + $0x7d8] sm:$0xff] }
 0x456   : > { %1905 = vmatpush.xpose.msrb.mxu3 %v1296_v55  ;;  %v1306_v55 = vld [vmem:[#allocation3 + $0x808] sm:$0xff] }
 0x457   : > { %1885 = vmatpush.xpose.msrb.mxu1 %v1295_v59  ;;  %v1402_v59 = vld [vmem:[#allocation3 + $0xb08] sm:$0xff] }
 0x458   : > { %2000 = vmatpush.xpose.msra.mxu0 %v1421_v61  ;;  %v1311_v61 = vld [vmem:[#allocation3 + $0x830] sm:$0xff] }
 0x459   : > { %2024 = vmatpush.xpose.msra.mxu2 %v1398_v63  ;;  %v1294_v63 = vld [vmem:[#allocation3 + $0x7a8] sm:$0xff] }
 0x45a   : > { %1906 = vmatpush.xpose.msrb.mxu3 %v1290_v60  ;;  %v1337_v60 = vld [vmem:[#allocation3 + $0x900] sm:$0xff] }
 0x45b   : > { %1886 = vmatpush.xpose.msrb.mxu1 %v1289_v6  ;;  %v1396_v6 = vld [vmem:[#allocation3 + $0xad8] sm:$0xff] }
 0x45c   : > { %2001 = vmatpush.xpose.msra.mxu0 %v1415_v1  ;;  %v1305_v1 = vld [vmem:[#allocation3 + $0x800] sm:$0xff] }
 0x45d   : > { %2025 = vmatpush.xpose.msra.mxu2 %v1392_v3  ;;  %v1288_v3 = vld [vmem:[#allocation3 + $0x778] sm:$0xff] }
 0x45e   : > { %1907 = vmatpush.xpose.msrb.mxu3 %v1284_v0  ;;  %v1425_v0 = vld [vmem:[#allocation3 + $0xbc0] sm:$0xff] }
 0x45f   : > { %1887 = vmatpush.xpose.msrb.mxu1 %v1283_v9  ;;  %v1390_v9 = vld [vmem:[#allocation3 + $0xaa8] sm:$0xff] }
 0x460   : > { %2002 = vmatpush.xpose.msra.mxu0 %v1409_v5  ;;  %v1299_v5 = vld [vmem:[#allocation3 + $0x7d0] sm:$0xff] }
 0x461   : > { %2026 = vmatpush.xpose.msra.mxu2 %v1386_v7  ;;  %v1282_v7 = vld [vmem:[#allocation3 + $0x748] sm:$0xff] }
 0x462   : > { %1908 = vmatpush.xpose.msrb.mxu3 %v1278_v4  ;;  %v1419_v4 = vld [vmem:[#allocation3 + $0xb90] sm:$0xff] }
 0x463   : > { %1888 = vmatpush.xpose.msrb.mxu1 %v1277_v13  ;;  %v1270_v13 = vld [vmem:[#allocation3 + $0x6e8] sm:$0xff] }
 0x464   : > { %2003 = vmatpush.xpose.msra.mxu0 %v1403_v8  ;;  %v1293_v8 = vld [vmem:[#allocation3 + $0x7a0] sm:$0xff] }
 0x465   : > { %2027 = vmatpush.xpose.msra.mxu2 %v1380_v2  ;;  %v1276_v2 = vld [vmem:[#allocation3 + $0x718] sm:$0xff] }
 0x466   : > { %1909 = vmatpush.xpose.msrb.mxu3 %v1272_v51  ;;  %v1413_v51 = vld [vmem:[#allocation3 + $0xb60] sm:$0xff] }
 0x467   : > { %1889 = vmatpush.xpose.msrb.mxu1 %v1271_v17  ;;  %v1264_v17 = vld [vmem:[#allocation3 + $0x6b8] sm:$0xff] }
 0x468   : > { %2004 = vmatpush.xpose.msra.mxu0 %v1397_v11  ;;  %v1384_v11 = vld [vmem:[#allocation3 + $0xa78] sm:$0xff] }
 0x469   : > { %2028 = vmatpush.xpose.msra.mxu2 %v1374_v12  ;;  %v1401_v12 = vld [vmem:[#allocation3 + $0xb00] sm:$0xff] }
 0x46a   : > { %1910 = vmatpush.xpose.msrb.mxu3 %v1266_v10  ;;  %v1287_v10 = vld [vmem:[#allocation3 + $0x770] sm:$0xff] }
 0x46b   : > { %1890 = vmatpush.xpose.msrb.mxu1 %v1265_v23  ;;  %v1258_v23 = vld [vmem:[#allocation3 + $0x688] sm:$0xff] }
 0x46c   : > { %2005 = vmatpush.xpose.msra.mxu0 %v1391_v15  ;;  %v1378_v15 = vld [vmem:[#allocation3 + $0xa48] sm:$0xff] }
 0x46d   : > { %2029 = vmatpush.xpose.msra.mxu2 %v1368_v19  ;;  %v1395_v19 = vld [vmem:[#allocation3 + $0xad0] sm:$0xff] }
 0x46e   : > { %1911 = vmatpush.xpose.msrb.mxu3 %v1260_v14  ;;  %v1281_v14 = vld [vmem:[#allocation3 + $0x740] sm:$0xff] }
 0x46f   : > { %1891 = vmatpush.xpose.msrb.mxu1 %v1259_v28  ;;  %v1252_v28 = vld [vmem:[#allocation3 + $0x658] sm:$0xff] }
 0x470   : > { %2006 = vmatpush.xpose.msra.mxu0 %v1385_v21  ;;  %v1372_v21 = vld [vmem:[#allocation3 + $0xa18] sm:$0xff] }
 0x471   : > { %2030 = vmatpush.xpose.msra.mxu2 %v1362_v25  ;;  %v1389_v25 = vld [vmem:[#allocation3 + $0xaa0] sm:$0xff] }
 0x472   : > { %1912 = vmatpush.xpose.msrb.mxu3 %v1254_v20  ;;  %v1275_v20 = vld [vmem:[#allocation3 + $0x710] sm:$0xff] }
 0x473   : > { %1892 = vmatpush.xpose.msrb.mxu1 %v1253_v34  ;;  %v1246_v34 = vld [vmem:[#allocation3 + $0x628] sm:$0xff] }
 0x474   : > { %2007 = vmatpush.xpose.msra.mxu0 %v1379_v27  ;;  %v1366_v27 = vld [vmem:[#allocation3 + $0x9e8] sm:$0xff] }
 0x475   : > { %2031 = vmatpush.xpose.msra.mxu2 %v1356_v29  ;;  %v2882_v29 = vld [vmem:[%s2922_s2] sm:$0x3f] }
 0x476   : > { %1913 = vmatpush.xpose.msrb.mxu3 %v1248_v26  ;;  %v1269_v26 = vld [vmem:[#allocation3 + $0x6e0] sm:$0xff] }
 0x477   : > { %1893 = vmatpush.xpose.msrb.mxu1 %v1247_v38  ;;  %v1377_v38 = vld [vmem:[#allocation3 + $0xa40] sm:$0xff] }
 0x478   : > { %2008 = vmatpush.xpose.msra.mxu0 %v1373_v33  ;;  %v1360_v33 = vld [vmem:[#allocation3 + $0x9b8] sm:$0xff] }
 0x479   : > { %2032 = vmatpush.xpose.msra.mxu2 %v1350_v22  ;;  %v1627_v22 = vperm.slane %v2882_v29, 0 }
 0x47a   : > { %1914 = vmatpush.xpose.msrb.mxu3 %v1242_v16  ;;  %v1383_v16 = vld [vmem:[#allocation3 + $0xa70] sm:$0xff] }
 0x47b   : > { %1894 = vmatpush.xpose.msrb.mxu1 %v1241_v42  ;;  %v1696_v42 = vpop.f32.mrf.mxu0 }
 0x47c   : > { %2009 = vmatpush.xpose.msra.mxu0 %v1367_v36  ;;  %v1656_v36 = vpop.f32.mrf.mxu1 }
 0x47d   : > { %1915 = vmatmul.f32.vlgmr.msrb.gmra.mxu3 %v2840_v30  ;;  %2033 = vmatpush.xpose.msra.mxu2 %v1344_v39  ;;  %v1257_v39 = vld [vmem:[#allocation3 + $0x680] sm:$0xff] }
 0x47e   : > { %1979 = vmatpush.xpose.msra.mxu3 %v1336_v32  ;;  %1895 = vmatmul.f32.vlgmr.msrb.gmra.mxu1 %v2849_v44  ;;  %v1263_v32 = vld [vmem:[#allocation3 + $0x6b0] sm:$0xff] }
 0x47f   : > { %1959 = vmatpush.xpose.msra.mxu1 %v1335_v31  ;;  %v1371_v31 = vld [vmem:[#allocation3 + $0xa10] sm:$0xff] }
 0x480   : > { %2010 = vmatpush.xpose.msra.mxu0 %v1361_v18  ;;  %v1657_v18 = vadd.f32 %v1656_v36, %v1627_v22  ;;  %v1513_v22 = vld [vmem:[#allocation3 + $0xe80] sm:$0xff]  ;;  %v1490_v36 = vld [vmem:[#allocation3 + $0xdc8] sm:$0xff] }
 0x481   : > { %2034 = vmatpush.xpose.msra.mxu2 %v1338_v43  ;;  %v1424_v43 = vld [vmem:[#allocation3 + $0xbb8] sm:$0xff] }
 0x482   : > { %1980 = vmatpush.xpose.msra.mxu3 %v1330_v35  ;;  %v1430_v35 = vld [vmem:[#allocation3 + $0xbe8] sm:$0xff] }
 0x483   : > { %1960 = vmatpush.xpose.msra.mxu1 %v1329_v48 }
 0x484   : > { %2011 = vmatpush.xpose.msra.mxu0 %v1355_v47  ;;  %2035 = vmatmul.f32.vlgmr.msra.gmra.mxu2 %v2840_v30  ;;  %v1431_v30 = vld [vmem:[#allocation3 + $0xbf0] sm:$0xff]  ;;  %v1676_v47 = vpop.f32.mrf.mxu3 }
 0x485   : > { %2099 = vmatpush.xpose.msrb.mxu2 %v1432_v45  ;;  %v1251_v45 = vld [vmem:[#allocation3 + $0x650] sm:$0xff]  ;;  %v1677_v48 = vadd.f32 %v1676_v47, %v1657_v18  ;;  %v1484_v18 = vld [vmem:[#allocation3 + $0xd98] sm:$0xff] }
 0x486   : > { %1981 = vmatpush.xpose.msra.mxu3 %v1324_v40  ;;  %v1354_v40 = vld [vmem:[#allocation3 + $0x988] sm:$0xff]  ;;  %v1375_v47 = vld [vmem:[#allocation3 + $0xa30] sm:$0xff] }
 0x487   : > { %1961 = vmatpush.xpose.msra.mxu1 %v1323_v53  ;;  %v1697_v53 = vadd.f32 %v1696_v42, %v1677_v48  ;;  %v1501_v42 = vld [vmem:[#allocation3 + $0xe20] sm:$0xff]  ;;  %v1472_v48 = vld [vmem:[#allocation3 + $0xd38] sm:$0xff] }
 0x488   : > { %2012 = vmatpush.xpose.msra.mxu0 %v1349_v52  ;;  %v1245_v52 = vld [vmem:[#allocation3 + $0x620] sm:$0xff] }
 0x489   : > { %2100 = vmatpush.xpose.msrb.mxu2 %v1426_v49  ;;  %v1418_v49 = vld [vmem:[#allocation3 + $0xb88] sm:$0xff] }
 0x48a   : > { %1982 = vmatpush.xpose.msra.mxu3 %v1318_v46  ;;  %v1348_v46 = vld [vmem:[#allocation3 + $0x958] sm:$0xff] }
 0x48b   : > { %1962 = vmatpush.xpose.msra.mxu1 %v1317_v56  ;;  %v1526_v56 = vld [vmem:[#allocation3 + $0xee8] sm:$0xff] }
 0x48c   : > { %2013 = vmatpush.xpose.msra.mxu0 %v1343_v37  ;;  %v1716_v37 = vpop.f32.mrf.mxu2 }
 0x48d   : > { %2101 = vmatpush.xpose.msrb.mxu2 %v1420_v54  ;;  %v1342_v54 = vld [vmem:[#allocation3 + $0x928] sm:$0xff] }
 0x48e   : > { %1983 = vmatpush.xpose.msra.mxu3 %v1312_v50  ;;  %v1365_v50 = vld [vmem:[#allocation3 + $0x9e0] sm:$0xff] }
 0x48f   : > { %1963 = vmatpush.xpose.msra.mxu1 %v1311_v61  ;;  %v1717_v61 = vadd.f32 %v1716_v37, %v1697_v53  ;;  %v1466_v53 = vld [vmem:[#allocation3 + $0xd08] sm:$0xff]  ;;  %v1363_v37 = vld [vmem:[#allocation3 + $0x9d0] sm:$0xff] }
 0x490   : > { %2014 = vmatpush.xpose.msra.mxu0 %v1337_v60  ;;  %v1628_v60 = vperm.slane %v2882_v29, 1 }
 0x491   : > { %2102 = vmatpush.xpose.msrb.mxu2 %v1414_v57  ;;  %v1412_v57 = vld [vmem:[#allocation3 + $0xb58] sm:$0xff] }
 0x492   : > { %1984 = vmatpush.xpose.msra.mxu3 %v1306_v55  ;;  %v1429_v55 = vld [vmem:[#allocation3 + $0xbe0] sm:$0xff] }
 0x493   : > { %2015 = vmatmul.f32.vlgmr.msra.gmra.mxu0 %v2849_v44  ;;  %1964 = vmatpush.xpose.msra.mxu1 %v1305_v1  ;;  %v1407_v44 = vld [vmem:[#allocation3 + $0xb30] sm:$0xff]  ;;  %v1520_v1 = vld [vmem:[#allocation3 + $0xeb8] sm:$0xff] }
 0x494   : > { %2079 = vmatpush.xpose.msrb.mxu0 %v1431_v30  ;;  %v1776_v30 = vpop.f32.mrf.mxu0 }
 0x495   : > { %2103 = vmatpush.xpose.msrb.mxu2 %v1408_v62  ;;  %v1423_v62 = vld [vmem:[#allocation3 + $0xbb0] sm:$0xff] }
 0x496   : > { %1985 = vmatpush.xpose.msra.mxu3 %v1300_v58  ;;  %v1359_v58 = vld [vmem:[#allocation3 + $0x9b0] sm:$0xff] }
 0x497   : > { %1965 = vmatpush.xpose.msra.mxu1 %v1299_v5  ;;  %v1777_v5 = vadd.f32 %v1776_v30, %v1628_v60  ;;  %v1357_v60 = vld [vmem:[#allocation3 + $0x9a0] sm:$0xff]  ;;  %v1454_v30 = vld [vmem:[#allocation3 + $0xca8] sm:$0xff] }
 0x498   : > { %2080 = vmatpush.xpose.msrb.mxu0 %v1425_v0 }
 0x499   : > { %2104 = vmatpush.xpose.msrb.mxu2 %v1402_v59 }
 0x49a   : > { %1986 = vmatpush.xpose.msra.mxu3 %v1294_v63 }
 0x49b   : > { %1966 = vmatpush.xpose.msra.mxu1 %v1293_v8  ;;  %v1400_v8 = vld [vmem:[#allocation3 + $0xaf8] sm:$0xff] }
 0x49c   : > { %2081 = vmatpush.xpose.msrb.mxu0 %v1419_v4  ;;  %v1353_v4 = vld [vmem:[#allocation3 + $0x980] sm:$0xff] }
 0x49d   : > { %2105 = vmatpush.xpose.msrb.mxu2 %v1396_v6 }
 0x49e   : > { %1987 = vmatpush.xpose.msra.mxu3 %v1288_v3  ;;  %v1406_v3 = vld [vmem:[#allocation3 + $0xb28] sm:$0xff] }
 0x49f   : > { %1967 = vmatpush.xpose.msra.mxu1 %v1287_v10 }
 0x4a0   : > { %2082 = vmatpush.xpose.msrb.mxu0 %v1413_v51  ;;  %v1514_v51 = vld [vmem:[#allocation3 + $0xe88] sm:$0xff] }
 0x4a1   : > { %2106 = vmatpush.xpose.msrb.mxu2 %v1390_v9  ;;  %v1347_v9 = vld [vmem:[#allocation3 + $0x950] sm:$0xff] }
 0x4a2   : > { %1988 = vmatpush.xpose.msra.mxu3 %v1282_v7  ;;  %v1417_v7 = vld [vmem:[#allocation3 + $0xb80] sm:$0xff] }
 0x4a3   : > { %1968 = vmatpush.xpose.msra.mxu1 %v1281_v14 }
 0x4a4   : > { %2083 = vmatpush.xpose.msrb.mxu0 %v1407_v44  ;;  %v1411_v44 = vld [vmem:[#allocation3 + $0xb50] sm:$0xff] }
 0x4a5   : > { %2107 = vmatpush.xpose.msrb.mxu2 %v1384_v11  ;;  %v1508_v11 = vld [vmem:[#allocation3 + $0xe58] sm:$0xff] }
 0x4a6   : > { %1989 = vmatpush.xpose.msra.mxu3 %v1276_v2 }
 0x4a7   : > { %1969 = vmatpush.xpose.msra.mxu1 %v1275_v20  ;;  %v1405_v20 = vld [vmem:[#allocation3 + $0xb20] sm:$0xff] }
 0x4a8   : > { %2084 = vmatpush.xpose.msrb.mxu0 %v1401_v12  ;;  %v1394_v12 = vld [vmem:[#allocation3 + $0xac8] sm:$0xff] }
 0x4a9   : > { %2108 = vmatpush.xpose.msrb.mxu2 %v1378_v15  ;;  %v1341_v15 = vld [vmem:[#allocation3 + $0x920] sm:$0xff] }
 0x4aa   : > { %1990 = vmatpush.xpose.msra.mxu3 %v1270_v13 }
 0x4ab   : > { %1970 = vmatpush.xpose.msra.mxu1 %v1269_v26  ;;  %v1388_v26 = vld [vmem:[#allocation3 + $0xa98] sm:$0xff] }
 0x4ac   : > { %2085 = vmatpush.xpose.msrb.mxu0 %v1395_v19  ;;  %v1525_v19 = vld [vmem:[#allocation3 + $0xee0] sm:$0xff] }
 0x4ad   : > { %2109 = vmatpush.xpose.msrb.mxu2 %v1372_v21 }
 0x4ae   : > { %1991 = vmatpush.xpose.msra.mxu3 %v1264_v17 }
 0x4af   : > { %1971 = vmatpush.xpose.msra.mxu1 %v1263_v32  ;;  %v1399_v32 = vld [vmem:[#allocation3 + $0xaf0] sm:$0xff] }
 0x4b0   : > { %2086 = vmatpush.xpose.msrb.mxu0 %v1389_v25 }
 0x4b1   : > { %2110 = vmatpush.xpose.msrb.mxu2 %v1366_v27 }
 0x4b2   : > { %1992 = vmatpush.xpose.msra.mxu3 %v1258_v23  ;;  %v1756_v63 = vpop.f32.mrf.mxu3  ;;  %v1502_v23 = vld [vmem:[#allocation3 + $0xe28] sm:$0xff] }
 0x4b3   : > { %1972 = vmatpush.xpose.msra.mxu1 %v1257_v39  ;;  %v1507_v39 = vld [vmem:[#allocation3 + $0xe50] sm:$0xff] }
 0x4b4   : > { %2087 = vmatpush.xpose.msrb.mxu0 %v1383_v16  ;;  %v1519_v16 = vld [vmem:[#allocation3 + $0xeb0] sm:$0xff] }
 0x4b5   : > { %2111 = vmatpush.xpose.msrb.mxu2 %v1360_v33  ;;  %v1496_v33 = vld [vmem:[#allocation3 + $0xdf8] sm:$0xff] }
 0x4b6   : > { %1993 = vmatpush.xpose.msra.mxu3 %v1252_v28 }
 0x4b7   : > { %1973 = vmatpush.xpose.msra.mxu1 %v1251_v45  ;;  %v1364_v45 = vld [vmem:[#allocation3 + $0x9d8] sm:$0xff] }
 0x4b8   : > { %2088 = vmatpush.xpose.msrb.mxu0 %v1377_v38  ;;  %v1376_v38 = vld [vmem:[#allocation3 + $0xa38] sm:$0xff] }
 0x4b9   : > { %2112 = vmatpush.xpose.msrb.mxu2 %v1354_v40  ;;  %v1387_v40 = vld [vmem:[#allocation3 + $0xa90] sm:$0xff] }
 0x4ba   : > { %1994 = vmatpush.xpose.msra.mxu3 %v1246_v34  ;;  %v1382_v34 = vld [vmem:[#allocation3 + $0xa68] sm:$0xff] }
 0x4bb   : > { %1974 = vmatpush.xpose.msra.mxu1 %v1245_v52  ;;  %v1736_v0 = vpop.f32.mrf.mxu1  ;;  %v1369_v52 = vld [vmem:[#allocation3 + $0xa00] sm:$0xff] }
 0x4bc   : > { %2089 = vmatpush.xpose.msrb.mxu0 %v1371_v31  ;;  %v1737_v59 = vadd.f32 %v1736_v0, %v1717_v61  ;;  %v1856_v21 = vpop.f32.mrf.mxu0  ;;  %v1478_v31 = vld [vmem:[#allocation3 + $0xd68] sm:$0xff]  ;;  %v1340_v61 = vld [vmem:[#allocation3 + $0x918] sm:$0xff]  ;;  %v1351_v0 = vld [vmem:[#allocation3 + $0x970] sm:$0xff] }
 0x4bd   : > { %1995 = vmatmul.f32.vlgmr.msra.gmra.mxu3 %v2862_v24  ;;  %2113 = vmatpush.xpose.msrb.mxu2 %v1348_v46  ;;  %v1495_v46 = vld [vmem:[#allocation3 + $0xdf0] sm:$0xff] }
 0x4be   : > { %2059 = vmatpush.xpose.msrb.mxu3 %v1430_v35  ;;  %1975 = vmatmul.f32.vlgmr.msra.gmra.mxu1 %v2868_v41  ;;  %v1757_v6 = vadd.f32 %v1756_v63, %v1737_v59  ;;  %v1393_v35 = vld [vmem:[#allocation3 + $0xac0] sm:$0xff]  ;;  %v1471_v63 = vld [vmem:[#allocation3 + $0xd30] sm:$0xff]  ;;  %v1518_v59 = vld [vmem:[#allocation3 + $0xea8] sm:$0xff] }
 0x4bf   : > { %2039 = vmatpush.xpose.msrb.mxu1 %v1429_v55  ;;  %v1483_v55 = vld [vmem:[#allocation3 + $0xd90] sm:$0xff] }
 0x4c0   : > { %2090 = vmatpush.xpose.msrb.mxu0 %v1365_v50  ;;  %2359 = vst [vmem:[%s2893_s4] sm:$0xff] %v1757_v6  ;;  %v1836_v14 = vpop.f32.mrf.mxu3  ;;  %v1489_v50 = vld [vmem:[#allocation3 + $0xdc0] sm:$0xff]  ;;  %v1442_v6 = vld [vmem:[#allocation3 + $0xc48] sm:$0xff] }
 0x4c1   : > { %2114 = vmatpush.xpose.msrb.mxu2 %v1342_v54  ;;  %v1352_v54 = vld [vmem:[#allocation3 + $0x978] sm:$0xff] }
 0x4c2   : > { %2060 = vmatpush.xpose.msrb.mxu3 %v1424_v43  ;;  %v1381_v43 = vld [vmem:[#allocation3 + $0xa60] sm:$0xff] }
 0x4c3   : > { %2040 = vmatpush.xpose.msrb.mxu1 %v1423_v62  ;;  %v1816_v10 = vpop.f32.mrf.mxu1  ;;  %v1524_v62 = vld [vmem:[#allocation3 + $0xed8] sm:$0xff] }
 0x4c4   : > { %2091 = vmatpush.xpose.msrb.mxu0 %v1359_v58  ;;  %2115 = vmatmul.f32.vlgmr.msrb.gmra.mxu2 %v2862_v24  ;;  %v1796_v24 = vpop.f32.mrf.mxu2  ;;  %v1477_v58 = vld [vmem:[#allocation3 + $0xd60] sm:$0xff] }
 0x4c5   : > { %2179 = vmatpush.xpose.msra.mxu2 %v1526_v56  ;;  %v1797_v2 = vadd.f32 %v1796_v24, %v1777_v5  ;;  %v1460_v56 = vld [vmem:[#allocation3 + $0xcd8] sm:$0xff]  ;;  %v1345_v5 = vld [vmem:[#allocation3 + $0x940] sm:$0xff] }
 0x4c6   : > { %2061 = vmatpush.xpose.msrb.mxu3 %v1418_v49  ;;  %v1358_v49 = vld [vmem:[#allocation3 + $0x9a8] sm:$0xff]  ;;  %v1436_v24 = vld [vmem:[#allocation3 + $0xc18] sm:$0xff] }
 0x4c7   : > { %2041 = vmatpush.xpose.msrb.mxu1 %v1417_v7  ;;  %v1817_v13 = vadd.f32 %v1816_v10, %v1797_v2  ;;  %v1512_v7 = vld [vmem:[#allocation3 + $0xe78] sm:$0xff]  ;;  %v1453_v10 = vld [vmem:[#allocation3 + $0xca0] sm:$0xff] }
 0x4c8   : > { %2092 = vmatpush.xpose.msrb.mxu0 %v1353_v4  ;;  %v1465_v4 = vld [vmem:[#allocation3 + $0xd00] sm:$0xff]  ;;  %v1620_v2 = vld [vmem:[#allocation3 + $0x11d8] sm:$0xff] }
 0x4c9   : > { %2180 = vmatpush.xpose.msra.mxu2 %v1520_v1  ;;  %v1837_v17 = vadd.f32 %v1836_v14, %v1817_v13  ;;  %v1448_v1 = vld [vmem:[#allocation3 + $0xc78] sm:$0xff]  ;;  %v2901_v13 = vld [vmem:[#allocation2 + $0x10] sm:$0xff] }
 0x4ca   : > { %2062 = vmatpush.xpose.msrb.mxu3 %v1412_v57  ;;  %v1346_v57 = vld [vmem:[#allocation3 + $0x948] sm:$0xff]  ;;  %v1500_v14 = vld [vmem:[#allocation3 + $0xe18] sm:$0xff] }
 0x4cb   : > { %2042 = vmatpush.xpose.msrb.mxu1 %v1411_v44  ;;  %v1857_v25 = vadd.f32 %v1856_v21, %v1837_v17  ;;  %v1506_v44 = vld [vmem:[#allocation3 + $0xe48] sm:$0xff]  ;;  %v1511_v17 = vld [vmem:[#allocation3 + $0xe70] sm:$0xff]  ;;  %v1441_v21 = vld [vmem:[#allocation3 + $0xc40] sm:$0xff] }
 0x4cc   : > { %2093 = vmatpush.xpose.msrb.mxu0 %v1347_v9  ;;  %v1876_v27 = vpop.f32.mrf.mxu2  ;;  %v1523_v9 = vld [vmem:[#allocation3 + $0xed0] sm:$0xff] }
 0x4cd   : > { %2181 = vmatpush.xpose.msra.mxu2 %v1514_v51  ;;  %v1877_v28 = vadd.f32 %v1876_v27, %v1857_v25  ;;  %v1459_v51 = vld [vmem:[#allocation3 + $0xcd0] sm:$0xff]  ;;  %v1602_v25 = vld [vmem:[#allocation3 + $0x1148] sm:$0xff] }
 0x4ce   : > { %2063 = vmatpush.xpose.msrb.mxu3 %v1406_v3  ;;  %v2898_v3 = vld [vmem:[#allocation2 + $0x18] sm:$0xff]  ;;  %v1435_v27 = vld [vmem:[#allocation3 + $0xc10] sm:$0xff] }
 0x4cf   : > { %2043 = vmatpush.xpose.msrb.mxu1 %v1405_v20  ;;  %2360 = vst [vmem:[%s2893_s4 + $0x8] sm:$0xff] %v1877_v28  ;;  %v1494_v20 = vld [vmem:[#allocation3 + $0xde8] sm:$0xff]  ;;  %v1619_v28 = vld [vmem:[#allocation3 + $0x11d0] sm:$0xff] }
 0x4d0   : > { %2094 = vmatpush.xpose.msrb.mxu0 %v1341_v15  ;;  %v1447_v15 = vld [vmem:[#allocation3 + $0xc70] sm:$0xff] }
 0x4d1   : > { %2182 = vmatpush.xpose.msra.mxu2 %v1508_v11  ;;  %v1517_v11 = vld [vmem:[#allocation3 + $0xea0] sm:$0xff] }
 0x4d2   : > { %2064 = vmatpush.xpose.msrb.mxu3 %v1400_v8  ;;  %v1339_v8 = vld [vmem:[#allocation3 + $0x910] sm:$0xff] }
 0x4d3   : > { %2095 = vmatmul.f32.vlgmr.msrb.gmra.mxu0 %v2868_v41  ;;  %2044 = vmatpush.xpose.msrb.mxu1 %v1399_v32  ;;  %v1370_v41 = vld [vmem:[#allocation3 + $0xa08] sm:$0xff]  ;;  %v1596_v32 = vld [vmem:[#allocation3 + $0x1118] sm:$0xff] }
 0x4d4   : > { %2159 = vmatpush.xpose.msra.mxu0 %v1525_v19  ;;  %v1608_v19 = vld [vmem:[#allocation3 + $0x1178] sm:$0xff] }
 0x4d5   : > { %2183 = vmatpush.xpose.msra.mxu2 %v1502_v23  ;;  %v1505_v23 = vld [vmem:[#allocation3 + $0xe40] sm:$0xff] }
 0x4d6   : > { %2065 = vmatpush.xpose.msrb.mxu3 %v1394_v12  ;;  %v1614_v12 = vld [vmem:[#allocation3 + $0x11a8] sm:$0xff] }
 0x4d7   : > { %2045 = vmatpush.xpose.msrb.mxu1 %v1393_v35  ;;  %v1590_v35 = vld [vmem:[#allocation3 + $0x10e8] sm:$0xff] }
 0x4d8   : > { %2160 = vmatpush.xpose.msra.mxu0 %v1519_v16  ;;  %v1499_v16 = vld [vmem:[#allocation3 + $0xe10] sm:$0xff] }
 0x4d9   : > { %2184 = vmatpush.xpose.msra.mxu2 %v1496_v33  ;;  %v1482_v33 = vld [vmem:[#allocation3 + $0xd88] sm:$0xff] }
 0x4da   : > { %2066 = vmatpush.xpose.msrb.mxu3 %v1388_v26  ;;  %v1488_v26 = vld [vmem:[#allocation3 + $0xdb8] sm:$0xff] }
 0x4db   : > { %2046 = vmatpush.xpose.msrb.mxu1 %v1387_v40  ;;  %v1584_v40 = vld [vmem:[#allocation3 + $0x10b8] sm:$0xff] }
 0x4dc   : > { %2161 = vmatpush.xpose.msra.mxu0 %v1513_v22  ;;  %v1493_v22 = vld [vmem:[#allocation3 + $0xde0] sm:$0xff] }
 0x4dd   : > { %2185 = vmatpush.xpose.msra.mxu2 %v1490_v36  ;;  %v1476_v36 = vld [vmem:[#allocation3 + $0xd58] sm:$0xff] }
 0x4de   : > { %2067 = vmatpush.xpose.msrb.mxu3 %v1382_v34  ;;  %v1613_v34 = vld [vmem:[#allocation3 + $0x11a0] sm:$0xff] }
 0x4df   : > { %2047 = vmatpush.xpose.msrb.mxu1 %v1381_v43  ;;  %v1578_v43 = vld [vmem:[#allocation3 + $0x1088] sm:$0xff] }
 0x4e0   : > { %2162 = vmatpush.xpose.msra.mxu0 %v1507_v39  ;;  %v1487_v39 = vld [vmem:[#allocation3 + $0xdb0] sm:$0xff] }
 0x4e1   : > { %2186 = vmatpush.xpose.msra.mxu2 %v1484_v18  ;;  %v1470_v18 = vld [vmem:[#allocation3 + $0xd28] sm:$0xff] }
 0x4e2   : > { %2068 = vmatpush.xpose.msrb.mxu3 %v1376_v38  ;;  %v1607_v38 = vld [vmem:[#allocation3 + $0x1170] sm:$0xff] }
 0x4e3   : > { %2048 = vmatpush.xpose.msrb.mxu1 %v1375_v47  ;;  %v1572_v47 = vld [vmem:[#allocation3 + $0x1058] sm:$0xff] }
 0x4e4   : > { %2163 = vmatpush.xpose.msra.mxu0 %v1501_v42  ;;  %v1481_v42 = vld [vmem:[#allocation3 + $0xd80] sm:$0xff] }
 0x4e5   : > { %2187 = vmatpush.xpose.msra.mxu2 %v1478_v31  ;;  %v1464_v31 = vld [vmem:[#allocation3 + $0xcf8] sm:$0xff] }
 0x4e6   : > { %2069 = vmatpush.xpose.msrb.mxu3 %v1370_v41  ;;  %v1601_v41 = vld [vmem:[#allocation3 + $0x1140] sm:$0xff] }
 0x4e7   : > { %2049 = vmatpush.xpose.msrb.mxu1 %v1369_v52  ;;  %v1566_v52 = vld [vmem:[#allocation3 + $0x1028] sm:$0xff] }
 0x4e8   : > { %2164 = vmatpush.xpose.msra.mxu0 %v1495_v46  ;;  %v1475_v46 = vld [vmem:[#allocation3 + $0xd50] sm:$0xff] }
 0x4e9   : > { %2188 = vmatpush.xpose.msra.mxu2 %v1472_v48  ;;  %v1458_v48 = vld [vmem:[#allocation3 + $0xcc8] sm:$0xff] }
 0x4ea   : > { %2070 = vmatpush.xpose.msrb.mxu3 %v1364_v45  ;;  %v1595_v45 = vld [vmem:[#allocation3 + $0x1110] sm:$0xff] }
 0x4eb   : > { %2050 = vmatpush.xpose.msrb.mxu1 %v1363_v37  ;;  %v1560_v37 = vld [vmem:[#allocation3 + $0xff8] sm:$0xff] }
 0x4ec   : > { %2165 = vmatpush.xpose.msra.mxu0 %v1489_v50  ;;  %v1469_v50 = vld [vmem:[#allocation3 + $0xd20] sm:$0xff] }
 0x4ed   : > { %2189 = vmatpush.xpose.msra.mxu2 %v1466_v53  ;;  %v1452_v53 = vld [vmem:[#allocation3 + $0xc98] sm:$0xff] }
 0x4ee   : > { %2071 = vmatpush.xpose.msrb.mxu3 %v1358_v49  ;;  %v1589_v49 = vld [vmem:[#allocation3 + $0x10e0] sm:$0xff] }
 0x4ef   : > { %2051 = vmatpush.xpose.msrb.mxu1 %v1357_v60  ;;  %v1554_v60 = vld [vmem:[#allocation3 + $0xfc8] sm:$0xff] }
 0x4f0   : > { %2166 = vmatpush.xpose.msra.mxu0 %v1483_v55  ;;  %v1463_v55 = vld [vmem:[#allocation3 + $0xcf0] sm:$0xff] }
 0x4f1   : > { %2190 = vmatpush.xpose.msra.mxu2 %v1460_v56  ;;  %v1446_v56 = vld [vmem:[#allocation3 + $0xc68] sm:$0xff] }
 0x4f2   : > { %2072 = vmatpush.xpose.msrb.mxu3 %v1352_v54  ;;  %v1583_v54 = vld [vmem:[#allocation3 + $0x10b0] sm:$0xff] }
 0x4f3   : > { %2052 = vmatpush.xpose.msrb.mxu1 %v1351_v0  ;;  %v1434_v0 = vld [vmem:[#allocation3 + $0xc08] sm:$0xff] }
 0x4f4   : > { %2167 = vmatpush.xpose.msra.mxu0 %v1477_v58  ;;  %v1457_v58 = vld [vmem:[#allocation3 + $0xcc0] sm:$0xff] }
 0x4f5   : > { %2191 = vmatpush.xpose.msra.mxu2 %v1454_v30  ;;  %v1440_v30 = vld [vmem:[#allocation3 + $0xc38] sm:$0xff] }
 0x4f6   : > { %2073 = vmatpush.xpose.msrb.mxu3 %v1346_v57  ;;  %v1577_v57 = vld [vmem:[#allocation3 + $0x1080] sm:$0xff] }
 0x4f7   : > { %2053 = vmatpush.xpose.msrb.mxu1 %v1345_v5  ;;  %v1445_v5 = vld [vmem:[#allocation3 + $0xc60] sm:$0xff] }
 0x4f8   : > { %2168 = vmatpush.xpose.msra.mxu0 %v1471_v63  ;;  %v1548_v63 = vld [vmem:[#allocation3 + $0xf98] sm:$0xff] }
 0x4f9   : > { %2192 = vmatpush.xpose.msra.mxu2 %v1448_v1  ;;  %v1528_v1 = vld [vmem:[#allocation3 + $0xef8] sm:$0xff] }
 0x4fa   : > { %2074 = vmatpush.xpose.msrb.mxu3 %v1340_v61  ;;  %v1571_v61 = vld [vmem:[#allocation3 + $0x1050] sm:$0xff] }
 0x4fb   : > { %2054 = vmatpush.xpose.msrb.mxu1 %v1339_v8 }
 0x4fc   : > { %2169 = vmatpush.xpose.msra.mxu0 %v1465_v4  ;;  %v1565_v4 = vld [vmem:[#allocation3 + $0x1020] sm:$0xff] }
 0x4fd   : > { %2075 = vmatmul.f32.vlgmr.msrb.gmra.mxu3 %v2898_v3  ;;  %2193 = vmatpush.xpose.msra.mxu2 %v1442_v6  ;;  %v1896_v6 = vpop.f32.mrf.mxu1 }
 0x4fe   : > { %2139 = vmatpush.xpose.msra.mxu3 %v1524_v62  ;;  %2055 = vmatmul.f32.vlgmr.msrb.gmra.mxu1 %v2901_v13  ;;  %v1451_v62 = vld [vmem:[#allocation3 + $0xc90] sm:$0xff] }
 0x4ff   : > { %2119 = vmatpush.xpose.msra.mxu1 %v1523_v9  ;;  %v1559_v9 = vld [vmem:[#allocation3 + $0xff0] sm:$0xff] }
 0x500   : > { %2170 = vmatpush.xpose.msra.mxu0 %v1459_v51  ;;  %v1522_v51 = vld [vmem:[#allocation3 + $0xec8] sm:$0xff] }
 0x501   : > { %2194 = vmatpush.xpose.msra.mxu2 %v1436_v24  ;;  %v2558_v24 = vld [vmem:[#allocation2 + $0x8] sm:$0xff] }
 0x502   : > { %2140 = vmatpush.xpose.msra.mxu3 %v1518_v59  ;;  %v1629_v59 = vperm.slane %v2882_v29, 2 }
 0x503   : > { %2120 = vmatpush.xpose.msra.mxu1 %v1517_v11  ;;  %v1516_v11 = vld [vmem:[#allocation3 + $0xe98] sm:$0xff] }
 0x504   : > { %2171 = vmatpush.xpose.msra.mxu0 %v1453_v10  ;;  %2195 = vmatmul.f32.vlgmr.msra.gmra.mxu2 %v2898_v3  ;;  %v1897_v8 = vadd.f32 %v1896_v6, %v1629_v59  ;;  %v1916_v10 = vpop.f32.mrf.mxu3  ;;  %v1462_v59 = vld [vmem:[#allocation3 + $0xce8] sm:$0xff] }
 0x505   : > { %2259 = vmatpush.xpose.msrb.mxu2 %v1620_v2  ;;  %v1439_v2 = vld [vmem:[#allocation3 + $0xc30] sm:$0xff]  ;;  %v1570_v6 = vld [vmem:[#allocation3 + $0x1048] sm:$0xff] }
 0x506   : > { %2141 = vmatpush.xpose.msra.mxu3 %v1512_v7  ;;  %v1542_v7 = vld [vmem:[#allocation3 + $0xf68] sm:$0xff] }
 0x507   : > { %2121 = vmatpush.xpose.msra.mxu1 %v1511_v17  ;;  %v1530_v17 = vld [vmem:[#allocation3 + $0xf08] sm:$0xff] }
 0x508   : > { %2172 = vmatpush.xpose.msra.mxu0 %v1447_v15  ;;  %v1433_v15 = vld [vmem:[#allocation3 + $0xc00] sm:$0xff] }
 0x509   : > { %2260 = vmatpush.xpose.msrb.mxu2 %v1614_v12  ;;  %v1917_v12 = vadd.f32 %v1916_v10, %v1897_v8  ;;  %v1467_v8 = vld [vmem:[#allocation3 + $0xd10] sm:$0xff]  ;;  %v1558_v10 = vld [vmem:[#allocation3 + $0xfe8] sm:$0xff] }
 0x50a   : > { %2142 = vmatpush.xpose.msra.mxu3 %v1506_v44  ;;  %v1536_v44 = vld [vmem:[#allocation3 + $0xf38] sm:$0xff] }
 0x50b   : > { %2122 = vmatpush.xpose.msra.mxu1 %v1505_v23  ;;  %v1510_v23 = vld [vmem:[#allocation3 + $0xe68] sm:$0xff] }
 0x50c   : > { %2173 = vmatpush.xpose.msra.mxu0 %v1441_v21  ;;  %v1936_v21 = vpop.f32.mrf.mxu0 }
 0x50d   : > { %2261 = vmatpush.xpose.msrb.mxu2 %v1608_v19  ;;  %v1527_v19 = vld [vmem:[#allocation3 + $0xef0] sm:$0xff] }
 0x50e   : > { %2143 = vmatpush.xpose.msra.mxu3 %v1500_v14  ;;  %v1553_v14 = vld [vmem:[#allocation3 + $0xfc0] sm:$0xff] }
 0x50f   : > { %2123 = vmatpush.xpose.msra.mxu1 %v1499_v16  ;;  %v1618_v16 = vld [vmem:[#allocation3 + $0x11c8] sm:$0xff] }
 0x510   : > { %2174 = vmatpush.xpose.msra.mxu0 %v1435_v27  ;;  %v1521_v27 = vld [vmem:[#allocation3 + $0xec0] sm:$0xff] }
 0x511   : > { %2262 = vmatpush.xpose.msrb.mxu2 %v1602_v25  ;;  %v1547_v25 = vld [vmem:[#allocation3 + $0xf90] sm:$0xff] }
 0x512   : > { %2144 = vmatpush.xpose.msra.mxu3 %v1494_v20  ;;  %v1624_v20 = vld [vmem:[#allocation3 + $0x11f8] sm:$0xff] }
 0x513   : > { %2175 = vmatmul.f32.vlgmr.msra.gmra.mxu0 %v2901_v13  ;;  %2124 = vmatpush.xpose.msra.mxu1 %v1493_v22  ;;  %v1541_v22 = vld [vmem:[#allocation3 + $0xf60] sm:$0xff] }
 0x514   : > { %2239 = vmatpush.xpose.msrb.mxu0 %v1619_v28  ;;  %v2559_v28 = vld [vmem:[#allocation2] sm:$0xff] }
 0x515   : > { %2263 = vmatpush.xpose.msrb.mxu2 %v1596_v32  ;;  %v1956_v32 = vpop.f32.mrf.mxu2 }
 0x516   : > { %2145 = vmatpush.xpose.msra.mxu3 %v1488_v26  ;;  %v1937_v26 = vadd.f32 %v1936_v21, %v1917_v12  ;;  %v1575_v12 = vld [vmem:[#allocation3 + $0x1070] sm:$0xff]  ;;  %v1449_v21 = vld [vmem:[#allocation3 + $0xc80] sm:$0xff] }
 0x517   : > { %2125 = vmatpush.xpose.msra.mxu1 %v1487_v39  ;;  %v1612_v39 = vld [vmem:[#allocation3 + $0x1198] sm:$0xff] }
 0x518   : > { %2240 = vmatpush.xpose.msrb.mxu0 %v1613_v34  ;;  %v1957_v34 = vadd.f32 %v1956_v32, %v1937_v26  ;;  %v2560_v26 = vld [vmem:[#allocation2 + $0x28] sm:$0xff]  ;;  %v1610_v32 = vld [vmem:[#allocation3 + $0x1188] sm:$0xff] }
 0x519   : > { %2264 = vmatpush.xpose.msrb.mxu2 %v1590_v35 }
 0x51a   : > { %2146 = vmatpush.xpose.msra.mxu3 %v1482_v33  ;;  %v1504_v33 = vld [vmem:[#allocation3 + $0xe38] sm:$0xff] }
 0x51b   : > { %2126 = vmatpush.xpose.msra.mxu1 %v1481_v42  ;;  %v1535_v42 = vld [vmem:[#allocation3 + $0xf30] sm:$0xff] }
 0x51c   : > { %2241 = vmatpush.xpose.msrb.mxu0 %v1607_v38 }
 0x51d   : > { %2265 = vmatpush.xpose.msrb.mxu2 %v1584_v40 }
 0x51e   : > { %2147 = vmatpush.xpose.msra.mxu3 %v1476_v36  ;;  %v1515_v36 = vld [vmem:[#allocation3 + $0xe90] sm:$0xff] }
 0x51f   : > { %2127 = vmatpush.xpose.msra.mxu1 %v1475_v46  ;;  %v1529_v46 = vld [vmem:[#allocation3 + $0xf00] sm:$0xff] }
 0x520   : > { %2242 = vmatpush.xpose.msrb.mxu0 %v1601_v41 }
 0x521   : > { %2266 = vmatpush.xpose.msrb.mxu2 %v1578_v43  ;;  %v1509_v43 = vld [vmem:[#allocation3 + $0xe60] sm:$0xff] }
 0x522   : > { %2148 = vmatpush.xpose.msra.mxu3 %v1470_v18  ;;  %v1498_v18 = vld [vmem:[#allocation3 + $0xe08] sm:$0xff] }
 0x523   : > { %2128 = vmatpush.xpose.msra.mxu1 %v1469_v50  ;;  %v1486_v50 = vld [vmem:[#allocation3 + $0xda8] sm:$0xff] }
 0x524   : > { %2243 = vmatpush.xpose.msrb.mxu0 %v1595_v45  ;;  %v1492_v45 = vld [vmem:[#allocation3 + $0xdd8] sm:$0xff] }
 0x525   : > { %2267 = vmatpush.xpose.msrb.mxu2 %v1572_v47  ;;  %v1623_v47 = vld [vmem:[#allocation3 + $0x11f0] sm:$0xff] }
 0x526   : > { %2149 = vmatpush.xpose.msra.mxu3 %v1464_v31  ;;  %v1606_v31 = vld [vmem:[#allocation3 + $0x1168] sm:$0xff] }
 0x527   : > { %2129 = vmatpush.xpose.msra.mxu1 %v1463_v55  ;;  %v1480_v55 = vld [vmem:[#allocation3 + $0xd78] sm:$0xff] }
 0x528   : > { %2244 = vmatpush.xpose.msrb.mxu0 %v1589_v49  ;;  %v1600_v49 = vld [vmem:[#allocation3 + $0x1138] sm:$0xff] }
 0x529   : > { %2268 = vmatpush.xpose.msrb.mxu2 %v1566_v52  ;;  %v1617_v52 = vld [vmem:[#allocation3 + $0x11c0] sm:$0xff] }
 0x52a   : > { %2150 = vmatpush.xpose.msra.mxu3 %v1458_v48  ;;  %v1503_v48 = vld [vmem:[#allocation3 + $0xe30] sm:$0xff] }
 0x52b   : > { %2130 = vmatpush.xpose.msra.mxu1 %v1457_v58  ;;  %v1474_v58 = vld [vmem:[#allocation3 + $0xd48] sm:$0xff] }
 0x52c   : > { %2245 = vmatpush.xpose.msrb.mxu0 %v1583_v54  ;;  %v1594_v54 = vld [vmem:[#allocation3 + $0x1108] sm:$0xff] }
 0x52d   : > { %2269 = vmatpush.xpose.msrb.mxu2 %v1560_v37  ;;  %v1611_v37 = vld [vmem:[#allocation3 + $0x1190] sm:$0xff] }
 0x52e   : > { %2151 = vmatpush.xpose.msra.mxu3 %v1452_v53  ;;  %v1497_v53 = vld [vmem:[#allocation3 + $0xe00] sm:$0xff] }
 0x52f   : > { %2131 = vmatpush.xpose.msra.mxu1 %v1451_v62  ;;  %v1468_v62 = vld [vmem:[#allocation3 + $0xd18] sm:$0xff] }
 0x530   : > { %2246 = vmatpush.xpose.msrb.mxu0 %v1577_v57  ;;  %v1588_v57 = vld [vmem:[#allocation3 + $0x10d8] sm:$0xff] }
 0x531   : > { %2270 = vmatpush.xpose.msrb.mxu2 %v1554_v60  ;;  %v1605_v60 = vld [vmem:[#allocation3 + $0x1160] sm:$0xff] }
 0x532   : > { %2152 = vmatpush.xpose.msra.mxu3 %v1446_v56  ;;  %v1491_v56 = vld [vmem:[#allocation3 + $0xdd0] sm:$0xff] }
 0x533   : > { %2132 = vmatpush.xpose.msra.mxu1 %v1445_v5  ;;  %v1473_v5 = vld [vmem:[#allocation3 + $0xd40] sm:$0xff] }
 0x534   : > { %2247 = vmatpush.xpose.msrb.mxu0 %v1571_v61  ;;  %v1582_v61 = vld [vmem:[#allocation3 + $0x10a8] sm:$0xff] }
 0x535   : > { %2271 = vmatpush.xpose.msrb.mxu2 %v1548_v63  ;;  %v1599_v63 = vld [vmem:[#allocation3 + $0x1130] sm:$0xff] }
 0x536   : > { %2153 = vmatpush.xpose.msra.mxu3 %v1440_v30  ;;  %v1485_v30 = vld [vmem:[#allocation3 + $0xda0] sm:$0xff] }
 0x537   : > { %2133 = vmatpush.xpose.msra.mxu1 %v1439_v2  ;;  %v1581_v2 = vld [vmem:[#allocation3 + $0x10a0] sm:$0xff] }
 0x538   : > { %2248 = vmatpush.xpose.msrb.mxu0 %v1565_v4  ;;  %v1593_v4 = vld [vmem:[#allocation3 + $0x1100] sm:$0xff] }
 0x539   : > { %2272 = vmatpush.xpose.msrb.mxu2 %v1542_v7  ;;  %v1456_v7 = vld [vmem:[#allocation3 + $0xcb8] sm:$0xff] }
 0x53a   : > { %2154 = vmatpush.xpose.msra.mxu3 %v1434_v0  ;;  %v1479_v0 = vld [vmem:[#allocation3 + $0xd70] sm:$0xff] }
 0x53b   : > { %2134 = vmatpush.xpose.msra.mxu1 %v1433_v15  ;;  %v1976_v35 = vpop.f32.mrf.mxu1  ;;  %v1552_v15 = vld [vmem:[#allocation3 + $0xfb8] sm:$0xff] }
 0x53c   : > { %2249 = vmatpush.xpose.msrb.mxu0 %v1559_v9  ;;  %v1977_v38 = vadd.f32 %v1976_v35, %v1957_v34  ;;  %v1450_v9 = vld [vmem:[#allocation3 + $0xc88] sm:$0xff]  ;;  %v1557_v34 = vld [vmem:[#allocation3 + $0xfe0] sm:$0xff]  ;;  %v2016_v35 = vpop.f32.mrf.mxu0 }
 0x53d   : > { %2155 = vmatmul.f32.vlgmr.msra.gmra.mxu3 %v2558_v24  ;;  %2273 = vmatpush.xpose.msrb.mxu2 %v1536_v44  ;;  %v1461_v44 = vld [vmem:[#allocation3 + $0xce0] sm:$0xff] }
 0x53e   : > { %2219 = vmatpush.xpose.msrb.mxu3 %v1528_v1  ;;  %2135 = vmatmul.f32.vlgmr.msra.gmra.mxu1 %v2559_v28  ;;  %v1576_v1 = vld [vmem:[#allocation3 + $0x1078] sm:$0xff] }
 0x53f   : > { %2199 = vmatpush.xpose.msrb.mxu1 %v1527_v19  ;;  %v1622_v19 = vld [vmem:[#allocation3 + $0x11e8] sm:$0xff] }
 0x540   : > { %2250 = vmatpush.xpose.msrb.mxu0 %v1553_v14  ;;  %v1996_v40 = vpop.f32.mrf.mxu3  ;;  %v1455_v14 = vld [vmem:[#allocation3 + $0xcb0] sm:$0xff] }
 0x541   : > { %2274 = vmatpush.xpose.msrb.mxu2 %v1530_v17  ;;  %v1997_v41 = vadd.f32 %v1996_v40, %v1977_v38  ;;  %v1438_v17 = vld [vmem:[#allocation3 + $0xc28] sm:$0xff]  ;;  %v1621_v38 = vld [vmem:[#allocation3 + $0x11e0] sm:$0xff] }
 0x542   : > { %2220 = vmatpush.xpose.msrb.mxu3 %v1522_v51  ;;  %v1587_v51 = vld [vmem:[#allocation3 + $0x10d0] sm:$0xff] }
 0x543   : > { %2200 = vmatpush.xpose.msrb.mxu1 %v1521_v27  ;;  %2361 = vst [vmem:[%s2893_s4 + $0x10] sm:$0xff] %v1997_v41  ;;  %v1563_v27 = vld [vmem:[#allocation3 + $0x1010] sm:$0xff] }
 0x544   : > { %2251 = vmatpush.xpose.msrb.mxu0 %v1547_v25  ;;  %2275 = vmatmul.f32.vlgmr.msrb.gmra.mxu2 %v2558_v24  ;;  %v1564_v24 = vld [vmem:[#allocation3 + $0x1018] sm:$0xff]  ;;  %v1615_v41 = vld [vmem:[#allocation3 + $0x11b0] sm:$0xff] }
 0x545   : > { %2339 = vmatpush.xpose.msra.mxu2 %v1624_v20  ;;  %v1569_v20 = vld [vmem:[#allocation3 + $0x1040] sm:$0xff]  ;;  %v1616_v25 = vld [vmem:[#allocation3 + $0x11b8] sm:$0xff] }
 0x546   : > { %2221 = vmatpush.xpose.msrb.mxu3 %v1516_v11  ;;  %v1444_v11 = vld [vmem:[#allocation3 + $0xc58] sm:$0xff] }
 0x547   : > { %2201 = vmatpush.xpose.msrb.mxu1 %v1515_v36  ;;  %v1534_v36 = vld [vmem:[#allocation3 + $0xf28] sm:$0xff] }
 0x548   : > { %2252 = vmatpush.xpose.msrb.mxu0 %v1541_v22  ;;  %v1437_v22 = vld [vmem:[#allocation3 + $0xc20] sm:$0xff] }
 0x549   : > { %2340 = vmatpush.xpose.msra.mxu2 %v1618_v16  ;;  %v1540_v16 = vld [vmem:[#allocation3 + $0xf58] sm:$0xff] }
 0x54a   : > { %2222 = vmatpush.xpose.msrb.mxu3 %v1510_v23  ;;  %v1546_v23 = vld [vmem:[#allocation3 + $0xf88] sm:$0xff] }
 0x54b   : > { %2202 = vmatpush.xpose.msrb.mxu1 %v1509_v43  ;;  %v2036_v43 = vpop.f32.mrf.mxu2 }
 0x54c   : > { %2253 = vmatpush.xpose.msrb.mxu0 %v1535_v42  ;;  %v2561_v42 = vld [vmem:[#allocation2 + $0x20] sm:$0xff] }
 0x54d   : > { %2341 = vmatpush.xpose.msra.mxu2 %v1612_v39  ;;  %v1604_v39 = vld [vmem:[#allocation3 + $0x1158] sm:$0xff] }
 0x54e   : > { %2223 = vmatpush.xpose.msrb.mxu3 %v1504_v33  ;;  %v1630_v33 = vperm.slane %v2882_v29, 3  ;;  %v1598_v29 = vld [vmem:[#allocation3 + $0x1128] sm:$0xff] }
 0x54f   : > { %2203 = vmatpush.xpose.msrb.mxu1 %v1503_v48 }
 0x550   : > { %2254 = vmatpush.xpose.msrb.mxu0 %v1529_v46  ;;  %v2017_v40 = vadd.f32 %v2016_v35, %v1630_v33 }
 0x551   : > { %2342 = vmatpush.xpose.msra.mxu2 %v1606_v31 }
 0x552   : > { %2224 = vmatpush.xpose.msrb.mxu3 %v1498_v18  ;;  %v1551_v18 = vld [vmem:[#allocation3 + $0xfb0] sm:$0xff]  ;;  %v2037_v31 = vadd.f32 %v2036_v43, %v2017_v40 }
 0x553   : > { %2255 = vmatmul.f32.vlgmr.msrb.gmra.mxu0 %v2559_v28  ;;  %2204 = vmatpush.xpose.msrb.mxu1 %v1497_v53  ;;  %v1443_v28 = vld [vmem:[#allocation3 + $0xc50] sm:$0xff] }
 0x554   : > { %2319 = vmatpush.xpose.msra.mxu0 %v1623_v47  ;;  %v1609_v47 = vld [vmem:[#allocation3 + $0x1180] sm:$0xff]  ;;  %v1539_v53 = vld [vmem:[#allocation3 + $0xf50] sm:$0xff] }
 0x555   : > { %2343 = vmatpush.xpose.msra.mxu2 %v1600_v49 }
 0x556   : > { %2225 = vmatpush.xpose.msrb.mxu3 %v1492_v45  ;;  %v1545_v45 = vld [vmem:[#allocation3 + $0xf80] sm:$0xff] }
 0x557   : > { %2205 = vmatpush.xpose.msrb.mxu1 %v1491_v56  ;;  %v2116_v56 = vpop.f32.mrf.mxu2 }
 0x558   : > { %2320 = vmatpush.xpose.msra.mxu0 %v1617_v52 }
 0x559   : > { %2344 = vmatpush.xpose.msra.mxu2 %v1594_v54  ;;  %v2096_v54 = vpop.f32.mrf.mxu0 }
 0x55a   : > { %2226 = vmatpush.xpose.msrb.mxu3 %v1486_v50  ;;  %v1592_v50 = vld [vmem:[#allocation3 + $0x10f8] sm:$0xff] }
 0x55b   : > { %2206 = vmatpush.xpose.msrb.mxu1 %v1485_v30  ;;  %v1597_v30 = vld [vmem:[#allocation3 + $0x1120] sm:$0xff] }
 0x55c   : > { %2321 = vmatpush.xpose.msra.mxu0 %v1611_v37 }
 0x55d   : > { %2345 = vmatpush.xpose.msra.mxu2 %v1588_v57  ;;  %v1586_v57 = vld [vmem:[#allocation3 + $0x10c8] sm:$0xff] }
 0x55e   : > { %2227 = vmatpush.xpose.msrb.mxu3 %v1480_v55  ;;  %v1603_v55 = vld [vmem:[#allocation3 + $0x1150] sm:$0xff] }
 0x55f   : > { %2207 = vmatpush.xpose.msrb.mxu1 %v1479_v0  ;;  %v1585_v0 = vld [vmem:[#allocation3 + $0x10c0] sm:$0xff] }
 0x560   : > { %2322 = vmatpush.xpose.msra.mxu0 %v1605_v60  ;;  %v1533_v60 = vld [vmem:[#allocation3 + $0xf20] sm:$0xff] }
 0x561   : > { %2346 = vmatpush.xpose.msra.mxu2 %v1582_v61  ;;  %v1580_v61 = vld [vmem:[#allocation3 + $0x1098] sm:$0xff] }
 0x562   : > { %2228 = vmatpush.xpose.msrb.mxu3 %v1474_v58 }
 0x563   : > { %2208 = vmatpush.xpose.msrb.mxu1 %v1473_v5  ;;  %v1573_v5 = vld [vmem:[#allocation3 + $0x1060] sm:$0xff] }
 0x564   : > { %2323 = vmatpush.xpose.msra.mxu0 %v1599_v63  ;;  %v1574_v63 = vld [vmem:[#allocation3 + $0x1068] sm:$0xff] }
 0x565   : > { %2347 = vmatpush.xpose.msra.mxu2 %v1576_v1  ;;  %v1568_v1 = vld [vmem:[#allocation3 + $0x1038] sm:$0xff] }
 0x566   : > { %2229 = vmatpush.xpose.msrb.mxu3 %v1468_v62  ;;  %v1591_v62 = vld [vmem:[#allocation3 + $0x10f0] sm:$0xff] }
 0x567   : > { %2209 = vmatpush.xpose.msrb.mxu1 %v1467_v8  ;;  %v1561_v8 = vld [vmem:[#allocation3 + $0x1000] sm:$0xff] }
 0x568   : > { %2324 = vmatpush.xpose.msra.mxu0 %v1593_v4  ;;  %v1562_v4 = vld [vmem:[#allocation3 + $0x1008] sm:$0xff] }
 0x569   : > { %2348 = vmatpush.xpose.msra.mxu2 %v1570_v6  ;;  %v1556_v6 = vld [vmem:[#allocation3 + $0xfd8] sm:$0xff] }
 0x56a   : > { %2230 = vmatpush.xpose.msrb.mxu3 %v1462_v59  ;;  %v1579_v59 = vld [vmem:[#allocation3 + $0x1090] sm:$0xff] }
 0x56b   : > { %2210 = vmatpush.xpose.msrb.mxu1 %v1461_v44  ;;  %v1549_v44 = vld [vmem:[#allocation3 + $0xfa0] sm:$0xff] }
 0x56c   : > { %2325 = vmatpush.xpose.msra.mxu0 %v1587_v51  ;;  %v1550_v51 = vld [vmem:[#allocation3 + $0xfa8] sm:$0xff] }
 0x56d   : > { %2349 = vmatpush.xpose.msra.mxu2 %v1564_v24  ;;  %v1544_v24 = vld [vmem:[#allocation3 + $0xf78] sm:$0xff] }
 0x56e   : > { %2231 = vmatpush.xpose.msrb.mxu3 %v1456_v7  ;;  %v1567_v7 = vld [vmem:[#allocation3 + $0x1030] sm:$0xff] }
 0x56f   : > { %2211 = vmatpush.xpose.msrb.mxu1 %v1455_v14  ;;  %v1531_v14 = vld [vmem:[#allocation3 + $0xf10] sm:$0xff] }
 0x570   : > { %2326 = vmatpush.xpose.msra.mxu0 %v1581_v2  ;;  %v1538_v2 = vld [vmem:[#allocation3 + $0xf48] sm:$0xff] }
 0x571   : > { %2350 = vmatpush.xpose.msra.mxu2 %v1558_v10  ;;  %v1532_v10 = vld [vmem:[#allocation3 + $0xf18] sm:$0xff] }
 0x572   : > { %2232 = vmatpush.xpose.msrb.mxu3 %v1450_v9  ;;  %v1555_v9 = vld [vmem:[#allocation3 + $0xfd0] sm:$0xff] }
 0x573   : > { %2212 = vmatpush.xpose.msrb.mxu1 %v1449_v21 }
 0x574   : > { %2327 = vmatpush.xpose.msra.mxu0 %v1575_v12  ;;  %v1537_v12 = vld [vmem:[#allocation3 + $0xf40] sm:$0xff] }
 0x575   : > { %2351 = vmatpush.xpose.msra.mxu2 %v1552_v15  ;;  %v2562_v15 = vld [vmem:[%s2922_s2] sm:$0x3f] }
 0x576   : > { %2233 = vmatpush.xpose.msrb.mxu3 %v1444_v11  ;;  %v1543_v11 = vld [vmem:[#allocation3 + $0xf70] sm:$0xff] }
 0x577   : > { %2213 = vmatpush.xpose.msrb.mxu1 %v1443_v28 }
 0x578   : > { %2328 = vmatpush.xpose.msra.mxu0 %v1569_v20 }
 0x579   : > { %2352 = vmatpush.xpose.msra.mxu2 %v1546_v23 }
 0x57a   : > { %2234 = vmatpush.xpose.msrb.mxu3 %v1438_v17  ;;  %v1631_v17 = vperm.slane %v2562_v15, 4 }
 0x57b   : > { %2214 = vmatpush.xpose.msrb.mxu1 %v1437_v22  ;;  %v2056_v46 = vpop.f32.mrf.mxu1 }
 0x57c   : > { %2329 = vmatpush.xpose.msra.mxu0 %v1563_v27  ;;  %v2057_v48 = vadd.f32 %v2056_v46, %v2037_v31 }
 0x57d   : > { %2235 = vmatmul.f32.vlgmr.msrb.gmra.mxu3 %v2560_v26  ;;  %2353 = vmatpush.xpose.msra.mxu2 %v1540_v16 }
 0x57e   : > { %2299 = vmatpush.xpose.msra.mxu3 %v1622_v19  ;;  %2215 = vmatmul.f32.vlgmr.msrb.gmra.mxu1 %v2561_v42 }
 0x57f   : > { %2279 = vmatpush.xpose.msra.mxu1 %v1621_v38 }
 0x580   : > { %2330 = vmatpush.xpose.msra.mxu0 %v1557_v34  ;;  %v2076_v49 = vpop.f32.mrf.mxu3 }
 0x581   : > { %2354 = vmatpush.xpose.msra.mxu2 %v1534_v36  ;;  %v2077_v52 = vadd.f32 %v2076_v49, %v2057_v48 }
 0x582   : > { %2300 = vmatpush.xpose.msra.mxu3 %v1616_v25 }
 0x583   : > { %2280 = vmatpush.xpose.msra.mxu1 %v1615_v41  ;;  %v2097_v37 = vadd.f32 %v2096_v54, %v2077_v52 }
 0x584   : > { %2331 = vmatpush.xpose.msra.mxu0 %v1551_v18  ;;  %2355 = vmatmul.f32.vlgmr.msra.gmra.mxu2 %v2560_v26 }
 0x585   : > { %v2117_v58 = vadd.f32 %v2116_v56, %v2097_v37 }
 0x586   : > { %2301 = vmatpush.xpose.msra.mxu3 %v1610_v32 }
 0x587   : > { %2281 = vmatpush.xpose.msra.mxu1 %v1609_v47  ;;  %2362 = vst [vmem:[%s2893_s4 + $0x18] sm:$0xff] %v2117_v58  ;;  %v2196_v27 = vpop.f32.mrf.mxu2 }
 0x588   : > { %2332 = vmatpush.xpose.msra.mxu0 %v1545_v45 }
 0x58a   : > { %2302 = vmatpush.xpose.msra.mxu3 %v1604_v39 }
 0x58b   : > { %2282 = vmatpush.xpose.msra.mxu1 %v1603_v55 }
 0x58c   : > { %2333 = vmatpush.xpose.msra.mxu0 %v1539_v53 }
 0x58e   : > { %2303 = vmatpush.xpose.msra.mxu3 %v1598_v29 }
 0x58f   : > { %2283 = vmatpush.xpose.msra.mxu1 %v1597_v30 }
 0x590   : > { %2334 = vmatpush.xpose.msra.mxu0 %v1533_v60  ;;  %v2176_v25 = vpop.f32.mrf.mxu0 }
 0x592   : > { %2304 = vmatpush.xpose.msra.mxu3 %v1592_v50 }
 0x593   : > { %2335 = vmatmul.f32.vlgmr.msra.gmra.mxu0 %v2561_v42  ;;  %2284 = vmatpush.xpose.msra.mxu1 %v1591_v62 }
 0x596   : > { %2305 = vmatpush.xpose.msra.mxu3 %v1586_v57 }
 0x597   : > { %2285 = vmatpush.xpose.msra.mxu1 %v1585_v0 }
 0x59a   : > { %2306 = vmatpush.xpose.msra.mxu3 %v1580_v61 }
 0x59b   : > { %2286 = vmatpush.xpose.msra.mxu1 %v1579_v59 }
 0x59e   : > { %2307 = vmatpush.xpose.msra.mxu3 %v1574_v63 }
 0x59f   : > { %2287 = vmatpush.xpose.msra.mxu1 %v1573_v5 }
 0x5a2   : > { %2308 = vmatpush.xpose.msra.mxu3 %v1568_v1 }
 0x5a3   : > { %2288 = vmatpush.xpose.msra.mxu1 %v1567_v7 }
 0x5a6   : > { %2309 = vmatpush.xpose.msra.mxu3 %v1562_v4 }
 0x5a7   : > { %2289 = vmatpush.xpose.msra.mxu1 %v1561_v8 }
 0x5aa   : > { %2310 = vmatpush.xpose.msra.mxu3 %v1556_v6 }
 0x5ab   : > { %2290 = vmatpush.xpose.msra.mxu1 %v1555_v9 }
 0x5ae   : > { %2311 = vmatpush.xpose.msra.mxu3 %v1550_v51 }
 0x5af   : > { %2291 = vmatpush.xpose.msra.mxu1 %v1549_v44 }
 0x5b2   : > { %2312 = vmatpush.xpose.msra.mxu3 %v1544_v24 }
 0x5b3   : > { %2292 = vmatpush.xpose.msra.mxu1 %v1543_v11 }
 0x5b6   : > { %2313 = vmatpush.xpose.msra.mxu3 %v1538_v2 }
 0x5b7   : > { %2293 = vmatpush.xpose.msra.mxu1 %v1537_v12 }
 0x5ba   : > { %2314 = vmatpush.xpose.msra.mxu3 %v1532_v10 }
 0x5bb   : > { %2294 = vmatpush.xpose.msra.mxu1 %v1531_v14  ;;  %v2136_v19 = vpop.f32.mrf.mxu1 }
 0x5bc   : > { %v2137_v20 = vadd.f32 %v2136_v19, %v1631_v17 }
 0x5bd   : > { %2315 = vmatmul.f32.vlgmr.msra.gmra.mxu3 %v2898_v3 }
 0x5be   : > { %2295 = vmatmul.f32.vlgmr.msra.gmra.mxu1 %v2901_v13  ;;  %v1632_v13 = vperm.slane %v2562_v15, 5 }
 0x5c0   : > { %v2156_v21 = vpop.f32.mrf.mxu3 }
 0x5c1   : > { %v2157_v23 = vadd.f32 %v2156_v21, %v2137_v20 }
 0x5c3   : > { %v2177_v26 = vadd.f32 %v2176_v25, %v2157_v23 }
 0x5c5   : > { %v2197_v3 = vadd.f32 %v2196_v27, %v2177_v26 }
 0x5c7   : > { %v2276_v35 = vpop.f32.mrf.mxu2 }
 0x5d0   : > { %v2256_v34 = vpop.f32.mrf.mxu0 }
 0x5d1   : > { %v2257_v22 = vadd.f32 %v2256_v34, %v1632_v13 }
 0x5d3   : > { %v2277_v36 = vadd.f32 %v2276_v35, %v2257_v22 }
 0x5fb   : > { %v2216_v28 = vpop.f32.mrf.mxu1 }
 0x5fc   : > { %v2217_v16 = vadd.f32 %v2216_v28, %v2197_v3 }
 0x600   : > { %v2236_v32 = vpop.f32.mrf.mxu3 }
 0x601   : > { %v2237_v33 = vadd.f32 %v2236_v32, %v2217_v16 }
 0x603   : > { %2363 = vst [vmem:[%s2893_s4 + $0x20] sm:$0xff] %v2237_v33 }
 0x607   : > { %v2356_v43 = vpop.f32.mrf.mxu2 }
 0x610   : > { %v2336_v41 = vpop.f32.mrf.mxu0 }
 0x63b   : > { %v2296_v38 = vpop.f32.mrf.mxu1 }
 0x63c   : > { %v2297_v39 = vadd.f32 %v2296_v38, %v2277_v36 }
 0x640   : > { %v2316_v40 = vpop.f32.mrf.mxu3 }
 0x641   : > { %v2317_v18 = vadd.f32 %v2316_v40, %v2297_v39 }
 0x643   : > { %v2337_v42 = vadd.f32 %v2336_v41, %v2317_v18 }
 0x645   : > { %v2357_v29 = vadd.f32 %v2356_v43, %v2337_v42 }
 0x647   : > { %2364 = vst [vmem:[%s2893_s4 + $0x28] sm:$0xff] %v2357_v29 }
 0x648 PF: > { %s14_s12 = sadd.s32 1, %s2603_s12  }
 0x649   : > { %p11_p7 = scmp.ge.s32.totalorder %s14_s12, 4  }
 0x64b   :  { %13 = sbr.rel (!%p11_p7) target bundleno = 1 (0x1), region = 67 }
 0x650   :  { %2386 = vsyncpa [#allocation4], 1 }
 0x651   :  { %2388 = vsyncpa [#allocation4 + $0x1], 1 }

// kernel: multi_head_self_attention.2
= control target key start
LH: loop header
LB: loop body
LE: loop exit
PB: predicated region body
PF: predicated region fallthrough
CT: control target
= control target key end

     0   :  { %8 = vsyncpa [#allocation3], 0  ;;  %s2876_s0 = inlined_call_operand.vmem [shape: f32[16,768], index: 0, kind: input, shape index: {}]   ;;  %s2877_s1 = inlined_call_operand.hbm [shape: f32[2304,768], index: 1, kind: input, shape index: {}]   ;;  %s2878_s2 = inlined_call_operand.vmem [shape: f32[1,2304], index: 2, kind: input, shape index: {}]   ;;  %s2879_s3 = inlined_call_operand.vmem [shape: f32[16,2304], index: 3, kind: output, shape index: {}]  }
   0x1   :  { %10 = vsyncpa [#allocation3 + $0x1], 0  ;;  %s1927_s12 = smov 0   ;;  %s1929_s13 = smov 0  }
   0x2   :  { %s1931_s14 = smov 0   ;;  %s1933_s15 = smov 0  }
   0x3 LB: > { %s1946_s16 = sadd.s32 4294967295, %s1903_s15   ;;  %s1949_s17 = sadd.s32 1, %s1903_s15   ;;  %s1903_s15 = sphi %s1933_s15, %s2886_s15   ;;  %s1899_s14 = sphi %s1931_s14, %s2885_s14   ;;  %s1895_s13 = sphi %s1929_s13, %s2884_s13   ;;  %s1891_s12 = sphi %s1927_s12, %s2883_s12  }
   0x4   : > { %s41_s18 = ssub.s32 %s1903_s15, %s1949_s17  ;;  %s44_s19 = sadd.s32 1, %s1899_s14 }
   0x5   : > { %p42_p0 = scmp.eq.s32.totalorder %s41_s18, 0  ;;  %p51_p1 = scmp.ne.s32.totalorder %s1899_s14, %s1895_s13 }
   0x6   : > { %p52_p2 = scmp.eq.s32.totalorder %s1903_s15, 0  ;;  %p57_p3 = scmp.ne.s32.totalorder %s1895_s13, %s1891_s12 }
   0x7   : > { %s1959_s20 = scalar_select %p42_p0, %s1899_s14, %s44_s19  }
   0x8   : > { %p53_p4 = por %p52_p2, %p51_p1  ;;  %p58_p5 = scmp.eq.s32.totalorder %s1946_s16, 0 }
   0x9   : > { %p107_p6 = scmp.eq.s32.totalorder %s1946_s16, 2  ;;  %p1790_p8 = scmp.lt.s32.totalorder %s1903_s15, 3 }
   0xa   : > { %p1963_p7 = por %p58_p5, %p57_p3  ;;  %s136_s23 = sand.u32 1, %s1899_s14  }
   0xb   : > { %p1968_p9 = por %p107_p6, %p51_p1  ;;  %s1780_s24 = smul.u32 4608, %s136_s23 }
   0xc   : > { %p1973_p10 = pnand %p1790_p8, %p53_p4  ;;  %s1791_s26 = smul.u32 4608, %s1903_s15 }
   0xd   : > { %s140_s27 = scalar_lea.vmem [#allocation2], %s1780_s24  ;;  %s137_s6 = scalar_lea.sflag [#allocation3], %s136_s23 }
   0xe   : > { %s149_s28 = sshll.u32 %s140_s27, 4  ;;  %s146_s4 = scalar_lea.hbm %s2877_s1, %s1791_s26  ;;  %s150_s28 = int_to_ptr.vmem [resolvable:$true] %s149_s28 }
   0xf   : > { %s147_s5 = sshll.u32 %s146_s4, 4  ;;  %p1843_p12 = pneg %p1973_p10  ;;  %s148_s5 = int_to_ptr.hbm [resolvable:$true] %s147_s5 }
  0x10   : > { %s1839_s7 = sshra.s32 %s148_s5, 4  ;;  %s1846_s11 = scalar_lea.hbm %s2877_s1, 13824  ;;  %s1840_s7 = int_to_ptr.hbm [resolvable:$true] %s1839_s7 }
  0x11   : > { %s1841_s8 = scalar_lea.hbm %s1840_s7, 4608  ;;  %p1847_p1 = scmp.lt.s32.totalorder %s1840_s7, %s2877_s1 }
  0x12   : > { %p1842_p11 = scmp.ne.s32.totalorder %s1840_s7, %s1841_s8  ;;  %p1848_p2 = scmp.lt.s32.totalorder %s1846_s11, %s1841_s8 }
  0x14   : > { %p1844_p13 = pnand %p1843_p12, %p1842_p11  ;;  %p1849_p3 = por %p1848_p2, %p1847_p1 }
  0x16   : > { %p1845_p0 = pneg %p1844_p13 }
  0x18   : > { %p1850_p4 = pnand %p1849_p3, %p1845_p0 }
  0x1a   : > { %1853 = shalt.err (!%p1850_p4)
}
  0x1b   : > { %s1905_s19 = smov 768   ;;  %s1906_s23 = smov 48  }
  0x1c   : > { %1789 = dma.hbm_to_vmem [thread:$0]  (!%p1973_p10), %s148_s5, 73728, %s150_s28, %s137_s6, %s1905_s19, %s1905_s19, %s1906_s23  }
  0x1d   : > { %p1775_p5 = scmp.ge.s32.totalorder %s1903_s15, 1  ;;  %p165_p6 = scmp.lt.s32.totalorder %s1903_s15, 4 }
  0x1f   : > { %p166_p8 = pnand %p1775_p5, %p165_p6 }
  0x20   : > { %s1994_s24 = sand.u32 (!%p166_p8), 1, %s1895_s13  }
  0x21   : > { %169 = sbr.rel (%p166_p8) target bundleno = 768 (0x300), region = 32  ;;  %s172_s27 = scalar_lea.sflag (!%p166_p8), [#allocation3], %s1994_s24 }
  0x22   : > { %s1782_s26 = smul.u32 (!%p166_p8), 4608, %s1994_s24 }
  0x24   : > { %s1998_s29 = scalar_lea.vmem (!%p166_p8), [#allocation2], %s1782_s26 }
  0x26   : > { %1886 = dma.done.wait (%p1963_p7), %s172_s27, 73728  }
  0x27   : > { %1888 = vsyncadd (%p1963_p7), %s172_s27, 4294893568  ;;  %v311_v0 = vld [vmem:[%s1998_s29 + $0x2d0] sm:$0xff]  ;;  %v313_v1 = vld [vmem:[%s1998_s29 + $0x2e0] sm:$0xff]  ;;  %s203_s4 = smul.u32 6, %s1946_s16 }
  0x28   : > { %v312_v2 = vld [vmem:[%s1998_s29 + $0x2d8] sm:$0xff]  ;;  %811 = vmatpush.xpose.msra.mxu0 %v311_v0  ;;  %857 = vmatpush.xpose.msra.mxu2 %v313_v1  ;;  %v314_v3 = vld [vmem:[%s1998_s29 + $0x2e8] sm:$0xff]  ;;  %v305_v4 = vld [vmem:[%s1998_s29 + $0x2a0] sm:$0xff]  ;;  %s1783_s8 = smul.u32 96, %s1994_s24 }
  0x29   : > { %834 = vmatpush.xpose.msra.mxu1 %v312_v2  ;;  %880 = vmatpush.xpose.msra.mxu3 %v314_v3  ;;  %v307_v5 = vld [vmem:[%s1998_s29 + $0x2b0] sm:$0xff]  ;;  %v306_v6 = vld [vmem:[%s1998_s29 + $0x2a8] sm:$0xff]  ;;  %v308_v7 = vld [vmem:[%s1998_s29 + $0x2b8] sm:$0xff]  ;;  %p204_p7 = scmp.lt.s32.totalorder %s203_s4, 17 }
  0x2a   : > { %v299_v8 = vld [vmem:[%s1998_s29 + $0x270] sm:$0xff]  ;;  %v301_v9 = vld [vmem:[%s1998_s29 + $0x280] sm:$0xff]  ;;  %v300_v10 = vld [vmem:[%s1998_s29 + $0x278] sm:$0xff]  ;;  %s2381_s24 = scalar_lea.vmem [#allocation4], %s1783_s8 }
  0x2b   : > { %v302_v11 = vld [vmem:[%s1998_s29 + $0x288] sm:$0xff]  ;;  %v293_v12 = vld [vmem:[%s1998_s29 + $0x240] sm:$0xff]  ;;  %v295_v13 = vld [vmem:[%s1998_s29 + $0x250] sm:$0xff]  ;;  %s2888_s4 = smov (!%p204_p7, %s203_s4), 17 }
  0x2c   : > { %812 = vmatpush.xpose.msra.mxu0 %v305_v4  ;;  %858 = vmatpush.xpose.msra.mxu2 %v307_v5  ;;  %v294_v14 = vld [vmem:[%s1998_s29 + $0x248] sm:$0xff]  ;;  %v296_v15 = vld [vmem:[%s1998_s29 + $0x258] sm:$0xff]  ;;  %v287_v16 = vld [vmem:[%s1998_s29 + $0x210] sm:$0xff]  ;;  %s2330_s7 = scalar_lea.vmem %s2878_s2, %s2888_s4 }
  0x2d   : > { %835 = vmatpush.xpose.msra.mxu1 %v306_v6  ;;  %881 = vmatpush.xpose.msra.mxu3 %v308_v7  ;;  %v289_v17 = vld [vmem:[%s1998_s29 + $0x220] sm:$0xff]  ;;  %v288_v18 = vld [vmem:[%s1998_s29 + $0x218] sm:$0xff]  ;;  %v290_v19 = vld [vmem:[%s1998_s29 + $0x228] sm:$0xff] }
  0x2e   : > { %v281_v20 = vld [vmem:[%s1998_s29 + $0x1e0] sm:$0xff]  ;;  %v283_v21 = vld [vmem:[%s1998_s29 + $0x1f0] sm:$0xff]  ;;  %v282_v22 = vld [vmem:[%s1998_s29 + $0x1e8] sm:$0xff] }
  0x2f   : > { %v284_v23 = vld [vmem:[%s1998_s29 + $0x1f8] sm:$0xff]  ;;  %v275_v24 = vld [vmem:[%s1998_s29 + $0x1b0] sm:$0xff]  ;;  %v277_v25 = vld [vmem:[%s1998_s29 + $0x1c0] sm:$0xff] }
  0x30   : > { %813 = vmatpush.xpose.msra.mxu0 %v299_v8  ;;  %859 = vmatpush.xpose.msra.mxu2 %v301_v9  ;;  %v276_v26 = vld [vmem:[%s1998_s29 + $0x1b8] sm:$0xff]  ;;  %v278_v27 = vld [vmem:[%s1998_s29 + $0x1c8] sm:$0xff]  ;;  %v269_v28 = vld [vmem:[%s1998_s29 + $0x180] sm:$0xff] }
  0x31   : > { %836 = vmatpush.xpose.msra.mxu1 %v300_v10  ;;  %882 = vmatpush.xpose.msra.mxu3 %v302_v11  ;;  %v271_v29 = vld [vmem:[%s1998_s29 + $0x190] sm:$0xff]  ;;  %v270_v30 = vld [vmem:[%s1998_s29 + $0x188] sm:$0xff]  ;;  %v272_v31 = vld [vmem:[%s1998_s29 + $0x198] sm:$0xff] }
  0x32   : > { %v263_v32 = vld [vmem:[%s1998_s29 + $0x150] sm:$0xff]  ;;  %v265_v33 = vld [vmem:[%s1998_s29 + $0x160] sm:$0xff]  ;;  %v264_v34 = vld [vmem:[%s1998_s29 + $0x158] sm:$0xff] }
  0x33   : > { %v266_v35 = vld [vmem:[%s1998_s29 + $0x168] sm:$0xff]  ;;  %v257_v36 = vld [vmem:[%s1998_s29 + $0x120] sm:$0xff]  ;;  %v259_v37 = vld [vmem:[%s1998_s29 + $0x130] sm:$0xff] }
  0x34   : > { %814 = vmatpush.xpose.msra.mxu0 %v293_v12  ;;  %860 = vmatpush.xpose.msra.mxu2 %v295_v13  ;;  %v258_v38 = vld [vmem:[%s1998_s29 + $0x128] sm:$0xff]  ;;  %v260_v39 = vld [vmem:[%s1998_s29 + $0x138] sm:$0xff]  ;;  %v251_v40 = vld [vmem:[%s1998_s29 + $0xf0] sm:$0xff] }
  0x35   : > { %837 = vmatpush.xpose.msra.mxu1 %v294_v14  ;;  %883 = vmatpush.xpose.msra.mxu3 %v296_v15  ;;  %v253_v41 = vld [vmem:[%s1998_s29 + $0x100] sm:$0xff]  ;;  %v252_v42 = vld [vmem:[%s1998_s29 + $0xf8] sm:$0xff]  ;;  %v254_v43 = vld [vmem:[%s1998_s29 + $0x108] sm:$0xff] }
  0x36   : > { %v245_v44 = vld [vmem:[%s1998_s29 + $0xc0] sm:$0xff]  ;;  %v247_v45 = vld [vmem:[%s1998_s29 + $0xd0] sm:$0xff]  ;;  %v246_v46 = vld [vmem:[%s1998_s29 + $0xc8] sm:$0xff] }
  0x37   : > { %v248_v47 = vld [vmem:[%s1998_s29 + $0xd8] sm:$0xff]  ;;  %v239_v48 = vld [vmem:[%s1998_s29 + $0x90] sm:$0xff]  ;;  %v241_v49 = vld [vmem:[%s1998_s29 + $0xa0] sm:$0xff] }
  0x38   : > { %815 = vmatpush.xpose.msra.mxu0 %v287_v16  ;;  %861 = vmatpush.xpose.msra.mxu2 %v289_v17  ;;  %v240_v50 = vld [vmem:[%s1998_s29 + $0x98] sm:$0xff]  ;;  %v242_v51 = vld [vmem:[%s1998_s29 + $0xa8] sm:$0xff]  ;;  %v233_v52 = vld [vmem:[%s1998_s29 + $0x60] sm:$0xff] }
  0x39   : > { %838 = vmatpush.xpose.msra.mxu1 %v288_v18  ;;  %884 = vmatpush.xpose.msra.mxu3 %v290_v19  ;;  %v235_v53 = vld [vmem:[%s1998_s29 + $0x70] sm:$0xff]  ;;  %v234_v54 = vld [vmem:[%s1998_s29 + $0x68] sm:$0xff]  ;;  %v236_v55 = vld [vmem:[%s1998_s29 + $0x78] sm:$0xff] }
  0x3a   : > { %v227_v56 = vld [vmem:[%s1998_s29 + $0x30] sm:$0xff]  ;;  %v229_v57 = vld [vmem:[%s1998_s29 + $0x40] sm:$0xff]  ;;  %v228_v58 = vld [vmem:[%s1998_s29 + $0x38] sm:$0xff] }
  0x3b   : > { %v230_v59 = vld [vmem:[%s1998_s29 + $0x48] sm:$0xff]  ;;  %v221_v60 = vld [vmem:[%s1998_s29] sm:$0xff]  ;;  %v223_v61 = vld [vmem:[%s1998_s29 + $0x10] sm:$0xff] }
  0x3c   : > { %816 = vmatpush.xpose.msra.mxu0 %v281_v20  ;;  %862 = vmatpush.xpose.msra.mxu2 %v283_v21  ;;  %v315_v62 = vld [vmem:[%s1998_s29 + $0x2f0] sm:$0xff]  ;;  %v222_v0 = vld [vmem:[%s1998_s29 + $0x8] sm:$0xff]  ;;  %v224_v1 = vld [vmem:[%s1998_s29 + $0x18] sm:$0xff] }
  0x3d   : > { %839 = vmatpush.xpose.msra.mxu1 %v282_v22  ;;  %885 = vmatpush.xpose.msra.mxu3 %v284_v23  ;;  %v407_v63 = vld [vmem:[%s1998_s29 + $0x5d0] sm:$0xff]  ;;  %v316_v2 = vld [vmem:[%s1998_s29 + $0x2f8] sm:$0xff]  ;;  %v309_v4 = vld [vmem:[%s1998_s29 + $0x2c0] sm:$0xff] }
  0x3e   : > { %v408_v3 = vld [vmem:[%s1998_s29 + $0x5d8] sm:$0xff]  ;;  %v401_v5 = vld [vmem:[%s1998_s29 + $0x5a0] sm:$0xff]  ;;  %v310_v6 = vld [vmem:[%s1998_s29 + $0x2c8] sm:$0xff] }
  0x3f   : > { %v402_v7 = vld [vmem:[%s1998_s29 + $0x5a8] sm:$0xff]  ;;  %v303_v8 = vld [vmem:[%s1998_s29 + $0x290] sm:$0xff]  ;;  %v304_v10 = vld [vmem:[%s1998_s29 + $0x298] sm:$0xff] }
  0x40   : > { %817 = vmatpush.xpose.msra.mxu0 %v275_v24  ;;  %863 = vmatpush.xpose.msra.mxu2 %v277_v25  ;;  %v395_v9 = vld [vmem:[%s1998_s29 + $0x570] sm:$0xff]  ;;  %v396_v11 = vld [vmem:[%s1998_s29 + $0x578] sm:$0xff]  ;;  %v297_v12 = vld [vmem:[%s1998_s29 + $0x260] sm:$0xff] }
  0x41   : > { %840 = vmatpush.xpose.msra.mxu1 %v276_v26  ;;  %886 = vmatpush.xpose.msra.mxu3 %v278_v27  ;;  %v389_v13 = vld [vmem:[%s1998_s29 + $0x540] sm:$0xff]  ;;  %v298_v14 = vld [vmem:[%s1998_s29 + $0x268] sm:$0xff]  ;;  %v291_v16 = vld [vmem:[%s1998_s29 + $0x230] sm:$0xff] }
  0x42   : > { %v390_v15 = vld [vmem:[%s1998_s29 + $0x548] sm:$0xff]  ;;  %v383_v17 = vld [vmem:[%s1998_s29 + $0x510] sm:$0xff]  ;;  %v292_v18 = vld [vmem:[%s1998_s29 + $0x238] sm:$0xff] }
  0x43   : > { %v384_v19 = vld [vmem:[%s1998_s29 + $0x518] sm:$0xff]  ;;  %v285_v20 = vld [vmem:[%s1998_s29 + $0x200] sm:$0xff]  ;;  %v286_v22 = vld [vmem:[%s1998_s29 + $0x208] sm:$0xff] }
  0x44   : > { %818 = vmatpush.xpose.msra.mxu0 %v269_v28  ;;  %864 = vmatpush.xpose.msra.mxu2 %v271_v29  ;;  %v377_v21 = vld [vmem:[%s1998_s29 + $0x4e0] sm:$0xff]  ;;  %v378_v23 = vld [vmem:[%s1998_s29 + $0x4e8] sm:$0xff]  ;;  %v279_v24 = vld [vmem:[%s1998_s29 + $0x1d0] sm:$0xff] }
  0x45   : > { %841 = vmatpush.xpose.msra.mxu1 %v270_v30  ;;  %887 = vmatpush.xpose.msra.mxu3 %v272_v31  ;;  %v371_v25 = vld [vmem:[%s1998_s29 + $0x4b0] sm:$0xff]  ;;  %v2097_v26 = vld [vmem:[%s2876_s0] sm:$0xff]  ;;  %v280_v27 = vld [vmem:[%s1998_s29 + $0x1d8] sm:$0xff] }
  0x46   : > { %v372_v28 = vld [vmem:[%s1998_s29 + $0x4b8] sm:$0xff]  ;;  %v2105_v29 = vld [vmem:[%s2876_s0 + $0x8] sm:$0xff]  ;;  %v273_v30 = vld [vmem:[%s1998_s29 + $0x1a0] sm:$0xff] }
  0x47   : > { %v365_v31 = vld [vmem:[%s1998_s29 + $0x480] sm:$0xff] }
  0x48   : > { %819 = vmatpush.xpose.msra.mxu0 %v263_v32  ;;  %865 = vmatpush.xpose.msra.mxu2 %v265_v33  ;;  %v274_v32 = vld [vmem:[%s1998_s29 + $0x1a8] sm:$0xff] }
  0x49   : > { %842 = vmatpush.xpose.msra.mxu1 %v264_v34  ;;  %888 = vmatpush.xpose.msra.mxu3 %v266_v35  ;;  %v366_v33 = vld [vmem:[%s1998_s29 + $0x488] sm:$0xff]  ;;  %v2115_v34 = vld [vmem:[%s2876_s0 + $0x10] sm:$0xff] }
  0x4a   : > { %v267_v35 = vld [vmem:[%s1998_s29 + $0x170] sm:$0xff] }
  0x4c   : > { %820 = vmatpush.xpose.msra.mxu0 %v257_v36  ;;  %866 = vmatpush.xpose.msra.mxu2 %v259_v37  ;;  %v359_v36 = vld [vmem:[%s1998_s29 + $0x450] sm:$0xff] }
  0x4d   : > { %843 = vmatpush.xpose.msra.mxu1 %v258_v38  ;;  %889 = vmatpush.xpose.msra.mxu3 %v260_v39  ;;  %v2123_v37 = vld [vmem:[%s2876_s0 + $0x30] sm:$0xff]  ;;  %v2128_v38 = vld [vmem:[%s2876_s0 + $0x18] sm:$0xff] }
  0x4e   : > { %v268_v39 = vld [vmem:[%s1998_s29 + $0x178] sm:$0xff] }
  0x50   : > { %821 = vmatpush.xpose.msra.mxu0 %v251_v40  ;;  %867 = vmatpush.xpose.msra.mxu2 %v253_v41  ;;  %v360_v40 = vld [vmem:[%s1998_s29 + $0x458] sm:$0xff] }
  0x51   : > { %844 = vmatpush.xpose.msra.mxu1 %v252_v42  ;;  %890 = vmatpush.xpose.msra.mxu3 %v254_v43  ;;  %v2137_v41 = vld [vmem:[%s2876_s0 + $0x38] sm:$0xff]  ;;  %v261_v42 = vld [vmem:[%s1998_s29 + $0x140] sm:$0xff] }
  0x52   : > { %v353_v43 = vld [vmem:[%s1998_s29 + $0x420] sm:$0xff] }
  0x54   : > { %822 = vmatpush.xpose.msra.mxu0 %v245_v44  ;;  %868 = vmatpush.xpose.msra.mxu2 %v247_v45  ;;  %v262_v44 = vld [vmem:[%s1998_s29 + $0x148] sm:$0xff] }
  0x55   : > { %845 = vmatpush.xpose.msra.mxu1 %v246_v46  ;;  %891 = vmatpush.xpose.msra.mxu3 %v248_v47  ;;  %v354_v45 = vld [vmem:[%s1998_s29 + $0x428] sm:$0xff]  ;;  %v255_v46 = vld [vmem:[%s1998_s29 + $0x110] sm:$0xff] }
  0x56   : > { %v347_v47 = vld [vmem:[%s1998_s29 + $0x3f0] sm:$0xff] }
  0x58   : > { %823 = vmatpush.xpose.msra.mxu0 %v239_v48  ;;  %869 = vmatpush.xpose.msra.mxu2 %v241_v49  ;;  %v256_v48 = vld [vmem:[%s1998_s29 + $0x118] sm:$0xff] }
  0x59   : > { %846 = vmatpush.xpose.msra.mxu1 %v240_v50  ;;  %892 = vmatpush.xpose.msra.mxu3 %v242_v51  ;;  %v348_v49 = vld [vmem:[%s1998_s29 + $0x3f8] sm:$0xff]  ;;  %v249_v50 = vld [vmem:[%s1998_s29 + $0xe0] sm:$0xff] }
  0x5a   : > { %v341_v51 = vld [vmem:[%s1998_s29 + $0x3c0] sm:$0xff] }
  0x5c   : > { %824 = vmatpush.xpose.msra.mxu0 %v233_v52  ;;  %870 = vmatpush.xpose.msra.mxu2 %v235_v53  ;;  %v250_v52 = vld [vmem:[%s1998_s29 + $0xe8] sm:$0xff] }
  0x5d   : > { %847 = vmatpush.xpose.msra.mxu1 %v234_v54  ;;  %893 = vmatpush.xpose.msra.mxu3 %v236_v55  ;;  %v342_v53 = vld [vmem:[%s1998_s29 + $0x3c8] sm:$0xff]  ;;  %v243_v54 = vld [vmem:[%s1998_s29 + $0xb0] sm:$0xff] }
  0x5e   : > { %v335_v55 = vld [vmem:[%s1998_s29 + $0x390] sm:$0xff] }
  0x60   : > { %825 = vmatpush.xpose.msra.mxu0 %v227_v56  ;;  %871 = vmatpush.xpose.msra.mxu2 %v229_v57  ;;  %v244_v56 = vld [vmem:[%s1998_s29 + $0xb8] sm:$0xff] }
  0x61   : > { %848 = vmatpush.xpose.msra.mxu1 %v228_v58  ;;  %894 = vmatpush.xpose.msra.mxu3 %v230_v59  ;;  %v336_v57 = vld [vmem:[%s1998_s29 + $0x398] sm:$0xff]  ;;  %v237_v58 = vld [vmem:[%s1998_s29 + $0x80] sm:$0xff] }
  0x62   : > { %v329_v59 = vld [vmem:[%s1998_s29 + $0x360] sm:$0xff] }
  0x64   : > { %826 = vmatpush.xpose.msra.mxu0 %v221_v60  ;;  %872 = vmatpush.xpose.msra.mxu2 %v223_v61  ;;  %v238_v60 = vld [vmem:[%s1998_s29 + $0x88] sm:$0xff] }
  0x65   : > { %849 = vmatpush.xpose.msra.mxu1 %v222_v0  ;;  %895 = vmatpush.xpose.msra.mxu3 %v224_v1  ;;  %v330_v61 = vld [vmem:[%s1998_s29 + $0x368] sm:$0xff]  ;;  %v232_v0 = vld [vmem:[%s1998_s29 + $0x58] sm:$0xff] }
  0x66   : > { %v324_v1 = vld [vmem:[%s1998_s29 + $0x338] sm:$0xff] }
  0x67   : > { %827 = vmatmul.f32.vlgmr.msra.gmra.mxu0 %v2097_v26  ;;  %873 = vmatmul.f32.vlgmr.msra.gmra.mxu2 %v2115_v34 }
  0x68   : > { %903 = vmatpush.xpose.msrb.mxu0 %v315_v62  ;;  %949 = vmatpush.xpose.msrb.mxu2 %v407_v63  ;;  %v231_v62 = vld [vmem:[%s1998_s29 + $0x50] sm:$0xff] }
  0x69   : > { %926 = vmatpush.xpose.msrb.mxu1 %v316_v2  ;;  %972 = vmatpush.xpose.msrb.mxu3 %v408_v3  ;;  %v323_v63 = vld [vmem:[%s1998_s29 + $0x330] sm:$0xff]  ;;  %v225_v2 = vld [vmem:[%s1998_s29 + $0x20] sm:$0xff] }
  0x6a   : > { %850 = vmatmul.f32.vlgmr.msra.gmra.mxu1 %v2105_v29  ;;  %896 = vmatmul.f32.vlgmr.msra.gmra.mxu3 %v2128_v38  ;;  %v317_v3 = vld [vmem:[%s1998_s29 + $0x300] sm:$0xff] }
  0x6c   : > { %904 = vmatpush.xpose.msrb.mxu0 %v309_v4  ;;  %950 = vmatpush.xpose.msrb.mxu2 %v401_v5  ;;  %v409_v4 = vld [vmem:[%s1998_s29 + $0x5e0] sm:$0xff]  ;;  %v411_v5 = vld [vmem:[%s1998_s29 + $0x5f0] sm:$0xff] }
  0x6d   : > { %927 = vmatpush.xpose.msrb.mxu1 %v310_v6  ;;  %973 = vmatpush.xpose.msrb.mxu3 %v402_v7  ;;  %v226_v6 = vld [vmem:[%s1998_s29 + $0x28] sm:$0xff] }
  0x6e   : > { %v318_v7 = vld [vmem:[%s1998_s29 + $0x308] sm:$0xff] }
  0x6f   : > { %830 = vmatmul.f32.gmra.mxu0 %v2123_v37 }
  0x70   : > { %905 = vmatpush.xpose.msrb.mxu0 %v303_v8  ;;  %951 = vmatpush.xpose.msrb.mxu2 %v395_v9  ;;  %v410_v8 = vld [vmem:[%s1998_s29 + $0x5e8] sm:$0xff]  ;;  %v412_v9 = vld [vmem:[%s1998_s29 + $0x5f8] sm:$0xff] }
  0x71   : > { %928 = vmatpush.xpose.msrb.mxu1 %v304_v10  ;;  %974 = vmatpush.xpose.msrb.mxu3 %v396_v11  ;;  %v2175_v10 = vld [vmem:[%s2876_s0 + $0x20] sm:$0xff]  ;;  %v403_v11 = vld [vmem:[%s1998_s29 + $0x5b0] sm:$0xff] }
  0x72   : > { %853 = vmatmul.f32.gmra.mxu1 %v2137_v41 }
  0x74   : > { %906 = vmatpush.xpose.msrb.mxu0 %v297_v12  ;;  %952 = vmatpush.xpose.msrb.mxu2 %v389_v13  ;;  %v405_v12 = vld [vmem:[%s1998_s29 + $0x5c0] sm:$0xff]  ;;  %v2182_v13 = vld [vmem:[%s2876_s0 + $0x28] sm:$0xff] }
  0x75   : > { %929 = vmatpush.xpose.msrb.mxu1 %v298_v14  ;;  %975 = vmatpush.xpose.msrb.mxu3 %v390_v15  ;;  %v404_v14 = vld [vmem:[%s1998_s29 + $0x5b8] sm:$0xff]  ;;  %v406_v15 = vld [vmem:[%s1998_s29 + $0x5c8] sm:$0xff] }
  0x78   : > { %907 = vmatpush.xpose.msrb.mxu0 %v291_v16  ;;  %953 = vmatpush.xpose.msrb.mxu2 %v383_v17  ;;  %v397_v16 = vld [vmem:[%s1998_s29 + $0x580] sm:$0xff]  ;;  %v399_v17 = vld [vmem:[%s1998_s29 + $0x590] sm:$0xff] }
  0x79   : > { %930 = vmatpush.xpose.msrb.mxu1 %v292_v18  ;;  %976 = vmatpush.xpose.msrb.mxu3 %v384_v19  ;;  %v398_v18 = vld [vmem:[%s1998_s29 + $0x588] sm:$0xff]  ;;  %v400_v19 = vld [vmem:[%s1998_s29 + $0x598] sm:$0xff] }
  0x7c   : > { %908 = vmatpush.xpose.msrb.mxu0 %v285_v20  ;;  %954 = vmatpush.xpose.msrb.mxu2 %v377_v21  ;;  %v391_v20 = vld [vmem:[%s1998_s29 + $0x550] sm:$0xff]  ;;  %v393_v21 = vld [vmem:[%s1998_s29 + $0x560] sm:$0xff] }
  0x7d   : > { %931 = vmatpush.xpose.msrb.mxu1 %v286_v22  ;;  %977 = vmatpush.xpose.msrb.mxu3 %v378_v23  ;;  %v392_v22 = vld [vmem:[%s1998_s29 + $0x558] sm:$0xff]  ;;  %v394_v23 = vld [vmem:[%s1998_s29 + $0x568] sm:$0xff] }
  0x80   : > { %909 = vmatpush.xpose.msrb.mxu0 %v279_v24  ;;  %955 = vmatpush.xpose.msrb.mxu2 %v371_v25  ;;  %v2199_v24 = vld [vmem:[%s2876_s0 + $0x40] sm:$0xff] }
  0x81   : > { %932 = vmatpush.xpose.msrb.mxu1 %v280_v27  ;;  %978 = vmatpush.xpose.msrb.mxu3 %v372_v28  ;;  %v385_v25 = vld [vmem:[%s1998_s29 + $0x520] sm:$0xff]  ;;  %v387_v27 = vld [vmem:[%s1998_s29 + $0x530] sm:$0xff]  ;;  %v2207_v28 = vld [vmem:[%s2876_s0 + $0x48] sm:$0xff] }
  0x82   : > { %876 = vmatmul.f32.gmra.mxu2 %v2199_v24  ;;  %899 = vmatmul.f32.gmra.mxu3 %v2207_v28 }
  0x84   : > { %910 = vmatpush.xpose.msrb.mxu0 %v273_v30  ;;  %956 = vmatpush.xpose.msrb.mxu2 %v365_v31  ;;  %v386_v30 = vld [vmem:[%s1998_s29 + $0x528] sm:$0xff]  ;;  %v388_v31 = vld [vmem:[%s1998_s29 + $0x538] sm:$0xff] }
  0x85   : > { %933 = vmatpush.xpose.msrb.mxu1 %v274_v32  ;;  %979 = vmatpush.xpose.msrb.mxu3 %v366_v33  ;;  %v379_v32 = vld [vmem:[%s1998_s29 + $0x4f0] sm:$0xff]  ;;  %v381_v33 = vld [vmem:[%s1998_s29 + $0x500] sm:$0xff] }
  0x88   : > { %911 = vmatpush.xpose.msrb.mxu0 %v267_v35  ;;  %957 = vmatpush.xpose.msrb.mxu2 %v359_v36  ;;  %v380_v35 = vld [vmem:[%s1998_s29 + $0x4f8] sm:$0xff]  ;;  %v382_v36 = vld [vmem:[%s1998_s29 + $0x508] sm:$0xff] }
  0x89   : > { %934 = vmatpush.xpose.msrb.mxu1 %v268_v39  ;;  %980 = vmatpush.xpose.msrb.mxu3 %v360_v40  ;;  %v373_v39 = vld [vmem:[%s1998_s29 + $0x4c0] sm:$0xff]  ;;  %v375_v40 = vld [vmem:[%s1998_s29 + $0x4d0] sm:$0xff] }
  0x8c   : > { %912 = vmatpush.xpose.msrb.mxu0 %v261_v42  ;;  %958 = vmatpush.xpose.msrb.mxu2 %v353_v43  ;;  %v374_v42 = vld [vmem:[%s1998_s29 + $0x4c8] sm:$0xff]  ;;  %v376_v43 = vld [vmem:[%s1998_s29 + $0x4d8] sm:$0xff] }
  0x8d   : > { %935 = vmatpush.xpose.msrb.mxu1 %v262_v44  ;;  %981 = vmatpush.xpose.msrb.mxu3 %v354_v45  ;;  %v367_v44 = vld [vmem:[%s1998_s29 + $0x490] sm:$0xff]  ;;  %v369_v45 = vld [vmem:[%s1998_s29 + $0x4a0] sm:$0xff] }
  0x90   : > { %913 = vmatpush.xpose.msrb.mxu0 %v255_v46  ;;  %959 = vmatpush.xpose.msrb.mxu2 %v347_v47  ;;  %v368_v46 = vld [vmem:[%s1998_s29 + $0x498] sm:$0xff]  ;;  %v370_v47 = vld [vmem:[%s1998_s29 + $0x4a8] sm:$0xff] }
  0x91   : > { %936 = vmatpush.xpose.msrb.mxu1 %v256_v48  ;;  %982 = vmatpush.xpose.msrb.mxu3 %v348_v49  ;;  %v361_v48 = vld [vmem:[%s1998_s29 + $0x460] sm:$0xff]  ;;  %v363_v49 = vld [vmem:[%s1998_s29 + $0x470] sm:$0xff] }
  0x94   : > { %914 = vmatpush.xpose.msrb.mxu0 %v249_v50  ;;  %960 = vmatpush.xpose.msrb.mxu2 %v341_v51  ;;  %v2232_v50 = vld [vmem:[%s2876_s0 + $0x50] sm:$0xff]  ;;  %v362_v51 = vld [vmem:[%s1998_s29 + $0x468] sm:$0xff] }
  0x95   : > { %937 = vmatpush.xpose.msrb.mxu1 %v250_v52  ;;  %983 = vmatpush.xpose.msrb.mxu3 %v342_v53  ;;  %v364_v52 = vld [vmem:[%s1998_s29 + $0x478] sm:$0xff] }
  0x96   : > { %v2241_v53 = vld [vmem:[%s2876_s0 + $0x58] sm:$0xff] }
  0x98   : > { %915 = vmatpush.xpose.msrb.mxu0 %v243_v54  ;;  %961 = vmatpush.xpose.msrb.mxu2 %v335_v55  ;;  %v355_v54 = vld [vmem:[%s1998_s29 + $0x430] sm:$0xff]  ;;  %v357_v55 = vld [vmem:[%s1998_s29 + $0x440] sm:$0xff] }
  0x99   : > { %938 = vmatpush.xpose.msrb.mxu1 %v244_v56  ;;  %984 = vmatpush.xpose.msrb.mxu3 %v336_v57  ;;  %v356_v56 = vld [vmem:[%s1998_s29 + $0x438] sm:$0xff]  ;;  %v358_v57 = vld [vmem:[%s1998_s29 + $0x448] sm:$0xff] }
  0x9c   : > { %916 = vmatpush.xpose.msrb.mxu0 %v237_v58  ;;  %962 = vmatpush.xpose.msrb.mxu2 %v329_v59  ;;  %v349_v58 = vld [vmem:[%s1998_s29 + $0x400] sm:$0xff]  ;;  %v351_v59 = vld [vmem:[%s1998_s29 + $0x410] sm:$0xff] }
  0x9d   : > { %939 = vmatpush.xpose.msrb.mxu1 %v238_v60  ;;  %985 = vmatpush.xpose.msrb.mxu3 %v330_v61  ;;  %v350_v60 = vld [vmem:[%s1998_s29 + $0x408] sm:$0xff]  ;;  %v352_v61 = vld [vmem:[%s1998_s29 + $0x418] sm:$0xff] }
  0xa0   : > { %917 = vmatpush.xpose.msrb.mxu0 %v231_v62  ;;  %963 = vmatpush.xpose.msrb.mxu2 %v323_v63  ;;  %v343_v62 = vld [vmem:[%s1998_s29 + $0x3d0] sm:$0xff]  ;;  %v345_v63 = vld [vmem:[%s1998_s29 + $0x3e0] sm:$0xff] }
  0xa1   : > { %940 = vmatpush.xpose.msrb.mxu1 %v232_v0  ;;  %986 = vmatpush.xpose.msrb.mxu3 %v324_v1  ;;  %v344_v0 = vld [vmem:[%s1998_s29 + $0x3d8] sm:$0xff]  ;;  %v346_v1 = vld [vmem:[%s1998_s29 + $0x3e8] sm:$0xff] }
  0xa4   : > { %918 = vmatpush.xpose.msrb.mxu0 %v225_v2  ;;  %964 = vmatpush.xpose.msrb.mxu2 %v317_v3  ;;  %v337_v2 = vld [vmem:[%s1998_s29 + $0x3a0] sm:$0xff]  ;;  %v339_v3 = vld [vmem:[%s1998_s29 + $0x3b0] sm:$0xff] }
  0xa5   : > { %941 = vmatpush.xpose.msrb.mxu1 %v226_v6  ;;  %987 = vmatpush.xpose.msrb.mxu3 %v318_v7  ;;  %v331_v6 = vld [vmem:[%s1998_s29 + $0x370] sm:$0xff]  ;;  %v333_v7 = vld [vmem:[%s1998_s29 + $0x380] sm:$0xff] }
  0xa7   : > { %919 = vmatmul.f32.vlgmr.msrb.gmra.mxu0 %v2175_v10  ;;  %965 = vmatmul.f32.vlgmr.msrb.gmra.mxu2 %v2097_v26 }
  0xa8   : > { %995 = vmatpush.xpose.msra.mxu0 %v409_v4  ;;  %1041 = vmatpush.xpose.msra.mxu2 %v411_v5  ;;  %v338_v4 = vld [vmem:[%s1998_s29 + $0x3a8] sm:$0xff]  ;;  %v340_v5 = vld [vmem:[%s1998_s29 + $0x3b8] sm:$0xff] }
  0xa9   : > { %1018 = vmatpush.xpose.msra.mxu1 %v410_v8  ;;  %1064 = vmatpush.xpose.msra.mxu3 %v412_v9  ;;  %v332_v8 = vld [vmem:[%s1998_s29 + $0x378] sm:$0xff]  ;;  %v334_v9 = vld [vmem:[%s1998_s29 + $0x388] sm:$0xff] }
  0xaa   : > { %942 = vmatmul.f32.vlgmr.msrb.gmra.mxu1 %v2182_v13  ;;  %988 = vmatmul.f32.vlgmr.msrb.gmra.mxu3 %v2105_v29 }
  0xac   : > { %996 = vmatpush.xpose.msra.mxu0 %v403_v11  ;;  %1042 = vmatpush.xpose.msra.mxu2 %v405_v12  ;;  %v325_v11 = vld [vmem:[%s1998_s29 + $0x340] sm:$0xff]  ;;  %v327_v12 = vld [vmem:[%s1998_s29 + $0x350] sm:$0xff] }
  0xad   : > { %1019 = vmatpush.xpose.msra.mxu1 %v404_v14  ;;  %1065 = vmatpush.xpose.msra.mxu3 %v406_v15  ;;  %v326_v14 = vld [vmem:[%s1998_s29 + $0x348] sm:$0xff]  ;;  %v328_v15 = vld [vmem:[%s1998_s29 + $0x358] sm:$0xff] }
  0xaf   : > { %968 = vmatmul.f32.gmra.mxu2 %v2123_v37  ;;  %922 = vmatmul.f32.gmra.mxu0 %v2232_v50 }
  0xb0   : > { %997 = vmatpush.xpose.msra.mxu0 %v397_v16  ;;  %1043 = vmatpush.xpose.msra.mxu2 %v399_v17  ;;  %v319_v16 = vld [vmem:[%s1998_s29 + $0x310] sm:$0xff]  ;;  %v321_v17 = vld [vmem:[%s1998_s29 + $0x320] sm:$0xff] }
  0xb1   : > { %1020 = vmatpush.xpose.msra.mxu1 %v398_v18  ;;  %1066 = vmatpush.xpose.msra.mxu3 %v400_v19  ;;  %v503_v18 = vld [vmem:[%s1998_s29 + $0x8d0] sm:$0xff]  ;;  %v505_v19 = vld [vmem:[%s1998_s29 + $0x8e0] sm:$0xff] }
  0xb2   : > { %991 = vmatmul.f32.gmra.mxu3 %v2137_v41  ;;  %945 = vmatmul.f32.gmra.mxu1 %v2241_v53 }
  0xb4   : > { %998 = vmatpush.xpose.msra.mxu0 %v391_v20  ;;  %1044 = vmatpush.xpose.msra.mxu2 %v393_v21  ;;  %v320_v20 = vld [vmem:[%s1998_s29 + $0x318] sm:$0xff]  ;;  %v322_v21 = vld [vmem:[%s1998_s29 + $0x328] sm:$0xff] }
  0xb5   : > { %1021 = vmatpush.xpose.msra.mxu1 %v392_v22  ;;  %1067 = vmatpush.xpose.msra.mxu3 %v394_v23  ;;  %v504_v22 = vld [vmem:[%s1998_s29 + $0x8d8] sm:$0xff]  ;;  %v506_v23 = vld [vmem:[%s1998_s29 + $0x8e8] sm:$0xff] }
  0xb8   : > { %999 = vmatpush.xpose.msra.mxu0 %v385_v25  ;;  %1045 = vmatpush.xpose.msra.mxu2 %v387_v27  ;;  %v497_v25 = vld [vmem:[%s1998_s29 + $0x8a0] sm:$0xff]  ;;  %v499_v27 = vld [vmem:[%s1998_s29 + $0x8b0] sm:$0xff] }
  0xb9   : > { %1022 = vmatpush.xpose.msra.mxu1 %v386_v30  ;;  %1068 = vmatpush.xpose.msra.mxu3 %v388_v31  ;;  %v498_v30 = vld [vmem:[%s1998_s29 + $0x8a8] sm:$0xff]  ;;  %v500_v31 = vld [vmem:[%s1998_s29 + $0x8b8] sm:$0xff] }
  0xbc   : > { %1000 = vmatpush.xpose.msra.mxu0 %v379_v32  ;;  %1046 = vmatpush.xpose.msra.mxu2 %v381_v33  ;;  %v491_v32 = vld [vmem:[%s1998_s29 + $0x870] sm:$0xff]  ;;  %v493_v33 = vld [vmem:[%s1998_s29 + $0x880] sm:$0xff] }
  0xbd   : > { %1023 = vmatpush.xpose.msra.mxu1 %v380_v35  ;;  %1069 = vmatpush.xpose.msra.mxu3 %v382_v36  ;;  %v492_v35 = vld [vmem:[%s1998_s29 + $0x878] sm:$0xff]  ;;  %v494_v36 = vld [vmem:[%s1998_s29 + $0x888] sm:$0xff] }
  0xc0   : > { %1001 = vmatpush.xpose.msra.mxu0 %v373_v39  ;;  %1047 = vmatpush.xpose.msra.mxu2 %v375_v40  ;;  %v485_v39 = vld [vmem:[%s1998_s29 + $0x840] sm:$0xff]  ;;  %v487_v40 = vld [vmem:[%s1998_s29 + $0x850] sm:$0xff] }
  0xc1   : > { %1024 = vmatpush.xpose.msra.mxu1 %v374_v42  ;;  %1070 = vmatpush.xpose.msra.mxu3 %v376_v43  ;;  %v486_v42 = vld [vmem:[%s1998_s29 + $0x848] sm:$0xff]  ;;  %v488_v43 = vld [vmem:[%s1998_s29 + $0x858] sm:$0xff] }
  0xc4   : > { %1002 = vmatpush.xpose.msra.mxu0 %v367_v44  ;;  %1048 = vmatpush.xpose.msra.mxu2 %v369_v45  ;;  %v479_v44 = vld [vmem:[%s1998_s29 + $0x810] sm:$0xff]  ;;  %v481_v45 = vld [vmem:[%s1998_s29 + $0x820] sm:$0xff] }
  0xc5   : > { %1025 = vmatpush.xpose.msra.mxu1 %v368_v46  ;;  %1071 = vmatpush.xpose.msra.mxu3 %v370_v47  ;;  %v480_v46 = vld [vmem:[%s1998_s29 + $0x818] sm:$0xff]  ;;  %v482_v47 = vld [vmem:[%s1998_s29 + $0x828] sm:$0xff] }
  0xc8   : > { %1003 = vmatpush.xpose.msra.mxu0 %v361_v48  ;;  %1049 = vmatpush.xpose.msra.mxu2 %v363_v49  ;;  %v473_v48 = vld [vmem:[%s1998_s29 + $0x7e0] sm:$0xff]  ;;  %v475_v49 = vld [vmem:[%s1998_s29 + $0x7f0] sm:$0xff] }
  0xc9   : > { %1026 = vmatpush.xpose.msra.mxu1 %v362_v51  ;;  %1072 = vmatpush.xpose.msra.mxu3 %v364_v52  ;;  %v474_v51 = vld [vmem:[%s1998_s29 + $0x7e8] sm:$0xff]  ;;  %v476_v52 = vld [vmem:[%s1998_s29 + $0x7f8] sm:$0xff] }
  0xcc   : > { %1004 = vmatpush.xpose.msra.mxu0 %v355_v54  ;;  %1050 = vmatpush.xpose.msra.mxu2 %v357_v55  ;;  %v467_v54 = vld [vmem:[%s1998_s29 + $0x7b0] sm:$0xff]  ;;  %v469_v55 = vld [vmem:[%s1998_s29 + $0x7c0] sm:$0xff] }
  0xcd   : > { %1027 = vmatpush.xpose.msra.mxu1 %v356_v56  ;;  %1073 = vmatpush.xpose.msra.mxu3 %v358_v57  ;;  %v468_v56 = vld [vmem:[%s1998_s29 + $0x7b8] sm:$0xff]  ;;  %v470_v57 = vld [vmem:[%s1998_s29 + $0x7c8] sm:$0xff] }
  0xd0   : > { %1005 = vmatpush.xpose.msra.mxu0 %v349_v58  ;;  %1051 = vmatpush.xpose.msra.mxu2 %v351_v59  ;;  %v461_v58 = vld [vmem:[%s1998_s29 + $0x780] sm:$0xff]  ;;  %v463_v59 = vld [vmem:[%s1998_s29 + $0x790] sm:$0xff] }
  0xd1   : > { %1028 = vmatpush.xpose.msra.mxu1 %v350_v60  ;;  %1074 = vmatpush.xpose.msra.mxu3 %v352_v61  ;;  %v462_v60 = vld [vmem:[%s1998_s29 + $0x788] sm:$0xff]  ;;  %v464_v61 = vld [vmem:[%s1998_s29 + $0x798] sm:$0xff] }
  0xd4   : > { %1006 = vmatpush.xpose.msra.mxu0 %v343_v62  ;;  %1052 = vmatpush.xpose.msra.mxu2 %v345_v63  ;;  %v455_v62 = vld [vmem:[%s1998_s29 + $0x750] sm:$0xff]  ;;  %v457_v63 = vld [vmem:[%s1998_s29 + $0x760] sm:$0xff] }
  0xd5   : > { %1029 = vmatpush.xpose.msra.mxu1 %v344_v0  ;;  %1075 = vmatpush.xpose.msra.mxu3 %v346_v1  ;;  %v456_v0 = vld [vmem:[%s1998_s29 + $0x758] sm:$0xff]  ;;  %v458_v1 = vld [vmem:[%s1998_s29 + $0x768] sm:$0xff] }
  0xd8   : > { %1007 = vmatpush.xpose.msra.mxu0 %v337_v2  ;;  %1053 = vmatpush.xpose.msra.mxu2 %v339_v3  ;;  %v449_v2 = vld [vmem:[%s1998_s29 + $0x720] sm:$0xff]  ;;  %v451_v3 = vld [vmem:[%s1998_s29 + $0x730] sm:$0xff] }
  0xd9   : > { %1030 = vmatpush.xpose.msra.mxu1 %v338_v4  ;;  %1076 = vmatpush.xpose.msra.mxu3 %v340_v5  ;;  %v450_v4 = vld [vmem:[%s1998_s29 + $0x728] sm:$0xff]  ;;  %v452_v5 = vld [vmem:[%s1998_s29 + $0x738] sm:$0xff] }
  0xdc   : > { %1008 = vmatpush.xpose.msra.mxu0 %v331_v6  ;;  %1054 = vmatpush.xpose.msra.mxu2 %v333_v7  ;;  %v443_v6 = vld [vmem:[%s1998_s29 + $0x6f0] sm:$0xff]  ;;  %v445_v7 = vld [vmem:[%s1998_s29 + $0x700] sm:$0xff] }
  0xdd   : > { %1031 = vmatpush.xpose.msra.mxu1 %v332_v8  ;;  %1077 = vmatpush.xpose.msra.mxu3 %v334_v9  ;;  %v444_v8 = vld [vmem:[%s1998_s29 + $0x6f8] sm:$0xff]  ;;  %v446_v9 = vld [vmem:[%s1998_s29 + $0x708] sm:$0xff] }
  0xe0   : > { %1009 = vmatpush.xpose.msra.mxu0 %v325_v11  ;;  %1055 = vmatpush.xpose.msra.mxu2 %v327_v12  ;;  %v437_v11 = vld [vmem:[%s1998_s29 + $0x6c0] sm:$0xff]  ;;  %v439_v12 = vld [vmem:[%s1998_s29 + $0x6d0] sm:$0xff] }
  0xe1   : > { %1032 = vmatpush.xpose.msra.mxu1 %v326_v14  ;;  %1078 = vmatpush.xpose.msra.mxu3 %v328_v15  ;;  %v438_v14 = vld [vmem:[%s1998_s29 + $0x6c8] sm:$0xff]  ;;  %v440_v15 = vld [vmem:[%s1998_s29 + $0x6d8] sm:$0xff] }
  0xe4   : > { %1010 = vmatpush.xpose.msra.mxu0 %v319_v16  ;;  %1056 = vmatpush.xpose.msra.mxu2 %v321_v17  ;;  %v431_v16 = vld [vmem:[%s1998_s29 + $0x690] sm:$0xff]  ;;  %v433_v17 = vld [vmem:[%s1998_s29 + $0x6a0] sm:$0xff] }
  0xe5   : > { %1033 = vmatpush.xpose.msra.mxu1 %v320_v20  ;;  %1079 = vmatpush.xpose.msra.mxu3 %v322_v21  ;;  %v434_v20 = vld [vmem:[%s1998_s29 + $0x6a8] sm:$0xff]  ;;  %v828_v21 = vpop.f32.mrf.mxu0 }
  0xe7   : > { %1057 = vmatmul.f32.vlgmr.msra.gmra.mxu2 %v2175_v10  ;;  %1011 = vmatmul.f32.vlgmr.msra.gmra.mxu0 %v2115_v34 }
  0xe8   : > { %1087 = vmatpush.xpose.msrb.mxu0 %v503_v18  ;;  %1133 = vmatpush.xpose.msrb.mxu2 %v505_v19  ;;  %v2337_v18 = vld [vmem:[%s2330_s7] sm:$0x3f]  ;;  %v432_v19 = vld [vmem:[%s1998_s29 + $0x698] sm:$0xff] }
  0xe9   : > { %1110 = vmatpush.xpose.msrb.mxu1 %v504_v22  ;;  %1156 = vmatpush.xpose.msrb.mxu3 %v506_v23  ;;  %v799_v22 = vperm.slane %v2337_v18, 0  ;;  %v425_v23 = vld [vmem:[%s1998_s29 + $0x660] sm:$0xff] }
  0xea   : > { %1080 = vmatmul.f32.vlgmr.msra.gmra.mxu3 %v2182_v13  ;;  %1034 = vmatmul.f32.vlgmr.msra.gmra.mxu1 %v2128_v38 }
  0xec   : > { %1088 = vmatpush.xpose.msrb.mxu0 %v497_v25  ;;  %1134 = vmatpush.xpose.msrb.mxu2 %v499_v27  ;;  %v427_v25 = vld [vmem:[%s1998_s29 + $0x670] sm:$0xff]  ;;  %v851_v27 = vpop.f32.mrf.mxu1 }
  0xed   : > { %1111 = vmatpush.xpose.msrb.mxu1 %v498_v30  ;;  %1157 = vmatpush.xpose.msrb.mxu3 %v500_v31  ;;  %v426_v30 = vld [vmem:[%s1998_s29 + $0x668] sm:$0xff]  ;;  %v428_v31 = vld [vmem:[%s1998_s29 + $0x678] sm:$0xff] }
  0xef   : > { %1060 = vmatmul.f32.gmra.mxu2 %v2232_v50  ;;  %1014 = vmatmul.f32.gmra.mxu0 %v2199_v24 }
  0xf0   : > { %1089 = vmatpush.xpose.msrb.mxu0 %v491_v32  ;;  %1135 = vmatpush.xpose.msrb.mxu2 %v493_v33  ;;  %v829_v32 = vadd.f32 %v828_v21, %v799_v22  ;;  %v419_v33 = vld [vmem:[%s1998_s29 + $0x630] sm:$0xff] }
  0xf1   : > { %1112 = vmatpush.xpose.msrb.mxu1 %v492_v35  ;;  %1158 = vmatpush.xpose.msrb.mxu3 %v494_v36  ;;  %v421_v35 = vld [vmem:[%s1998_s29 + $0x640] sm:$0xff]  ;;  %v420_v36 = vld [vmem:[%s1998_s29 + $0x638] sm:$0xff] }
  0xf2   : > { %1083 = vmatmul.f32.gmra.mxu3 %v2241_v53  ;;  %1037 = vmatmul.f32.gmra.mxu1 %v2207_v28 }
  0xf4   : > { %1090 = vmatpush.xpose.msrb.mxu0 %v485_v39  ;;  %1136 = vmatpush.xpose.msrb.mxu2 %v487_v40  ;;  %v422_v39 = vld [vmem:[%s1998_s29 + $0x648] sm:$0xff]  ;;  %v852_v40 = vadd.f32 %v851_v27, %v829_v32  ;;  %v459_v27 = vld [vmem:[%s1998_s29 + $0x770] sm:$0xff]  ;;  %v460_v32 = vld [vmem:[%s1998_s29 + $0x778] sm:$0xff] }
  0xf5   : > { %1113 = vmatpush.xpose.msrb.mxu1 %v486_v42  ;;  %1159 = vmatpush.xpose.msrb.mxu3 %v488_v43  ;;  %v413_v42 = vld [vmem:[%s1998_s29 + $0x600] sm:$0xff]  ;;  %v415_v43 = vld [vmem:[%s1998_s29 + $0x610] sm:$0xff] }
  0xf8   : > { %1091 = vmatpush.xpose.msrb.mxu0 %v479_v44  ;;  %1137 = vmatpush.xpose.msrb.mxu2 %v481_v45  ;;  %v2354_v44 = vpop.f32.mrf.mxu0  ;;  %v874_v45 = vpop.f32.mrf.mxu2 }
  0xf9   : > { %1114 = vmatpush.xpose.msrb.mxu1 %v480_v46  ;;  %1160 = vmatpush.xpose.msrb.mxu3 %v482_v47  ;;  %v507_v46 = vld [vmem:[%s1998_s29 + $0x8f0] sm:$0xff] }
  0xfa   : > { %v599_v47 = vld [vmem:[%s1998_s29 + $0xbd0] sm:$0xff] }
  0xfc   : > { %1092 = vmatpush.xpose.msrb.mxu0 %v473_v48  ;;  %1138 = vmatpush.xpose.msrb.mxu2 %v475_v49  ;;  %v414_v48 = vld [vmem:[%s1998_s29 + $0x608] sm:$0xff]  ;;  %v416_v49 = vld [vmem:[%s1998_s29 + $0x618] sm:$0xff] }
  0xfd   : > { %1115 = vmatpush.xpose.msrb.mxu1 %v474_v51  ;;  %1161 = vmatpush.xpose.msrb.mxu3 %v476_v52  ;;  %v2360_v51 = vpop.f32.mrf.mxu1  ;;  %v508_v52 = vld [vmem:[%s1998_s29 + $0x8f8] sm:$0xff] }
 0x100   : > { %1093 = vmatpush.xpose.msrb.mxu0 %v467_v54  ;;  %1139 = vmatpush.xpose.msrb.mxu2 %v469_v55  ;;  %v600_v54 = vld [vmem:[%s1998_s29 + $0xbd8] sm:$0xff]  ;;  %v875_v55 = vadd.f32 %v874_v45, %v852_v40 }
 0x101   : > { %1116 = vmatpush.xpose.msrb.mxu1 %v468_v56  ;;  %1162 = vmatpush.xpose.msrb.mxu3 %v470_v57  ;;  %v897_v56 = vpop.f32.mrf.mxu3  ;;  %v501_v57 = vld [vmem:[%s1998_s29 + $0x8c0] sm:$0xff] }
 0x104   : > { %1094 = vmatpush.xpose.msrb.mxu0 %v461_v58  ;;  %1140 = vmatpush.xpose.msrb.mxu2 %v463_v59  ;;  %v593_v58 = vld [vmem:[%s1998_s29 + $0xba0] sm:$0xff]  ;;  %v502_v59 = vld [vmem:[%s1998_s29 + $0x8c8] sm:$0xff] }
 0x105   : > { %1117 = vmatpush.xpose.msrb.mxu1 %v462_v60  ;;  %1163 = vmatpush.xpose.msrb.mxu3 %v464_v61  ;;  %v594_v60 = vld [vmem:[%s1998_s29 + $0xba8] sm:$0xff]  ;;  %v898_v61 = vadd.f32 %v897_v56, %v875_v55  ;;  %v877_v21 = vpop.f32.mrf.mxu2 }
 0x106   : > { %v442_v55 = vld [vmem:[%s1998_s29 + $0x6e8] sm:$0xff] }
 0x107   : > { %v534_v56 = vld [vmem:[%s1998_s29 + $0x9c8] sm:$0xff] }
 0x108   : > { %1095 = vmatpush.xpose.msrb.mxu0 %v455_v62  ;;  %1141 = vmatpush.xpose.msrb.mxu2 %v457_v63  ;;  %v495_v62 = vld [vmem:[%s1998_s29 + $0x890] sm:$0xff] }
 0x109   : > { %1118 = vmatpush.xpose.msrb.mxu1 %v456_v0  ;;  %1164 = vmatpush.xpose.msrb.mxu3 %v458_v1  ;;  %v587_v63 = vld [vmem:[%s1998_s29 + $0xb70] sm:$0xff]  ;;  %v496_v1 = vld [vmem:[%s1998_s29 + $0x898] sm:$0xff] }
 0x10c   : > { %1096 = vmatpush.xpose.msrb.mxu0 %v449_v2  ;;  %1142 = vmatpush.xpose.msrb.mxu2 %v451_v3  ;;  %v489_v3 = vld [vmem:[%s1998_s29 + $0x860] sm:$0xff] }
 0x10d   : > { %1119 = vmatpush.xpose.msrb.mxu1 %v450_v4  ;;  %1165 = vmatpush.xpose.msrb.mxu3 %v452_v5  ;;  %v581_v4 = vld [vmem:[%s1998_s29 + $0xb40] sm:$0xff] }
 0x110   : > { %1097 = vmatpush.xpose.msrb.mxu0 %v443_v6  ;;  %1143 = vmatpush.xpose.msrb.mxu2 %v445_v7  ;;  %v483_v6 = vld [vmem:[%s1998_s29 + $0x830] sm:$0xff] }
 0x111   : > { %1120 = vmatpush.xpose.msrb.mxu1 %v444_v8  ;;  %1166 = vmatpush.xpose.msrb.mxu3 %v446_v9  ;;  %v575_v7 = vld [vmem:[%s1998_s29 + $0xb10] sm:$0xff]  ;;  %v484_v8 = vld [vmem:[%s1998_s29 + $0x838] sm:$0xff] }
 0x112   : > { %v576_v9 = vld [vmem:[%s1998_s29 + $0xb18] sm:$0xff] }
 0x114   : > { %1098 = vmatpush.xpose.msrb.mxu0 %v437_v11  ;;  %1144 = vmatpush.xpose.msrb.mxu2 %v439_v12  ;;  %v570_v11 = vld [vmem:[%s1998_s29 + $0xae8] sm:$0xff]  ;;  %v471_v12 = vld [vmem:[%s1998_s29 + $0x7d0] sm:$0xff] }
 0x115   : > { %1121 = vmatpush.xpose.msrb.mxu1 %v438_v14  ;;  %1167 = vmatpush.xpose.msrb.mxu3 %v440_v15  ;;  %v563_v14 = vld [vmem:[%s1998_s29 + $0xab0] sm:$0xff] }
 0x118   : > { %1099 = vmatpush.xpose.msrb.mxu0 %v431_v16  ;;  %1145 = vmatpush.xpose.msrb.mxu2 %v433_v17  ;;  %v472_v16 = vld [vmem:[%s1998_s29 + $0x7d8] sm:$0xff] }
 0x119   : > { %1122 = vmatpush.xpose.msrb.mxu1 %v432_v19  ;;  %1168 = vmatpush.xpose.msrb.mxu3 %v434_v20  ;;  %v564_v17 = vld [vmem:[%s1998_s29 + $0xab8] sm:$0xff]  ;;  %v465_v19 = vld [vmem:[%s1998_s29 + $0x7a0] sm:$0xff] }
 0x11a   : > { %v557_v20 = vld [vmem:[%s1998_s29 + $0xa80] sm:$0xff] }
 0x11c   : > { %1100 = vmatpush.xpose.msrb.mxu0 %v425_v23  ;;  %1146 = vmatpush.xpose.msrb.mxu2 %v427_v25  ;;  %v558_v23 = vld [vmem:[%s1998_s29 + $0xa88] sm:$0xff] }
 0x11d   : > { %1123 = vmatpush.xpose.msrb.mxu1 %v426_v30  ;;  %1169 = vmatpush.xpose.msrb.mxu3 %v428_v31  ;;  %v551_v30 = vld [vmem:[%s1998_s29 + $0xa50] sm:$0xff]  ;;  %v900_v31 = vpop.f32.mrf.mxu3 }
 0x120   : > { %1101 = vmatpush.xpose.msrb.mxu0 %v419_v33  ;;  %1147 = vmatpush.xpose.msrb.mxu2 %v421_v35  ;;  %v552_v33 = vld [vmem:[%s1998_s29 + $0xa58] sm:$0xff] }
 0x121   : > { %1124 = vmatpush.xpose.msrb.mxu1 %v420_v36  ;;  %1170 = vmatpush.xpose.msrb.mxu3 %v422_v39  ;;  %v453_v36 = vld [vmem:[%s1998_s29 + $0x740] sm:$0xff] }
 0x122   : > { %v545_v39 = vld [vmem:[%s1998_s29 + $0xa20] sm:$0xff] }
 0x124   : > { %1102 = vmatpush.xpose.msrb.mxu0 %v413_v42  ;;  %1148 = vmatpush.xpose.msrb.mxu2 %v415_v43  ;;  %v920_v0 = vpop.f32.mrf.mxu0  ;;  %v454_v42 = vld [vmem:[%s1998_s29 + $0x748] sm:$0xff] }
 0x125   : > { %1125 = vmatpush.xpose.msrb.mxu1 %v414_v48  ;;  %1171 = vmatpush.xpose.msrb.mxu3 %v416_v49  ;;  %v921_v2 = vadd.f32 %v920_v0, %v898_v61  ;;  %v546_v43 = vld [vmem:[%s1998_s29 + $0xa28] sm:$0xff]  ;;  %v448_v49 = vld [vmem:[%s1998_s29 + $0x718] sm:$0xff]  ;;  %v429_v61 = vld [vmem:[%s1998_s29 + $0x680] sm:$0xff] }
 0x126   : > { %v522_v0 = vld [vmem:[%s1998_s29 + $0x968] sm:$0xff] }
 0x127   : > { %1103 = vmatmul.f32.vlgmr.msrb.gmra.mxu0 %v2097_v26  ;;  %1149 = vmatmul.f32.vlgmr.msrb.gmra.mxu2 %v2115_v34  ;;  %v588_v26 = vld [vmem:[%s1998_s29 + $0xb78] sm:$0xff]  ;;  %v943_v34 = vpop.f32.mrf.mxu1 }
 0x128   : > { %1179 = vmatpush.xpose.msra.mxu0 %v507_v46  ;;  %1225 = vmatpush.xpose.msra.mxu2 %v599_v47  ;;  %v944_v5 = vadd.f32 %v943_v34, %v921_v2  ;;  %v447_v46 = vld [vmem:[%s1998_s29 + $0x710] sm:$0xff]  ;;  %v424_v34 = vld [vmem:[%s1998_s29 + $0x658] sm:$0xff] }
 0x129   : > { %1202 = vmatpush.xpose.msra.mxu1 %v508_v52  ;;  %1248 = vmatpush.xpose.msra.mxu3 %v600_v54  ;;  %v539_v47 = vld [vmem:[%s1998_s29 + $0x9f0] sm:$0xff]  ;;  %v441_v52 = vld [vmem:[%s1998_s29 + $0x6e0] sm:$0xff] }
 0x12a   : > { %1126 = vmatmul.f32.vlgmr.msrb.gmra.mxu1 %v2105_v29  ;;  %1172 = vmatmul.f32.vlgmr.msrb.gmra.mxu3 %v2128_v38  ;;  %v490_v29 = vld [vmem:[%s1998_s29 + $0x868] sm:$0xff]  ;;  %1639 = vst [vmem:[%s2381_s24] sm:$0xff] %v944_v5  ;;  %v533_v54 = vld [vmem:[%s1998_s29 + $0x9c0] sm:$0xff]  ;;  %v966_v2 = vpop.f32.mrf.mxu2  ;;  %v800_v5 = vperm.slane %v2337_v18, 1 }
 0x12b   : > { %v582_v38 = vld [vmem:[%s1998_s29 + $0xb48] sm:$0xff] }
 0x12c   : > { %1180 = vmatpush.xpose.msra.mxu0 %v501_v57  ;;  %1226 = vmatpush.xpose.msra.mxu2 %v593_v58  ;;  %v923_v40 = vpop.f32.mrf.mxu0  ;;  %v435_v57 = vld [vmem:[%s1998_s29 + $0x6b0] sm:$0xff] }
 0x12d   : > { %1203 = vmatpush.xpose.msra.mxu1 %v502_v59  ;;  %1249 = vmatpush.xpose.msra.mxu3 %v594_v60  ;;  %v527_v58 = vld [vmem:[%s1998_s29 + $0x990] sm:$0xff]  ;;  %v436_v59 = vld [vmem:[%s1998_s29 + $0x6b8] sm:$0xff] }
 0x12e   : > { %v528_v60 = vld [vmem:[%s1998_s29 + $0x998] sm:$0xff] }
 0x12f   : > { %1106 = vmatmul.f32.gmra.mxu0 %v2123_v37  ;;  %1152 = vmatmul.f32.gmra.mxu2 %v2199_v24  ;;  %v477_v37 = vld [vmem:[%s1998_s29 + $0x800] sm:$0xff]  ;;  %v946_v45 = vpop.f32.mrf.mxu1 }
 0x130   : > { %1181 = vmatpush.xpose.msra.mxu0 %v495_v62  ;;  %1227 = vmatpush.xpose.msra.mxu2 %v587_v63  ;;  %v569_v24 = vld [vmem:[%s1998_s29 + $0xae0] sm:$0xff]  ;;  %v430_v63 = vld [vmem:[%s1998_s29 + $0x688] sm:$0xff] }
 0x131   : > { %1204 = vmatpush.xpose.msra.mxu1 %v496_v1  ;;  %1250 = vmatpush.xpose.msra.mxu3 %v588_v26  ;;  %v521_v62 = vld [vmem:[%s1998_s29 + $0x960] sm:$0xff]  ;;  %v423_v1 = vld [vmem:[%s1998_s29 + $0x650] sm:$0xff] }
 0x132   : > { %1129 = vmatmul.f32.gmra.mxu1 %v2137_v41  ;;  %1175 = vmatmul.f32.gmra.mxu3 %v2207_v28  ;;  %v832_v41 = vadd.f32 %v2354_v44, %v799_v22  ;;  %v478_v28 = vld [vmem:[%s1998_s29 + $0x808] sm:$0xff]  ;;  %v515_v26 = vld [vmem:[%s1998_s29 + $0x930] sm:$0xff] }
 0x133   : > { %v466_v22 = vld [vmem:[%s1998_s29 + $0x7a8] sm:$0xff] }
 0x134   : > { %1182 = vmatpush.xpose.msra.mxu0 %v489_v3  ;;  %1228 = vmatpush.xpose.msra.mxu2 %v581_v4  ;;  %v855_v15 = vadd.f32 %v2360_v51, %v832_v41  ;;  %v540_v51 = vld [vmem:[%s1998_s29 + $0x9f8] sm:$0xff]  ;;  %v989_v4 = vpop.f32.mrf.mxu3 }
 0x135   : > { %1205 = vmatpush.xpose.msra.mxu1 %v490_v29  ;;  %1251 = vmatpush.xpose.msra.mxu3 %v582_v38  ;;  %v516_v3 = vld [vmem:[%s1998_s29 + $0x938] sm:$0xff]  ;;  %v417_v29 = vld [vmem:[%s1998_s29 + $0x620] sm:$0xff] }
 0x136   : > { %v878_v25 = vadd.f32 %v877_v21, %v855_v15  ;;  %v509_v38 = vld [vmem:[%s1998_s29 + $0x900] sm:$0xff]  ;;  %v604_v41 = vld [vmem:[%s1998_s29 + $0xbf8] sm:$0xff]  ;;  %v591_v21 = vld [vmem:[%s1998_s29 + $0xb90] sm:$0xff] }
 0x137   : > { %v596_v15 = vld [vmem:[%s1998_s29 + $0xbb8] sm:$0xff] }
 0x138   : > { %1183 = vmatpush.xpose.msra.mxu0 %v483_v6  ;;  %1229 = vmatpush.xpose.msra.mxu2 %v575_v7  ;;  %v901_v35 = vadd.f32 %v900_v31, %v878_v25  ;;  %v601_v6 = vld [vmem:[%s1998_s29 + $0xbe0] sm:$0xff]  ;;  %v603_v7 = vld [vmem:[%s1998_s29 + $0xbf0] sm:$0xff]  ;;  %v592_v25 = vld [vmem:[%s1998_s29 + $0xb98] sm:$0xff] }
 0x139   : > { %1206 = vmatpush.xpose.msra.mxu1 %v484_v8  ;;  %1252 = vmatpush.xpose.msra.mxu3 %v576_v9  ;;  %v418_v8 = vld [vmem:[%s1998_s29 + $0x628] sm:$0xff]  ;;  %v585_v31 = vld [vmem:[%s1998_s29 + $0xb60] sm:$0xff] }
 0x13a   : > { %v924_v44 = vadd.f32 %v923_v40, %v901_v35  ;;  %v510_v9 = vld [vmem:[%s1998_s29 + $0x908] sm:$0xff]  ;;  %v577_v40 = vld [vmem:[%s1998_s29 + $0xb20] sm:$0xff] }
 0x13b   : > { %v586_v35 = vld [vmem:[%s1998_s29 + $0xb68] sm:$0xff] }
 0x13c   : > { %1184 = vmatpush.xpose.msra.mxu0 %v477_v37  ;;  %1230 = vmatpush.xpose.msra.mxu2 %v569_v24  ;;  %v947_v48 = vadd.f32 %v946_v45, %v924_v44  ;;  %v967_v37 = vadd.f32 %v966_v2, %v800_v5  ;;  %v602_v24 = vld [vmem:[%s1998_s29 + $0xbe8] sm:$0xff]  ;;  %v2490_v44 = vld [vmem:[%s2876_s0 + $0x38] sm:$0xff]  ;;  %v547_v2 = vld [vmem:[%s1998_s29 + $0xa30] sm:$0xff] }
 0x13d   : > { %1207 = vmatpush.xpose.msra.mxu1 %v478_v28  ;;  %1253 = vmatpush.xpose.msra.mxu3 %v570_v11  ;;  %v595_v28 = vld [vmem:[%s1998_s29 + $0xbb0] sm:$0xff]  ;;  %v597_v11 = vld [vmem:[%s1998_s29 + $0xbc0] sm:$0xff]  ;;  %v578_v45 = vld [vmem:[%s1998_s29 + $0xb28] sm:$0xff] }
 0x13e   : > { %1645 = vst [vmem:[%s2381_s24 + $0x30] sm:$0xff] %v947_v48  ;;  %v571_v48 = vld [vmem:[%s1998_s29 + $0xaf0] sm:$0xff] }
 0x140   : > { %1185 = vmatpush.xpose.msra.mxu0 %v471_v12  ;;  %1231 = vmatpush.xpose.msra.mxu2 %v563_v14  ;;  %v2450_v12 = vpop.f32.mrf.mxu2  ;;  %v990_v14 = vadd.f32 %v989_v4, %v967_v37 }
 0x141   : > { %1208 = vmatpush.xpose.msra.mxu1 %v472_v16  ;;  %1254 = vmatpush.xpose.msra.mxu3 %v564_v17  ;;  %v598_v16 = vld [vmem:[%s1998_s29 + $0xbc8] sm:$0xff]  ;;  %v2458_v17 = vld [vmem:[%s2876_s0] sm:$0xff] }
 0x144   : > { %1186 = vmatpush.xpose.msra.mxu0 %v465_v19  ;;  %1232 = vmatpush.xpose.msra.mxu2 %v557_v20  ;;  %v2461_v19 = vpop.f32.mrf.mxu3  ;;  %v589_v20 = vld [vmem:[%s1998_s29 + $0xb80] sm:$0xff] }
 0x145   : > { %1209 = vmatpush.xpose.msra.mxu1 %v466_v22  ;;  %1255 = vmatpush.xpose.msra.mxu3 %v558_v23  ;;  %v590_v23 = vld [vmem:[%s1998_s29 + $0xb88] sm:$0xff] }
 0x148   : > { %1187 = vmatpush.xpose.msra.mxu0 %v459_v27  ;;  %1233 = vmatpush.xpose.msra.mxu2 %v551_v30  ;;  %v583_v30 = vld [vmem:[%s1998_s29 + $0xb50] sm:$0xff] }
 0x149   : > { %1210 = vmatpush.xpose.msra.mxu1 %v460_v32  ;;  %1256 = vmatpush.xpose.msra.mxu3 %v552_v33  ;;  %v584_v33 = vld [vmem:[%s1998_s29 + $0xb58] sm:$0xff] }
 0x14c   : > { %1188 = vmatpush.xpose.msra.mxu0 %v453_v36  ;;  %1234 = vmatpush.xpose.msra.mxu2 %v545_v39  ;;  %v2481_v36 = vld [vmem:[%s2876_s0 + $0x30] sm:$0xff] }
 0x14d   : > { %1211 = vmatpush.xpose.msra.mxu1 %v454_v42  ;;  %1257 = vmatpush.xpose.msra.mxu3 %v546_v43  ;;  %v579_v42 = vld [vmem:[%s1998_s29 + $0xb30] sm:$0xff] }
 0x150   : > { %1189 = vmatpush.xpose.msra.mxu0 %v447_v46  ;;  %1235 = vmatpush.xpose.msra.mxu2 %v539_v47  ;;  %v580_v46 = vld [vmem:[%s1998_s29 + $0xb38] sm:$0xff] }
 0x151   : > { %1212 = vmatpush.xpose.msra.mxu1 %v448_v49  ;;  %1258 = vmatpush.xpose.msra.mxu3 %v540_v51  ;;  %v573_v49 = vld [vmem:[%s1998_s29 + $0xb00] sm:$0xff]  ;;  %v574_v51 = vld [vmem:[%s1998_s29 + $0xb08] sm:$0xff] }
 0x154   : > { %1190 = vmatpush.xpose.msra.mxu0 %v441_v52  ;;  %1236 = vmatpush.xpose.msra.mxu2 %v533_v54  ;;  %v565_v52 = vld [vmem:[%s1998_s29 + $0xac0] sm:$0xff]  ;;  %v567_v54 = vld [vmem:[%s1998_s29 + $0xad0] sm:$0xff] }
 0x155   : > { %1213 = vmatpush.xpose.msra.mxu1 %v442_v55  ;;  %1259 = vmatpush.xpose.msra.mxu3 %v534_v56  ;;  %v566_v55 = vld [vmem:[%s1998_s29 + $0xac8] sm:$0xff]  ;;  %v568_v56 = vld [vmem:[%s1998_s29 + $0xad8] sm:$0xff] }
 0x158   : > { %1191 = vmatpush.xpose.msra.mxu0 %v435_v57  ;;  %1237 = vmatpush.xpose.msra.mxu2 %v527_v58  ;;  %v559_v57 = vld [vmem:[%s1998_s29 + $0xa90] sm:$0xff]  ;;  %v561_v58 = vld [vmem:[%s1998_s29 + $0xaa0] sm:$0xff] }
 0x159   : > { %1214 = vmatpush.xpose.msra.mxu1 %v436_v59  ;;  %1260 = vmatpush.xpose.msra.mxu3 %v528_v60  ;;  %v970_v59 = vadd.f32 %v2450_v12, %v800_v5  ;;  %v560_v60 = vld [vmem:[%s1998_s29 + $0xa98] sm:$0xff]  ;;  %v535_v12 = vld [vmem:[%s1998_s29 + $0x9d0] sm:$0xff] }
 0x15a   : > { %v548_v5 = vld [vmem:[%s1998_s29 + $0xa38] sm:$0xff] }
 0x15c   : > { %1192 = vmatpush.xpose.msra.mxu0 %v429_v61  ;;  %1238 = vmatpush.xpose.msra.mxu2 %v521_v62  ;;  %v562_v61 = vld [vmem:[%s1998_s29 + $0xaa8] sm:$0xff]  ;;  %v553_v62 = vld [vmem:[%s1998_s29 + $0xa60] sm:$0xff] }
 0x15d   : > { %1215 = vmatpush.xpose.msra.mxu1 %v430_v63  ;;  %1261 = vmatpush.xpose.msra.mxu3 %v522_v0  ;;  %v555_v63 = vld [vmem:[%s1998_s29 + $0xa70] sm:$0xff]  ;;  %v993_v0 = vadd.f32 %v2461_v19, %v970_v59  ;;  %v529_v19 = vld [vmem:[%s1998_s29 + $0x9a0] sm:$0xff]  ;;  %v686_v59 = vld [vmem:[%s1998_s29 + $0xe88] sm:$0xff] }
 0x160   : > { %1193 = vmatpush.xpose.msra.mxu0 %v423_v1  ;;  %1239 = vmatpush.xpose.msra.mxu2 %v515_v26  ;;  %v554_v1 = vld [vmem:[%s1998_s29 + $0xa68] sm:$0xff]  ;;  %v556_v26 = vld [vmem:[%s1998_s29 + $0xa78] sm:$0xff] }
 0x161   : > { %1216 = vmatpush.xpose.msra.mxu1 %v424_v34  ;;  %1262 = vmatpush.xpose.msra.mxu3 %v516_v3  ;;  %v549_v34 = vld [vmem:[%s1998_s29 + $0xa40] sm:$0xff] }
 0x164   : > { %1194 = vmatpush.xpose.msra.mxu0 %v417_v29  ;;  %1240 = vmatpush.xpose.msra.mxu2 %v509_v38  ;;  %v1012_v22 = vpop.f32.mrf.mxu0  ;;  %v550_v29 = vld [vmem:[%s1998_s29 + $0xa48] sm:$0xff] }
 0x165   : > { %1217 = vmatpush.xpose.msra.mxu1 %v418_v8  ;;  %1263 = vmatpush.xpose.msra.mxu3 %v510_v9  ;;  %v1013_v27 = vadd.f32 %v1012_v22, %v990_v14  ;;  %v543_v8 = vld [vmem:[%s1998_s29 + $0xa10] sm:$0xff]  ;;  %v537_v14 = vld [vmem:[%s1998_s29 + $0x9e0] sm:$0xff]  ;;  %v532_v22 = vld [vmem:[%s1998_s29 + $0x9b8] sm:$0xff] }
 0x167   : > { %1195 = vmatmul.f32.vlgmr.msra.gmra.mxu0 %v2175_v10  ;;  %1241 = vmatmul.f32.vlgmr.msra.gmra.mxu2 %v2458_v17  ;;  %v2469_v10 = vld [vmem:[%s2876_s0 + $0x8] sm:$0xff] }
 0x168   : > { %1271 = vmatpush.xpose.msrb.mxu0 %v601_v6  ;;  %1317 = vmatpush.xpose.msrb.mxu2 %v603_v7  ;;  %v541_v7 = vld [vmem:[%s1998_s29 + $0xa00] sm:$0xff] }
 0x169   : > { %1294 = vmatpush.xpose.msrb.mxu1 %v602_v24  ;;  %1340 = vmatpush.xpose.msrb.mxu3 %v604_v41  ;;  %v542_v24 = vld [vmem:[%s1998_s29 + $0xa08] sm:$0xff]  ;;  %v544_v41 = vld [vmem:[%s1998_s29 + $0xa18] sm:$0xff] }
 0x16a   : > { %1218 = vmatmul.f32.vlgmr.msra.gmra.mxu1 %v2182_v13  ;;  %1264 = vmatmul.f32.vlgmr.msra.gmra.mxu3 %v2469_v10  ;;  %v1035_v13 = vpop.f32.mrf.mxu1  ;;  %v1058_v39 = vpop.f32.mrf.mxu2 }
 0x16b   : > { %v1036_v32 = vadd.f32 %v1035_v13, %v1013_v27  ;;  %v524_v27 = vld [vmem:[%s1998_s29 + $0x978] sm:$0xff]  ;;  %v526_v13 = vld [vmem:[%s1998_s29 + $0x988] sm:$0xff] }
 0x16c   : > { %1272 = vmatpush.xpose.msrb.mxu0 %v595_v28  ;;  %1318 = vmatpush.xpose.msrb.mxu2 %v597_v11  ;;  %v1015_v3 = vpop.f32.mrf.mxu0 }
 0x16d   : > { %1295 = vmatpush.xpose.msrb.mxu1 %v596_v15  ;;  %1341 = vmatpush.xpose.msrb.mxu3 %v598_v16  ;;  %v1059_v43 = vadd.f32 %v1058_v39, %v1036_v32  ;;  %v1016_v4 = vadd.f32 %v1015_v3, %v993_v0  ;;  %v536_v15 = vld [vmem:[%s1998_s29 + $0x9d8] sm:$0xff]  ;;  %v538_v16 = vld [vmem:[%s1998_s29 + $0x9e8] sm:$0xff]  ;;  %v513_v39 = vld [vmem:[%s1998_s29 + $0x920] sm:$0xff] }
 0x16e   : > { %v518_v32 = vld [vmem:[%s1998_s29 + $0x948] sm:$0xff]  ;;  %v2589_v0 = vld [vmem:[%s2876_s0 + $0x50] sm:$0xff] }
 0x16f   : > { %1244 = vmatmul.f32.gmra.mxu2 %v2481_v36  ;;  %1198 = vmatmul.f32.gmra.mxu0 %v2232_v50  ;;  %v1081_v50 = vpop.f32.mrf.mxu3  ;;  %v2609_v3 = vld [vmem:[%s2876_s0 + $0x48] sm:$0xff] }
 0x170   : > { %1273 = vmatpush.xpose.msrb.mxu0 %v589_v20  ;;  %1319 = vmatpush.xpose.msrb.mxu2 %v591_v21  ;;  %v1082_v47 = vadd.f32 %v1081_v50, %v1059_v43  ;;  %v531_v20 = vld [vmem:[%s1998_s29 + $0x9b0] sm:$0xff]  ;;  %v530_v21 = vld [vmem:[%s1998_s29 + $0x9a8] sm:$0xff]  ;;  %v512_v43 = vld [vmem:[%s1998_s29 + $0x918] sm:$0xff] }
 0x171   : > { %1296 = vmatpush.xpose.msrb.mxu1 %v590_v23  ;;  %1342 = vmatpush.xpose.msrb.mxu3 %v592_v25  ;;  %v523_v23 = vld [vmem:[%s1998_s29 + $0x970] sm:$0xff]  ;;  %v525_v25 = vld [vmem:[%s1998_s29 + $0x980] sm:$0xff]  ;;  %v514_v50 = vld [vmem:[%s1998_s29 + $0x928] sm:$0xff] }
 0x172   : > { %1267 = vmatmul.f32.gmra.mxu3 %v2490_v44  ;;  %1221 = vmatmul.f32.gmra.mxu1 %v2241_v53  ;;  %1640 = vst [vmem:[%s2381_s24 + $0x8] sm:$0xff] %v1082_v47  ;;  %v572_v53 = vld [vmem:[%s1998_s29 + $0xaf8] sm:$0xff]  ;;  %v1038_v38 = vpop.f32.mrf.mxu1  ;;  %v1061_v9 = vpop.f32.mrf.mxu2  ;;  %v689_v47 = vld [vmem:[%s1998_s29 + $0xea0] sm:$0xff] }
 0x173   : > { %v1039_v6 = vadd.f32 %v1038_v38, %v1016_v4  ;;  %v672_v4 = vld [vmem:[%s1998_s29 + $0xe18] sm:$0xff]  ;;  %v667_v38 = vld [vmem:[%s1998_s29 + $0xdf0] sm:$0xff] }
 0x174   : > { %1274 = vmatpush.xpose.msrb.mxu0 %v583_v30  ;;  %1320 = vmatpush.xpose.msrb.mxu2 %v585_v31  ;;  %v517_v30 = vld [vmem:[%s1998_s29 + $0x940] sm:$0xff]  ;;  %v519_v31 = vld [vmem:[%s1998_s29 + $0x950] sm:$0xff] }
 0x175   : > { %1297 = vmatpush.xpose.msrb.mxu1 %v584_v33  ;;  %1343 = vmatpush.xpose.msrb.mxu3 %v586_v35  ;;  %v1062_v37 = vadd.f32 %v1061_v9, %v1039_v6  ;;  %v520_v33 = vld [vmem:[%s1998_s29 + $0x958] sm:$0xff]  ;;  %v511_v35 = vld [vmem:[%s1998_s29 + $0x910] sm:$0xff]  ;;  %v666_v6 = vld [vmem:[%s1998_s29 + $0xde8] sm:$0xff] }
 0x176   : > { %v661_v9 = vld [vmem:[%s1998_s29 + $0xdc0] sm:$0xff] }
 0x177   : > { %v1084_v28 = vpop.f32.mrf.mxu3 }
 0x178   : > { %1275 = vmatpush.xpose.msrb.mxu0 %v577_v40  ;;  %1321 = vmatpush.xpose.msrb.mxu2 %v579_v42  ;;  %v1085_v11 = vadd.f32 %v1084_v28, %v1062_v37  ;;  %v695_v40 = vld [vmem:[%s1998_s29 + $0xed0] sm:$0xff]  ;;  %v697_v42 = vld [vmem:[%s1998_s29 + $0xee0] sm:$0xff]  ;;  %v660_v37 = vld [vmem:[%s1998_s29 + $0xdb8] sm:$0xff] }
 0x179   : > { %1298 = vmatpush.xpose.msrb.mxu1 %v578_v45  ;;  %1344 = vmatpush.xpose.msrb.mxu3 %v580_v46  ;;  %v696_v45 = vld [vmem:[%s1998_s29 + $0xed8] sm:$0xff]  ;;  %v698_v46 = vld [vmem:[%s1998_s29 + $0xee8] sm:$0xff]  ;;  %v655_v28 = vld [vmem:[%s1998_s29 + $0xd90] sm:$0xff] }
 0x17a   : > { %1646 = vst [vmem:[%s2381_s24 + $0x38] sm:$0xff] %v1085_v11  ;;  %v654_v11 = vld [vmem:[%s1998_s29 + $0xd88] sm:$0xff] }
 0x17c   : > { %1276 = vmatpush.xpose.msrb.mxu0 %v571_v48  ;;  %1322 = vmatpush.xpose.msrb.mxu2 %v573_v49  ;;  %v691_v48 = vld [vmem:[%s1998_s29 + $0xeb0] sm:$0xff]  ;;  %v690_v49 = vld [vmem:[%s1998_s29 + $0xea8] sm:$0xff] }
 0x17d   : > { %1299 = vmatpush.xpose.msrb.mxu1 %v572_v53  ;;  %1345 = vmatpush.xpose.msrb.mxu3 %v574_v51  ;;  %v692_v53 = vld [vmem:[%s1998_s29 + $0xeb8] sm:$0xff]  ;;  %v2557_v51 = vld [vmem:[%s2876_s0 + $0x20] sm:$0xff] }
 0x180   : > { %1277 = vmatpush.xpose.msrb.mxu0 %v565_v52  ;;  %1323 = vmatpush.xpose.msrb.mxu2 %v567_v54  ;;  %v2563_v52 = vld [vmem:[%s2876_s0 + $0x10] sm:$0xff] }
 0x181   : > { %1300 = vmatpush.xpose.msrb.mxu1 %v566_v55  ;;  %1346 = vmatpush.xpose.msrb.mxu3 %v568_v56  ;;  %v683_v54 = vld [vmem:[%s1998_s29 + $0xe70] sm:$0xff]  ;;  %v685_v55 = vld [vmem:[%s1998_s29 + $0xe80] sm:$0xff]  ;;  %v2571_v56 = vld [vmem:[%s2876_s0 + $0x28] sm:$0xff] }
 0x184   : > { %1278 = vmatpush.xpose.msrb.mxu0 %v559_v57  ;;  %1324 = vmatpush.xpose.msrb.mxu2 %v561_v58  ;;  %v2577_v57 = vld [vmem:[%s2876_s0 + $0x18] sm:$0xff] }
 0x185   : > { %1301 = vmatpush.xpose.msrb.mxu1 %v560_v60  ;;  %1347 = vmatpush.xpose.msrb.mxu3 %v562_v61  ;;  %v684_v58 = vld [vmem:[%s1998_s29 + $0xe78] sm:$0xff]  ;;  %v677_v60 = vld [vmem:[%s1998_s29 + $0xe40] sm:$0xff]  ;;  %v679_v61 = vld [vmem:[%s1998_s29 + $0xe50] sm:$0xff] }
 0x188   : > { %1279 = vmatpush.xpose.msrb.mxu0 %v553_v62  ;;  %1325 = vmatpush.xpose.msrb.mxu2 %v555_v63  ;;  %v678_v62 = vld [vmem:[%s1998_s29 + $0xe48] sm:$0xff]  ;;  %v680_v63 = vld [vmem:[%s1998_s29 + $0xe58] sm:$0xff] }
 0x189   : > { %1302 = vmatpush.xpose.msrb.mxu1 %v554_v1  ;;  %1348 = vmatpush.xpose.msrb.mxu3 %v556_v26  ;;  %v2595_v1 = vld [vmem:[%s2876_s0 + $0x40] sm:$0xff]  ;;  %v671_v26 = vld [vmem:[%s1998_s29 + $0xe10] sm:$0xff] }
 0x18c   : > { %1280 = vmatpush.xpose.msrb.mxu0 %v547_v2  ;;  %1326 = vmatpush.xpose.msrb.mxu2 %v549_v34  ;;  %v673_v2 = vld [vmem:[%s1998_s29 + $0xe20] sm:$0xff]  ;;  %v2603_v34 = vld [vmem:[%s2876_s0 + $0x58] sm:$0xff] }
 0x18d   : > { %1303 = vmatpush.xpose.msrb.mxu1 %v548_v5  ;;  %1349 = vmatpush.xpose.msrb.mxu3 %v550_v29  ;;  %v674_v5 = vld [vmem:[%s1998_s29 + $0xe28] sm:$0xff]  ;;  %v665_v29 = vld [vmem:[%s1998_s29 + $0xde0] sm:$0xff] }
 0x190   : > { %1281 = vmatpush.xpose.msrb.mxu0 %v541_v7  ;;  %1327 = vmatpush.xpose.msrb.mxu2 %v543_v8  ;;  %v668_v7 = vld [vmem:[%s1998_s29 + $0xdf8] sm:$0xff]  ;;  %v659_v8 = vld [vmem:[%s1998_s29 + $0xdb0] sm:$0xff] }
 0x191   : > { %1304 = vmatpush.xpose.msrb.mxu1 %v542_v24  ;;  %1350 = vmatpush.xpose.msrb.mxu3 %v544_v41  ;;  %v662_v24 = vld [vmem:[%s1998_s29 + $0xdc8] sm:$0xff]  ;;  %v653_v41 = vld [vmem:[%s1998_s29 + $0xd80] sm:$0xff] }
 0x194   : > { %1282 = vmatpush.xpose.msrb.mxu0 %v535_v12  ;;  %1328 = vmatpush.xpose.msrb.mxu2 %v537_v14  ;;  %v656_v12 = vld [vmem:[%s1998_s29 + $0xd98] sm:$0xff]  ;;  %v647_v14 = vld [vmem:[%s1998_s29 + $0xd50] sm:$0xff] }
 0x195   : > { %1305 = vmatpush.xpose.msrb.mxu1 %v536_v15  ;;  %1351 = vmatpush.xpose.msrb.mxu3 %v538_v16  ;;  %v649_v15 = vld [vmem:[%s1998_s29 + $0xd60] sm:$0xff]  ;;  %v648_v16 = vld [vmem:[%s1998_s29 + $0xd58] sm:$0xff] }
 0x198   : > { %1283 = vmatpush.xpose.msrb.mxu0 %v529_v19  ;;  %1329 = vmatpush.xpose.msrb.mxu2 %v531_v20  ;;  %v650_v19 = vld [vmem:[%s1998_s29 + $0xd68] sm:$0xff]  ;;  %v641_v20 = vld [vmem:[%s1998_s29 + $0xd20] sm:$0xff] }
 0x199   : > { %1306 = vmatpush.xpose.msrb.mxu1 %v530_v21  ;;  %1352 = vmatpush.xpose.msrb.mxu3 %v532_v22  ;;  %v643_v21 = vld [vmem:[%s1998_s29 + $0xd30] sm:$0xff]  ;;  %v642_v22 = vld [vmem:[%s1998_s29 + $0xd28] sm:$0xff] }
 0x19c   : > { %1284 = vmatpush.xpose.msrb.mxu0 %v523_v23  ;;  %1330 = vmatpush.xpose.msrb.mxu2 %v525_v25  ;;  %v644_v23 = vld [vmem:[%s1998_s29 + $0xd38] sm:$0xff]  ;;  %v635_v25 = vld [vmem:[%s1998_s29 + $0xcf0] sm:$0xff] }
 0x19d   : > { %1307 = vmatpush.xpose.msrb.mxu1 %v524_v27  ;;  %1353 = vmatpush.xpose.msrb.mxu3 %v526_v13  ;;  %v637_v27 = vld [vmem:[%s1998_s29 + $0xd00] sm:$0xff]  ;;  %v636_v13 = vld [vmem:[%s1998_s29 + $0xcf8] sm:$0xff] }
 0x1a0   : > { %1285 = vmatpush.xpose.msrb.mxu0 %v517_v30  ;;  %1331 = vmatpush.xpose.msrb.mxu2 %v519_v31  ;;  %v638_v30 = vld [vmem:[%s1998_s29 + $0xd08] sm:$0xff]  ;;  %v629_v31 = vld [vmem:[%s1998_s29 + $0xcc0] sm:$0xff] }
 0x1a1   : > { %1308 = vmatpush.xpose.msrb.mxu1 %v518_v32  ;;  %1354 = vmatpush.xpose.msrb.mxu3 %v520_v33  ;;  %v631_v32 = vld [vmem:[%s1998_s29 + $0xcd0] sm:$0xff]  ;;  %v630_v33 = vld [vmem:[%s1998_s29 + $0xcc8] sm:$0xff] }
 0x1a4   : > { %1286 = vmatpush.xpose.msrb.mxu0 %v511_v35  ;;  %1332 = vmatpush.xpose.msrb.mxu2 %v513_v39  ;;  %v632_v35 = vld [vmem:[%s1998_s29 + $0xcd8] sm:$0xff]  ;;  %v623_v39 = vld [vmem:[%s1998_s29 + $0xc90] sm:$0xff] }
 0x1a5   : > { %1309 = vmatpush.xpose.msrb.mxu1 %v512_v43  ;;  %1355 = vmatpush.xpose.msrb.mxu3 %v514_v50  ;;  %v626_v43 = vld [vmem:[%s1998_s29 + $0xca8] sm:$0xff]  ;;  %v1104_v50 = vpop.f32.mrf.mxu0 }
 0x1a7   : > { %1333 = vmatmul.f32.vlgmr.msrb.gmra.mxu2 %v2557_v51  ;;  %1287 = vmatmul.f32.vlgmr.msrb.gmra.mxu0 %v2563_v52 }
 0x1a8   : > { %1363 = vmatpush.xpose.msra.mxu0 %v695_v40  ;;  %1409 = vmatpush.xpose.msra.mxu2 %v697_v42  ;;  %v625_v40 = vld [vmem:[%s1998_s29 + $0xca0] sm:$0xff]  ;;  %v624_v42 = vld [vmem:[%s1998_s29 + $0xc98] sm:$0xff] }
 0x1a9   : > { %1386 = vmatpush.xpose.msra.mxu1 %v696_v45  ;;  %1432 = vmatpush.xpose.msra.mxu3 %v698_v46  ;;  %v801_v45 = vperm.slane %v2337_v18, 2  ;;  %v617_v46 = vld [vmem:[%s1998_s29 + $0xc60] sm:$0xff]  ;;  %v664_v18 = vld [vmem:[%s1998_s29 + $0xdd8] sm:$0xff] }
 0x1aa   : > { %1356 = vmatmul.f32.vlgmr.msrb.gmra.mxu3 %v2571_v56  ;;  %1310 = vmatmul.f32.vlgmr.msrb.gmra.mxu1 %v2577_v57 }
 0x1ac   : > { %1364 = vmatpush.xpose.msra.mxu0 %v689_v47  ;;  %1410 = vmatpush.xpose.msra.mxu2 %v691_v48  ;;  %v619_v47 = vld [vmem:[%s1998_s29 + $0xc70] sm:$0xff]  ;;  %v1127_v48 = vpop.f32.mrf.mxu1 }
 0x1ad   : > { %1387 = vmatpush.xpose.msra.mxu1 %v690_v49  ;;  %1433 = vmatpush.xpose.msra.mxu3 %v692_v53  ;;  %v618_v49 = vld [vmem:[%s1998_s29 + $0xc68] sm:$0xff]  ;;  %v620_v53 = vld [vmem:[%s1998_s29 + $0xc78] sm:$0xff] }
 0x1af   : > { %1336 = vmatmul.f32.gmra.mxu2 %v2589_v0  ;;  %1290 = vmatmul.f32.gmra.mxu0 %v2595_v1 }
 0x1b0   : > { %1365 = vmatpush.xpose.msra.mxu0 %v683_v54  ;;  %1411 = vmatpush.xpose.msra.mxu2 %v685_v55  ;;  %v1105_v54 = vadd.f32 %v1104_v50, %v801_v45  ;;  %v611_v55 = vld [vmem:[%s1998_s29 + $0xc30] sm:$0xff]  ;;  %v762_v50 = vld [vmem:[%s1998_s29 + $0x10e8] sm:$0xff] }
 0x1b1   : > { %1388 = vmatpush.xpose.msra.mxu1 %v684_v58  ;;  %1434 = vmatpush.xpose.msra.mxu3 %v686_v59  ;;  %v613_v58 = vld [vmem:[%s1998_s29 + $0xc40] sm:$0xff]  ;;  %v612_v59 = vld [vmem:[%s1998_s29 + $0xc38] sm:$0xff] }
 0x1b2   : > { %1359 = vmatmul.f32.gmra.mxu3 %v2603_v34  ;;  %1313 = vmatmul.f32.gmra.mxu1 %v2609_v3 }
 0x1b4   : > { %1366 = vmatpush.xpose.msra.mxu0 %v677_v60  ;;  %1412 = vmatpush.xpose.msra.mxu2 %v679_v61  ;;  %v614_v60 = vld [vmem:[%s1998_s29 + $0xc48] sm:$0xff]  ;;  %v1128_v61 = vadd.f32 %v1127_v48, %v1105_v54 }
 0x1b5   : > { %1389 = vmatpush.xpose.msra.mxu1 %v678_v62  ;;  %1435 = vmatpush.xpose.msra.mxu3 %v680_v63  ;;  %v605_v62 = vld [vmem:[%s1998_s29 + $0xc00] sm:$0xff]  ;;  %v607_v63 = vld [vmem:[%s1998_s29 + $0xc10] sm:$0xff] }
 0x1b8   : > { %1367 = vmatpush.xpose.msra.mxu0 %v671_v26  ;;  %1413 = vmatpush.xpose.msra.mxu2 %v673_v2  ;;  %v2659_v26 = vpop.f32.mrf.mxu0  ;;  %v1150_v2 = vpop.f32.mrf.mxu2 }
 0x1b9   : > { %1390 = vmatpush.xpose.msra.mxu1 %v672_v4  ;;  %1436 = vmatpush.xpose.msra.mxu3 %v674_v5  ;;  %v699_v4 = vld [vmem:[%s1998_s29 + $0xef0] sm:$0xff] }
 0x1ba   : > { %v791_v5 = vld [vmem:[%s1998_s29 + $0x11d0] sm:$0xff] }
 0x1bc   : > { %1368 = vmatpush.xpose.msra.mxu0 %v665_v29  ;;  %1414 = vmatpush.xpose.msra.mxu2 %v667_v38  ;;  %v606_v29 = vld [vmem:[%s1998_s29 + $0xc08] sm:$0xff]  ;;  %v608_v38 = vld [vmem:[%s1998_s29 + $0xc18] sm:$0xff] }
 0x1bd   : > { %1391 = vmatpush.xpose.msra.mxu1 %v666_v6  ;;  %1437 = vmatpush.xpose.msra.mxu3 %v668_v7  ;;  %v2665_v6 = vpop.f32.mrf.mxu1  ;;  %v700_v7 = vld [vmem:[%s1998_s29 + $0xef8] sm:$0xff] }
 0x1c0   : > { %1369 = vmatpush.xpose.msra.mxu0 %v659_v8  ;;  %1415 = vmatpush.xpose.msra.mxu2 %v661_v9  ;;  %v792_v8 = vld [vmem:[%s1998_s29 + $0x11d8] sm:$0xff]  ;;  %v1151_v9 = vadd.f32 %v1150_v2, %v1128_v61  ;;  %v1153_v54 = vpop.f32.mrf.mxu2  ;;  %v743_v61 = vld [vmem:[%s1998_s29 + $0x1050] sm:$0xff] }
 0x1c1   : > { %1392 = vmatpush.xpose.msra.mxu1 %v660_v37  ;;  %1438 = vmatpush.xpose.msra.mxu3 %v662_v24  ;;  %v1173_v37 = vpop.f32.mrf.mxu3  ;;  %v693_v24 = vld [vmem:[%s1998_s29 + $0xec0] sm:$0xff]  ;;  %v744_v2 = vld [vmem:[%s1998_s29 + $0x1058] sm:$0xff] }
 0x1c4   : > { %1370 = vmatpush.xpose.msra.mxu0 %v653_v41  ;;  %1416 = vmatpush.xpose.msra.mxu2 %v655_v28  ;;  %v785_v41 = vld [vmem:[%s1998_s29 + $0x11a0] sm:$0xff]  ;;  %v694_v28 = vld [vmem:[%s1998_s29 + $0xec8] sm:$0xff] }
 0x1c5   : > { %1393 = vmatpush.xpose.msra.mxu1 %v654_v11  ;;  %1439 = vmatpush.xpose.msra.mxu3 %v656_v12  ;;  %v786_v11 = vld [vmem:[%s1998_s29 + $0x11a8] sm:$0xff]  ;;  %v1174_v12 = vadd.f32 %v1173_v37, %v1151_v9  ;;  %v639_v37 = vld [vmem:[%s1998_s29 + $0xd10] sm:$0xff] }
 0x1c8   : > { %1371 = vmatpush.xpose.msra.mxu0 %v647_v14  ;;  %1417 = vmatpush.xpose.msra.mxu2 %v649_v15  ;;  %v687_v14 = vld [vmem:[%s1998_s29 + $0xe90] sm:$0xff] }
 0x1c9   : > { %1394 = vmatpush.xpose.msra.mxu1 %v648_v16  ;;  %1440 = vmatpush.xpose.msra.mxu3 %v650_v19  ;;  %v779_v15 = vld [vmem:[%s1998_s29 + $0x1170] sm:$0xff]  ;;  %v688_v19 = vld [vmem:[%s1998_s29 + $0xe98] sm:$0xff] }
 0x1cc   : > { %1372 = vmatpush.xpose.msra.mxu0 %v641_v20  ;;  %1418 = vmatpush.xpose.msra.mxu2 %v643_v21  ;;  %v780_v20 = vld [vmem:[%s1998_s29 + $0x1178] sm:$0xff] }
 0x1cd   : > { %1395 = vmatpush.xpose.msra.mxu1 %v642_v22  ;;  %1441 = vmatpush.xpose.msra.mxu3 %v644_v23  ;;  %v681_v23 = vld [vmem:[%s1998_s29 + $0xe60] sm:$0xff] }
 0x1d0   : > { %1373 = vmatpush.xpose.msra.mxu0 %v635_v25  ;;  %1419 = vmatpush.xpose.msra.mxu2 %v637_v27  ;;  %v773_v25 = vld [vmem:[%s1998_s29 + $0x1140] sm:$0xff] }
 0x1d1   : > { %1396 = vmatpush.xpose.msra.mxu1 %v636_v13  ;;  %1442 = vmatpush.xpose.msra.mxu3 %v638_v30  ;;  %v682_v13 = vld [vmem:[%s1998_s29 + $0xe68] sm:$0xff] }
 0x1d2   : > { %v774_v30 = vld [vmem:[%s1998_s29 + $0x1148] sm:$0xff] }
 0x1d4   : > { %1374 = vmatpush.xpose.msra.mxu0 %v629_v31  ;;  %1420 = vmatpush.xpose.msra.mxu2 %v631_v32  ;;  %v675_v31 = vld [vmem:[%s1998_s29 + $0xe30] sm:$0xff] }
 0x1d5   : > { %1397 = vmatpush.xpose.msra.mxu1 %v630_v33  ;;  %1443 = vmatpush.xpose.msra.mxu3 %v632_v35  ;;  %v767_v32 = vld [vmem:[%s1998_s29 + $0x1110] sm:$0xff]  ;;  %v676_v33 = vld [vmem:[%s1998_s29 + $0xe38] sm:$0xff] }
 0x1d6   : > { %v768_v35 = vld [vmem:[%s1998_s29 + $0x1118] sm:$0xff] }
 0x1d8   : > { %1375 = vmatpush.xpose.msra.mxu0 %v623_v39  ;;  %1421 = vmatpush.xpose.msra.mxu2 %v625_v40  ;;  %v669_v39 = vld [vmem:[%s1998_s29 + $0xe00] sm:$0xff] }
 0x1d9   : > { %1398 = vmatpush.xpose.msra.mxu1 %v624_v42  ;;  %1444 = vmatpush.xpose.msra.mxu3 %v626_v43  ;;  %v761_v40 = vld [vmem:[%s1998_s29 + $0x10e0] sm:$0xff]  ;;  %v1108_v42 = vadd.f32 %v2659_v26, %v801_v45  ;;  %v670_v43 = vld [vmem:[%s1998_s29 + $0xe08] sm:$0xff]  ;;  %v756_v45 = vld [vmem:[%s1998_s29 + $0x10b8] sm:$0xff] }
 0x1da   : > { %v652_v26 = vld [vmem:[%s1998_s29 + $0xd78] sm:$0xff] }
 0x1db   : > { %v1131_v48 = vadd.f32 %v2665_v6, %v1108_v42  ;;  %v646_v6 = vld [vmem:[%s1998_s29 + $0xd48] sm:$0xff]  ;;  %v609_v42 = vld [vmem:[%s1998_s29 + $0xc20] sm:$0xff] }
 0x1dc   : > { %1376 = vmatpush.xpose.msra.mxu0 %v617_v46  ;;  %1422 = vmatpush.xpose.msra.mxu2 %v619_v47  ;;  %v663_v46 = vld [vmem:[%s1998_s29 + $0xdd0] sm:$0xff] }
 0x1dd   : > { %1399 = vmatpush.xpose.msra.mxu1 %v618_v49  ;;  %1445 = vmatpush.xpose.msra.mxu3 %v620_v53  ;;  %v755_v47 = vld [vmem:[%s1998_s29 + $0x10b0] sm:$0xff]  ;;  %v657_v49 = vld [vmem:[%s1998_s29 + $0xda0] sm:$0xff] }
 0x1de   : > { %v749_v53 = vld [vmem:[%s1998_s29 + $0x1080] sm:$0xff] }
 0x1e0   : > { %1377 = vmatpush.xpose.msra.mxu0 %v611_v55  ;;  %1423 = vmatpush.xpose.msra.mxu2 %v613_v58  ;;  %v1154_v55 = vadd.f32 %v1153_v54, %v1131_v48  ;;  %v658_v58 = vld [vmem:[%s1998_s29 + $0xda8] sm:$0xff]  ;;  %v789_v54 = vld [vmem:[%s1998_s29 + $0x11c0] sm:$0xff] }
 0x1e1   : > { %1400 = vmatpush.xpose.msra.mxu1 %v612_v59  ;;  %1446 = vmatpush.xpose.msra.mxu3 %v614_v60  ;;  %v750_v59 = vld [vmem:[%s1998_s29 + $0x1088] sm:$0xff]  ;;  %v651_v60 = vld [vmem:[%s1998_s29 + $0xd70] sm:$0xff] }
 0x1e2   : > { %v702_v48 = vld [vmem:[%s1998_s29 + $0xf08] sm:$0xff] }
 0x1e4   : > { %1378 = vmatpush.xpose.msra.mxu0 %v605_v62  ;;  %1424 = vmatpush.xpose.msra.mxu2 %v607_v63  ;;  %v1196_v16 = vpop.f32.mrf.mxu0  ;;  %v1176_v62 = vpop.f32.mrf.mxu3 }
 0x1e5   : > { %1401 = vmatpush.xpose.msra.mxu1 %v606_v29  ;;  %1447 = vmatpush.xpose.msra.mxu3 %v608_v38  ;;  %v1197_v21 = vadd.f32 %v1196_v16, %v1174_v12  ;;  %v1177_v63 = vadd.f32 %v1176_v62, %v1154_v55  ;;  %v725_v12 = vld [vmem:[%s1998_s29 + $0xfc0] sm:$0xff]  ;;  %v627_v16 = vld [vmem:[%s1998_s29 + $0xcb0] sm:$0xff] }
 0x1e6   : > { %v781_v62 = vld [vmem:[%s1998_s29 + $0x1180] sm:$0xff] }
 0x1e7   : > { %1379 = vmatmul.f32.vlgmr.msra.gmra.mxu0 %v2458_v17  ;;  %1425 = vmatmul.f32.vlgmr.msra.gmra.mxu2 %v2563_v52  ;;  %v1219_v22 = vpop.f32.mrf.mxu1 }
 0x1e8   : > { %1455 = vmatpush.xpose.msrb.mxu0 %v699_v4  ;;  %1501 = vmatpush.xpose.msrb.mxu2 %v791_v5  ;;  %v1220_v27 = vadd.f32 %v1219_v22, %v1197_v21  ;;  %v645_v4 = vld [vmem:[%s1998_s29 + $0xd40] sm:$0xff]  ;;  %v720_v21 = vld [vmem:[%s1998_s29 + $0xf98] sm:$0xff] }
 0x1e9   : > { %1478 = vmatpush.xpose.msrb.mxu1 %v700_v7  ;;  %1524 = vmatpush.xpose.msrb.mxu3 %v792_v8  ;;  %v737_v5 = vld [vmem:[%s1998_s29 + $0x1020] sm:$0xff]  ;;  %v738_v7 = vld [vmem:[%s1998_s29 + $0x1028] sm:$0xff] }
 0x1ea   : > { %1402 = vmatmul.f32.vlgmr.msra.gmra.mxu1 %v2469_v10  ;;  %1448 = vmatmul.f32.vlgmr.msra.gmra.mxu3 %v2577_v57  ;;  %1641 = vst [vmem:[%s2381_s24 + $0x10] sm:$0xff] %v1220_v27  ;;  %v621_v22 = vld [vmem:[%s1998_s29 + $0xc80] sm:$0xff]  ;;  %v714_v27 = vld [vmem:[%s1998_s29 + $0xf68] sm:$0xff] }
 0x1ec   : > { %1456 = vmatpush.xpose.msrb.mxu0 %v693_v24  ;;  %1502 = vmatpush.xpose.msrb.mxu2 %v785_v41  ;;  %v1199_v29 = vpop.f32.mrf.mxu0  ;;  %v731_v24 = vld [vmem:[%s1998_s29 + $0xff0] sm:$0xff]  ;;  %v640_v41 = vld [vmem:[%s1998_s29 + $0xd18] sm:$0xff] }
 0x1ed   : > { %1479 = vmatpush.xpose.msrb.mxu1 %v694_v28  ;;  %1525 = vmatpush.xpose.msrb.mxu3 %v786_v11  ;;  %v1200_v38 = vadd.f32 %v1199_v29, %v1177_v63  ;;  %v732_v28 = vld [vmem:[%s1998_s29 + $0xff8] sm:$0xff]  ;;  %v633_v11 = vld [vmem:[%s1998_s29 + $0xce0] sm:$0xff]  ;;  %v783_v63 = vld [vmem:[%s1998_s29 + $0x1190] sm:$0xff] }
 0x1ee   : > { %v775_v29 = vld [vmem:[%s1998_s29 + $0x1150] sm:$0xff] }
 0x1ef   : > { %1382 = vmatmul.f32.gmra.mxu0 %v2481_v36  ;;  %1428 = vmatmul.f32.gmra.mxu2 %v2595_v1  ;;  %v1222_v8 = vpop.f32.mrf.mxu1 }
 0x1f0   : > { %1457 = vmatpush.xpose.msrb.mxu0 %v687_v14  ;;  %1503 = vmatpush.xpose.msrb.mxu2 %v779_v15  ;;  %v1223_v9 = vadd.f32 %v1222_v8, %v1200_v38  ;;  %v634_v14 = vld [vmem:[%s1998_s29 + $0xce8] sm:$0xff]  ;;  %v777_v38 = vld [vmem:[%s1998_s29 + $0x1160] sm:$0xff] }
 0x1f1   : > { %1480 = vmatpush.xpose.msrb.mxu1 %v688_v19  ;;  %1526 = vmatpush.xpose.msrb.mxu3 %v780_v20  ;;  %v726_v15 = vld [vmem:[%s1998_s29 + $0xfc8] sm:$0xff]  ;;  %v719_v19 = vld [vmem:[%s1998_s29 + $0xf90] sm:$0xff]  ;;  %v628_v20 = vld [vmem:[%s1998_s29 + $0xcb8] sm:$0xff] }
 0x1f2   : > { %1405 = vmatmul.f32.gmra.mxu1 %v2490_v44  ;;  %1451 = vmatmul.f32.gmra.mxu3 %v2609_v3  ;;  %1647 = vst [vmem:[%s2381_s24 + $0x40] sm:$0xff] %v1223_v9  ;;  %v769_v9 = vld [vmem:[%s1998_s29 + $0x1120] sm:$0xff] }
 0x1f4   : > { %1458 = vmatpush.xpose.msrb.mxu0 %v681_v23  ;;  %1504 = vmatpush.xpose.msrb.mxu2 %v773_v25  ;;  %v713_v23 = vld [vmem:[%s1998_s29 + $0xf60] sm:$0xff]  ;;  %v622_v25 = vld [vmem:[%s1998_s29 + $0xc88] sm:$0xff] }
 0x1f5   : > { %1481 = vmatpush.xpose.msrb.mxu1 %v682_v13  ;;  %1527 = vmatpush.xpose.msrb.mxu3 %v774_v30  ;;  %v615_v13 = vld [vmem:[%s1998_s29 + $0xc50] sm:$0xff] }
 0x1f6   : > { %v707_v30 = vld [vmem:[%s1998_s29 + $0xf30] sm:$0xff] }
 0x1f8   : > { %1459 = vmatpush.xpose.msrb.mxu0 %v675_v31  ;;  %1505 = vmatpush.xpose.msrb.mxu2 %v767_v32  ;;  %v1242_v31 = vpop.f32.mrf.mxu2  ;;  %v616_v32 = vld [vmem:[%s1998_s29 + $0xc58] sm:$0xff] }
 0x1f9   : > { %1482 = vmatpush.xpose.msrb.mxu1 %v676_v33  ;;  %1528 = vmatpush.xpose.msrb.mxu3 %v768_v35  ;;  %v708_v33 = vld [vmem:[%s1998_s29 + $0xf38] sm:$0xff]  ;;  %v1265_v35 = vpop.f32.mrf.mxu3 }
 0x1fc   : > { %1460 = vmatpush.xpose.msrb.mxu0 %v669_v39  ;;  %1506 = vmatpush.xpose.msrb.mxu2 %v761_v40  ;;  %v2740_v39 = vld [vmem:[%s2330_s7] sm:$0x3f] }
 0x1fd   : > { %1483 = vmatpush.xpose.msrb.mxu1 %v670_v43  ;;  %1529 = vmatpush.xpose.msrb.mxu3 %v762_v50  ;;  %v802_v40 = vperm.slane %v2740_v39, 3  ;;  %v701_v43 = vld [vmem:[%s1998_s29 + $0xf00] sm:$0xff] }
 0x1fe   : > { %v793_v50 = vld [vmem:[%s1998_s29 + $0x11e0] sm:$0xff] }
 0x200   : > { %1461 = vmatpush.xpose.msrb.mxu0 %v663_v46  ;;  %1507 = vmatpush.xpose.msrb.mxu2 %v755_v47  ;;  %v795_v46 = vld [vmem:[%s1998_s29 + $0x11f0] sm:$0xff]  ;;  %v610_v47 = vld [vmem:[%s1998_s29 + $0xc28] sm:$0xff]  ;;  %v2755_v55 = vpop.f32.mrf.mxu2 }
 0x201   : > { %1484 = vmatpush.xpose.msrb.mxu1 %v664_v18  ;;  %1530 = vmatpush.xpose.msrb.mxu3 %v756_v45  ;;  %v1243_v18 = vadd.f32 %v1242_v31, %v802_v40  ;;  %v794_v45 = vld [vmem:[%s1998_s29 + $0x11e8] sm:$0xff]  ;;  %v747_v31 = vld [vmem:[%s1998_s29 + $0x1070] sm:$0xff] }
 0x204   : > { %1462 = vmatpush.xpose.msrb.mxu0 %v657_v49  ;;  %1508 = vmatpush.xpose.msrb.mxu2 %v749_v53  ;;  %v796_v49 = vld [vmem:[%s1998_s29 + $0x11f8] sm:$0xff]  ;;  %v787_v53 = vld [vmem:[%s1998_s29 + $0x11b0] sm:$0xff] }
 0x205   : > { %1485 = vmatpush.xpose.msrb.mxu1 %v658_v58  ;;  %1531 = vmatpush.xpose.msrb.mxu3 %v750_v59  ;;  %v1266_v58 = vadd.f32 %v1265_v35, %v1243_v18  ;;  %v788_v59 = vld [vmem:[%s1998_s29 + $0x11b8] sm:$0xff] }
 0x206   : > { %v748_v35 = vld [vmem:[%s1998_s29 + $0x1078] sm:$0xff] }
 0x208   : > { %1463 = vmatpush.xpose.msrb.mxu0 %v651_v60  ;;  %1509 = vmatpush.xpose.msrb.mxu2 %v743_v61  ;;  %v790_v60 = vld [vmem:[%s1998_s29 + $0x11c8] sm:$0xff]  ;;  %v2761_v61 = vpop.f32.mrf.mxu3 }
 0x209   : > { %1486 = vmatpush.xpose.msrb.mxu1 %v652_v26  ;;  %1532 = vmatpush.xpose.msrb.mxu3 %v744_v2  ;;  %v782_v2 = vld [vmem:[%s1998_s29 + $0x1188] sm:$0xff] }
 0x20c   : > { %1464 = vmatpush.xpose.msrb.mxu0 %v645_v4  ;;  %1510 = vmatpush.xpose.msrb.mxu2 %v737_v5  ;;  %v784_v4 = vld [vmem:[%s1998_s29 + $0x1198] sm:$0xff] }
 0x20d   : > { %1487 = vmatpush.xpose.msrb.mxu1 %v646_v6  ;;  %1533 = vmatpush.xpose.msrb.mxu3 %v738_v7  ;;  %v776_v7 = vld [vmem:[%s1998_s29 + $0x1158] sm:$0xff] }
 0x210   : > { %1465 = vmatpush.xpose.msrb.mxu0 %v639_v37  ;;  %1511 = vmatpush.xpose.msrb.mxu2 %v731_v24  ;;  %v771_v37 = vld [vmem:[%s1998_s29 + $0x1130] sm:$0xff] }
 0x211   : > { %1488 = vmatpush.xpose.msrb.mxu1 %v640_v41  ;;  %1534 = vmatpush.xpose.msrb.mxu3 %v732_v28  ;;  %v772_v28 = vld [vmem:[%s1998_s29 + $0x1138] sm:$0xff] }
 0x214   : > { %1466 = vmatpush.xpose.msrb.mxu0 %v633_v11  ;;  %1512 = vmatpush.xpose.msrb.mxu2 %v725_v12  ;;  %v763_v12 = vld [vmem:[%s1998_s29 + $0x10f0] sm:$0xff] }
 0x215   : > { %1489 = vmatpush.xpose.msrb.mxu1 %v634_v14  ;;  %1535 = vmatpush.xpose.msrb.mxu3 %v726_v15  ;;  %v765_v14 = vld [vmem:[%s1998_s29 + $0x1100] sm:$0xff]  ;;  %v766_v15 = vld [vmem:[%s1998_s29 + $0x1108] sm:$0xff] }
 0x218   : > { %1467 = vmatpush.xpose.msrb.mxu0 %v627_v16  ;;  %1513 = vmatpush.xpose.msrb.mxu2 %v719_v19  ;;  %v757_v16 = vld [vmem:[%s1998_s29 + $0x10c0] sm:$0xff]  ;;  %v759_v19 = vld [vmem:[%s1998_s29 + $0x10d0] sm:$0xff] }
 0x219   : > { %1490 = vmatpush.xpose.msrb.mxu1 %v628_v20  ;;  %1536 = vmatpush.xpose.msrb.mxu3 %v720_v21  ;;  %v758_v20 = vld [vmem:[%s1998_s29 + $0x10c8] sm:$0xff]  ;;  %v760_v21 = vld [vmem:[%s1998_s29 + $0x10d8] sm:$0xff] }
 0x21c   : > { %1468 = vmatpush.xpose.msrb.mxu0 %v621_v22  ;;  %1514 = vmatpush.xpose.msrb.mxu2 %v713_v23  ;;  %v751_v22 = vld [vmem:[%s1998_s29 + $0x1090] sm:$0xff]  ;;  %v753_v23 = vld [vmem:[%s1998_s29 + $0x10a0] sm:$0xff] }
 0x21d   : > { %1491 = vmatpush.xpose.msrb.mxu1 %v622_v25  ;;  %1537 = vmatpush.xpose.msrb.mxu3 %v714_v27  ;;  %v1246_v25 = vadd.f32 %v2755_v55, %v802_v40  ;;  %v752_v27 = vld [vmem:[%s1998_s29 + $0x1098] sm:$0xff]  ;;  %v739_v40 = vld [vmem:[%s1998_s29 + $0x1030] sm:$0xff]  ;;  %v734_v55 = vld [vmem:[%s1998_s29 + $0x1008] sm:$0xff] }
 0x220   : > { %1469 = vmatpush.xpose.msrb.mxu0 %v615_v13  ;;  %1515 = vmatpush.xpose.msrb.mxu2 %v707_v30  ;;  %v754_v13 = vld [vmem:[%s1998_s29 + $0x10a8] sm:$0xff]  ;;  %v745_v30 = vld [vmem:[%s1998_s29 + $0x1060] sm:$0xff] }
 0x221   : > { %1492 = vmatpush.xpose.msrb.mxu1 %v616_v32  ;;  %1538 = vmatpush.xpose.msrb.mxu3 %v708_v33  ;;  %v1269_v32 = vadd.f32 %v2761_v61, %v1246_v25  ;;  %v746_v33 = vld [vmem:[%s1998_s29 + $0x1068] sm:$0xff]  ;;  %v727_v61 = vld [vmem:[%s1998_s29 + $0xfd0] sm:$0xff] }
 0x224   : > { %1470 = vmatpush.xpose.msrb.mxu0 %v609_v42  ;;  %1516 = vmatpush.xpose.msrb.mxu2 %v701_v43  ;;  %v1288_v26 = vpop.f32.mrf.mxu0  ;;  %v741_v42 = vld [vmem:[%s1998_s29 + $0x1040] sm:$0xff] }
 0x225   : > { %1493 = vmatpush.xpose.msrb.mxu1 %v610_v47  ;;  %1539 = vmatpush.xpose.msrb.mxu3 %v702_v48  ;;  %v740_v47 = vld [vmem:[%s1998_s29 + $0x1038] sm:$0xff]  ;;  %v742_v48 = vld [vmem:[%s1998_s29 + $0x1048] sm:$0xff] }
 0x227   : > { %1471 = vmatmul.f32.vlgmr.msrb.gmra.mxu0 %v2557_v51  ;;  %1517 = vmatmul.f32.vlgmr.msrb.gmra.mxu2 %v2458_v17  ;;  %v1289_v17 = vadd.f32 %v1288_v26, %v1266_v58  ;;  %v1311_v5 = vpop.f32.mrf.mxu1  ;;  %v736_v58 = vld [vmem:[%s1998_s29 + $0x1018] sm:$0xff]  ;;  %v730_v26 = vld [vmem:[%s1998_s29 + $0xfe8] sm:$0xff] }
 0x228   : > { %1547 = vmatpush.xpose.msra.mxu0 %v793_v50  ;;  %1593 = vmatpush.xpose.msra.mxu2 %v795_v46 }
 0x229   : > { %1570 = vmatpush.xpose.msra.mxu1 %v794_v45  ;;  %1616 = vmatpush.xpose.msra.mxu3 %v796_v49  ;;  %v1312_v6 = vadd.f32 %v1311_v5, %v1289_v17  ;;  %v733_v49 = vld [vmem:[%s1998_s29 + $0x1000] sm:$0xff]  ;;  %v722_v17 = vld [vmem:[%s1998_s29 + $0xfa8] sm:$0xff]  ;;  %v724_v5 = vld [vmem:[%s1998_s29 + $0xfb8] sm:$0xff] }
 0x22a   : > { %1494 = vmatmul.f32.vlgmr.msrb.gmra.mxu1 %v2571_v56  ;;  %1540 = vmatmul.f32.vlgmr.msrb.gmra.mxu3 %v2469_v10  ;;  %v778_v10 = vld [vmem:[%s1998_s29 + $0x1168] sm:$0xff]  ;;  %v1334_v8 = vpop.f32.mrf.mxu2 }
 0x22b   : > { %v1335_v24 = vadd.f32 %v1334_v8, %v1312_v6  ;;  %v716_v6 = vld [vmem:[%s1998_s29 + $0xf78] sm:$0xff]  ;;  %v711_v8 = vld [vmem:[%s1998_s29 + $0xf50] sm:$0xff] }
 0x22c   : > { %1548 = vmatpush.xpose.msra.mxu0 %v787_v53  ;;  %1594 = vmatpush.xpose.msra.mxu2 %v789_v54  ;;  %v1291_v43 = vpop.f32.mrf.mxu0  ;;  %v735_v53 = vld [vmem:[%s1998_s29 + $0x1010] sm:$0xff] }
 0x22d   : > { %1571 = vmatpush.xpose.msra.mxu1 %v788_v59  ;;  %1617 = vmatpush.xpose.msra.mxu3 %v790_v60  ;;  %v1357_v41 = vpop.f32.mrf.mxu3  ;;  %v1292_v46 = vadd.f32 %v1291_v43, %v1269_v32 }
 0x22e   : > { %v1358_v11 = vadd.f32 %v1357_v41, %v1335_v24  ;;  %v703_v24 = vld [vmem:[%s1998_s29 + $0xf10] sm:$0xff]  ;;  %v705_v41 = vld [vmem:[%s1998_s29 + $0xf20] sm:$0xff] }
 0x22f   : > { %1474 = vmatmul.f32.gmra.mxu0 %v2589_v0  ;;  %1520 = vmatmul.f32.gmra.mxu2 %v2481_v36  ;;  %v770_v36 = vld [vmem:[%s1998_s29 + $0x1128] sm:$0xff]  ;;  %v1314_v50 = vpop.f32.mrf.mxu1 }
 0x230   : > { %1549 = vmatpush.xpose.msra.mxu0 %v781_v62  ;;  %1595 = vmatpush.xpose.msra.mxu2 %v783_v63  ;;  %1642 = vst [vmem:[%s2381_s24 + $0x18] sm:$0xff] %v1358_v11  ;;  %v1315_v45 = vadd.f32 %v1314_v50, %v1292_v46  ;;  %v729_v62 = vld [vmem:[%s1998_s29 + $0xfe0] sm:$0xff]  ;;  %v728_v63 = vld [vmem:[%s1998_s29 + $0xfd8] sm:$0xff] }
 0x231   : > { %1572 = vmatpush.xpose.msra.mxu1 %v782_v2  ;;  %1618 = vmatpush.xpose.msra.mxu3 %v784_v4  ;;  %v721_v2 = vld [vmem:[%s1998_s29 + $0xfa0] sm:$0xff]  ;;  %v723_v4 = vld [vmem:[%s1998_s29 + $0xfb0] sm:$0xff] }
 0x232   : > { %1497 = vmatmul.f32.gmra.mxu1 %v2603_v34  ;;  %1543 = vmatmul.f32.gmra.mxu3 %v2490_v44  ;;  %v764_v44 = vld [vmem:[%s1998_s29 + $0x10f8] sm:$0xff]  ;;  %v1337_v18 = vpop.f32.mrf.mxu2 }
 0x233   : > { %v1338_v54 = vadd.f32 %v1337_v18, %v1315_v45 }
 0x234   : > { %1550 = vmatpush.xpose.msra.mxu0 %v775_v29  ;;  %1596 = vmatpush.xpose.msra.mxu2 %v777_v38  ;;  %v715_v29 = vld [vmem:[%s1998_s29 + $0xf70] sm:$0xff]  ;;  %v717_v38 = vld [vmem:[%s1998_s29 + $0xf80] sm:$0xff] }
 0x235   : > { %1573 = vmatpush.xpose.msra.mxu1 %v776_v7  ;;  %1619 = vmatpush.xpose.msra.mxu3 %v778_v10  ;;  %v1360_v59 = vpop.f32.mrf.mxu3  ;;  %v718_v7 = vld [vmem:[%s1998_s29 + $0xf88] sm:$0xff]  ;;  %v709_v10 = vld [vmem:[%s1998_s29 + $0xf40] sm:$0xff] }
 0x236   : > { %v1361_v60 = vadd.f32 %v1360_v59, %v1338_v54 }
 0x238   : > { %1551 = vmatpush.xpose.msra.mxu0 %v769_v9  ;;  %1597 = vmatpush.xpose.msra.mxu2 %v771_v37  ;;  %1648 = vst [vmem:[%s2381_s24 + $0x48] sm:$0xff] %v1361_v60  ;;  %v710_v9 = vld [vmem:[%s1998_s29 + $0xf48] sm:$0xff]  ;;  %v712_v37 = vld [vmem:[%s1998_s29 + $0xf58] sm:$0xff] }
 0x239   : > { %1574 = vmatpush.xpose.msra.mxu1 %v770_v36  ;;  %1620 = vmatpush.xpose.msra.mxu3 %v772_v28  ;;  %v704_v36 = vld [vmem:[%s1998_s29 + $0xf18] sm:$0xff]  ;;  %v706_v28 = vld [vmem:[%s1998_s29 + $0xf28] sm:$0xff]  ;;  %s1779_s29 = smul.u32 (%p1968_p9), 48, %s1946_s16 }
 0x23b   : > { %s1660_s26 = scalar_lea.vmem (%p1968_p9), %s2879_s3, %s1779_s29 }
 0x23c   : > { %1552 = vmatpush.xpose.msra.mxu0 %v763_v12  ;;  %1598 = vmatpush.xpose.msra.mxu2 %v765_v14  ;;  %v803_v12 = vperm.slane %v2740_v39, 4 }
 0x23d   : > { %1575 = vmatpush.xpose.msra.mxu1 %v764_v44  ;;  %1621 = vmatpush.xpose.msra.mxu3 %v766_v15 }
 0x240   : > { %1553 = vmatpush.xpose.msra.mxu0 %v757_v16  ;;  %1599 = vmatpush.xpose.msra.mxu2 %v759_v19 }
 0x241   : > { %1576 = vmatpush.xpose.msra.mxu1 %v758_v20  ;;  %1622 = vmatpush.xpose.msra.mxu3 %v760_v21 }
 0x244   : > { %1554 = vmatpush.xpose.msra.mxu0 %v751_v22  ;;  %1600 = vmatpush.xpose.msra.mxu2 %v753_v23 }
 0x245   : > { %1577 = vmatpush.xpose.msra.mxu1 %v752_v27  ;;  %1623 = vmatpush.xpose.msra.mxu3 %v754_v13 }
 0x248   : > { %1555 = vmatpush.xpose.msra.mxu0 %v745_v30  ;;  %1601 = vmatpush.xpose.msra.mxu2 %v747_v31 }
 0x249   : > { %1578 = vmatpush.xpose.msra.mxu1 %v746_v33  ;;  %1624 = vmatpush.xpose.msra.mxu3 %v748_v35 }
 0x24c   : > { %1556 = vmatpush.xpose.msra.mxu0 %v739_v40  ;;  %1602 = vmatpush.xpose.msra.mxu2 %v741_v42  ;;  %v804_v40 = vperm.slane %v2740_v39, 5 }
 0x24d   : > { %1579 = vmatpush.xpose.msra.mxu1 %v740_v47  ;;  %1625 = vmatpush.xpose.msra.mxu3 %v742_v48 }
 0x250   : > { %1557 = vmatpush.xpose.msra.mxu0 %v733_v49  ;;  %1603 = vmatpush.xpose.msra.mxu2 %v735_v53 }
 0x251   : > { %1580 = vmatpush.xpose.msra.mxu1 %v734_v55  ;;  %1626 = vmatpush.xpose.msra.mxu3 %v736_v58 }
 0x254   : > { %1558 = vmatpush.xpose.msra.mxu0 %v727_v61  ;;  %1604 = vmatpush.xpose.msra.mxu2 %v729_v62 }
 0x255   : > { %1581 = vmatpush.xpose.msra.mxu1 %v728_v63  ;;  %1627 = vmatpush.xpose.msra.mxu3 %v730_v26 }
 0x258   : > { %1559 = vmatpush.xpose.msra.mxu0 %v721_v2  ;;  %1605 = vmatpush.xpose.msra.mxu2 %v723_v4 }
 0x259   : > { %1582 = vmatpush.xpose.msra.mxu1 %v722_v17  ;;  %1628 = vmatpush.xpose.msra.mxu3 %v724_v5  ;;  %v1673_v17 = vld [vmem:[%s2381_s24] sm:$0xff] (%p1968_p9)  ;;  %v1675_v5 = vld [vmem:[%s2381_s24 + $0x8] sm:$0xff] (%p1968_p9) }
 0x25a   : > { %1674 = vst [vmem:[%s1660_s26] sm:$0xff] (%p1968_p9), %v1673_v17 }
 0x25b   : > { %1676 = vst [vmem:[%s1660_s26 + $0x8] sm:$0xff] (%p1968_p9), %v1675_v5 }
 0x25c   : > { %1560 = vmatpush.xpose.msra.mxu0 %v715_v29  ;;  %1606 = vmatpush.xpose.msra.mxu2 %v717_v38  ;;  %v1677_v29 = vld [vmem:[%s2381_s24 + $0x10] sm:$0xff] (%p1968_p9)  ;;  %v1679_v38 = vld [vmem:[%s2381_s24 + $0x18] sm:$0xff] (%p1968_p9) }
 0x25d   : > { %1583 = vmatpush.xpose.msra.mxu1 %v716_v6  ;;  %1629 = vmatpush.xpose.msra.mxu3 %v718_v7  ;;  %1678 = vst [vmem:[%s1660_s26 + $0x10] sm:$0xff] (%p1968_p9), %v1677_v29 }
 0x25e   : > { %1680 = vst [vmem:[%s1660_s26 + $0x18] sm:$0xff] (%p1968_p9), %v1679_v38 }
 0x260   : > { %1561 = vmatpush.xpose.msra.mxu0 %v709_v10  ;;  %1607 = vmatpush.xpose.msra.mxu2 %v711_v8  ;;  %v1685_v10 = vld [vmem:[%s2381_s24 + $0x30] sm:$0xff] (%p1968_p9)  ;;  %v1687_v8 = vld [vmem:[%s2381_s24 + $0x38] sm:$0xff] (%p1968_p9) }
 0x261   : > { %1584 = vmatpush.xpose.msra.mxu1 %v710_v9  ;;  %1630 = vmatpush.xpose.msra.mxu3 %v712_v37  ;;  %v1689_v9 = vld [vmem:[%s2381_s24 + $0x40] sm:$0xff] (%p1968_p9)  ;;  %1686 = vst [vmem:[%s1660_s26 + $0x90] sm:$0xff] (%p1968_p9), %v1685_v10  ;;  %v1691_v37 = vld [vmem:[%s2381_s24 + $0x48] sm:$0xff] (%p1968_p9) }
 0x262   : > { %1688 = vst [vmem:[%s1660_s26 + $0x98] sm:$0xff] (%p1968_p9), %v1687_v8 }
 0x263   : > { %1690 = vst [vmem:[%s1660_s26 + $0xa0] sm:$0xff] (%p1968_p9), %v1689_v9 }
 0x264   : > { %1562 = vmatpush.xpose.msra.mxu0 %v703_v24  ;;  %1608 = vmatpush.xpose.msra.mxu2 %v705_v41  ;;  %v1380_v11 = vpop.f32.mrf.mxu0  ;;  %1692 = vst [vmem:[%s1660_s26 + $0xa8] sm:$0xff] (%p1968_p9), %v1691_v37 }
 0x265   : > { %1585 = vmatpush.xpose.msra.mxu1 %v704_v36  ;;  %1631 = vmatpush.xpose.msra.mxu3 %v706_v28  ;;  %v1381_v44 = vadd.f32 %v1380_v11, %v803_v12 }
 0x267   : > { %1563 = vmatmul.f32.vlgmr.msra.gmra.mxu0 %v2563_v52  ;;  %1609 = vmatmul.f32.vlgmr.msra.gmra.mxu2 %v2557_v51  ;;  %v1403_v14 = vpop.f32.mrf.mxu1 }
 0x268   : > { %1586 = vmatmul.f32.vlgmr.msra.gmra.mxu1 %v2577_v57  ;;  %1632 = vmatmul.f32.vlgmr.msra.gmra.mxu3 %v2571_v56  ;;  %v1404_v52 = vadd.f32 %v1403_v14, %v1381_v44 }
 0x26a   : > { %v1426_v15 = vpop.f32.mrf.mxu2 }
 0x26b   : > { %v1427_v56 = vadd.f32 %v1426_v15, %v1404_v52 }
 0x26c   : > { %v1383_v51 = vpop.f32.mrf.mxu0 }
 0x26d   : > { %v1384_v16 = vadd.f32 %v1383_v51, %v803_v12  ;;  %v1449_v19 = vpop.f32.mrf.mxu3 }
 0x26f   : > { %1566 = vmatmul.f32.gmra.mxu0 %v2595_v1  ;;  %1612 = vmatmul.f32.gmra.mxu2 %v2589_v0  ;;  %v1406_v57 = vpop.f32.mrf.mxu1  ;;  %v1450_v0 = vadd.f32 %v1449_v19, %v1427_v56 }
 0x270   : > { %1589 = vmatmul.f32.gmra.mxu1 %v2609_v3  ;;  %1635 = vmatmul.f32.gmra.mxu3 %v2603_v34  ;;  %v1407_v1 = vadd.f32 %v1406_v57, %v1384_v16 }
 0x272   : > { %v1429_v20 = vpop.f32.mrf.mxu2 }
 0x273   : > { %v1430_v34 = vadd.f32 %v1429_v20, %v1407_v1 }
 0x275   : > { %v1452_v23 = vpop.f32.mrf.mxu3 }
 0x276   : > { %v1453_v27 = vadd.f32 %v1452_v23, %v1430_v34 }
 0x2a4   : > { %v1472_v3 = vpop.f32.mrf.mxu0 }
 0x2a5   : > { %v1473_v21 = vadd.f32 %v1472_v3, %v1450_v0 }
 0x2a7   : > { %v1495_v22 = vpop.f32.mrf.mxu1 }
 0x2a8   : > { %v1496_v25 = vadd.f32 %v1495_v22, %v1473_v21 }
 0x2aa   : > { %1643 = vst [vmem:[%s2381_s24 + $0x20] sm:$0xff] %v1496_v25  ;;  %v1518_v33 = vpop.f32.mrf.mxu2 }
 0x2ab   : > { %v1519_v42 = vadd.f32 %v1518_v33, %v804_v40 }
 0x2ac   : > { %v1475_v13 = vpop.f32.mrf.mxu0 }
 0x2ad   : > { %v1476_v30 = vadd.f32 %v1475_v13, %v1453_v27  ;;  %v1541_v35 = vpop.f32.mrf.mxu3 }
 0x2ae   : > { %v1542_v46 = vadd.f32 %v1541_v35, %v1519_v42 }
 0x2af   : > { %v1498_v31 = vpop.f32.mrf.mxu1 }
 0x2b0   : > { %v1499_v32 = vadd.f32 %v1498_v31, %v1476_v30 }
 0x2b1   : > { %v1681_v6 = vld [vmem:[%s2381_s24 + $0x20] sm:$0xff] (%p1968_p9) }
 0x2b2   : > { %1649 = vst [vmem:[%s2381_s24 + $0x50] sm:$0xff] %v1499_v32  ;;  %v1521_v43 = vpop.f32.mrf.mxu2 }
 0x2b3   : > { %v1522_v45 = vadd.f32 %v1521_v43, %v804_v40  ;;  %1682 = vst [vmem:[%s1660_s26 + $0x20] sm:$0xff] (%p1968_p9), %v1681_v6 }
 0x2b5   : > { %v1544_v50 = vpop.f32.mrf.mxu3 }
 0x2b6   : > { %v1545_v54 = vadd.f32 %v1544_v50, %v1522_v45 }
 0x2b9   : > { %v1693_v24 = vld [vmem:[%s2381_s24 + $0x50] sm:$0xff] (%p1968_p9) }
 0x2ba   : > { %1694 = vst [vmem:[%s1660_s26 + $0xb0] sm:$0xff] (%p1968_p9), %v1693_v24 }
 0x2e4   : > { %v1564_v47 = vpop.f32.mrf.mxu0 }
 0x2e5   : > { %v1565_v48 = vadd.f32 %v1564_v47, %v1542_v46  ;;  %v1587_v18 = vpop.f32.mrf.mxu1 }
 0x2e7   : > { %v1588_v49 = vadd.f32 %v1587_v18, %v1565_v48 }
 0x2ea   : > { %v1610_v53 = vpop.f32.mrf.mxu2 }
 0x2eb   : > { %v1611_v55 = vadd.f32 %v1610_v53, %v1588_v49  ;;  %v1633_v59 = vpop.f32.mrf.mxu3 }
 0x2ec   : > { %v1567_v58 = vpop.f32.mrf.mxu0 }
 0x2ed   : > { %v1568_v60 = vadd.f32 %v1567_v58, %v1545_v54  ;;  %v1634_v61 = vadd.f32 %v1633_v59, %v1611_v55  ;;  %v1590_v62 = vpop.f32.mrf.mxu1 }
 0x2ef   : > { %1644 = vst [vmem:[%s2381_s24 + $0x28] sm:$0xff] %v1634_v61  ;;  %v1591_v39 = vadd.f32 %v1590_v62, %v1568_v60 }
 0x2f2   : > { %v1613_v63 = vpop.f32.mrf.mxu2 }
 0x2f3   : > { %v1614_v26 = vadd.f32 %v1613_v63, %v1591_v39  ;;  %v1636_v2 = vpop.f32.mrf.mxu3  ;;  %1657 = sbr.rel (!%p1968_p9) target bundleno = 768 (0x300), region = 40 }
 0x2f5   : > { %v1637_v4 = vadd.f32 %v1636_v2, %v1614_v26 }
 0x2f6   : > { %v1683_v7 = vld [vmem:[%s2381_s24 + $0x28] sm:$0xff] (%p1968_p9) }
 0x2f7   : > { %1650 = vst [vmem:[%s2381_s24 + $0x58] sm:$0xff] %v1637_v4 }
 0x2f8   : > { %1684 = vst [vmem:[%s1660_s26 + $0x28] sm:$0xff] %v1683_v7 }
 0x2fe   : > { %v1695_v41 = vld [vmem:[%s2381_s24 + $0x58] sm:$0xff] }
 0x2ff   : > { %1696 = vst [vmem:[%s1660_s26 + $0xb8] sm:$0xff] %v1695_v41 }
 0x300 PF: > { %p13_p9 = scmp.ge.s32.totalorder %s1949_s17, 5   ;;  %s2883_s12 = smov %s1895_s13 }
 0x301   : > { %s2884_s13 = smov %s1899_s14  ;;  %s2885_s14 = smov %s1959_s20 }
 0x302   : > { %s2886_s15 = smov %s1949_s17  ;;  %15 = sbr.rel (!%p13_p9) target bundleno = 3 (0x3), region = 98 }
 0x307   :  { %1712 = vsyncpa [#allocation3], 1 }
 0x308   :  { %1714 = vsyncpa [#allocation3 + $0x1], 1 }

</bundles_post_ra>
